<compile_context>
chip_gen: v7x
topology: tpu7x:2x2x1
jax: 0.10.0
libtpu: 0.0.40
codegen_flags: <defaults>
</compile_context>

<pallas_src>
import functools
import math

import jax
import jax.numpy as jnp
from jax.experimental import pallas as pl
from jax.experimental.pallas import tpu as pltpu  # noqa: F401  (TPU backend)


# ----------------------------- Fused Pallas kernel -----------------------------

def _fused_decoder_kernel(
    mem_ref,                       # (B*S, E)   batch-major memory slab
    sa_qkv_w_ref, sa_qkv_b_ref,    # (L, E, 3E), (L, 1, 3E)   packed self-attn QKV proj
    sa_wo_ref, sa_bo_ref,          # (L, E, E),  (L, 1, E)
    ca_q_w_ref, ca_q_b_ref,        # (L, E, E),  (L, 1, E)
    ca_kv_w_ref, ca_kv_b_ref,      # (L, E, 2E), (L, 1, 2E)   packed cross-attn KV proj
    ca_wo_ref, ca_bo_ref,          # (L, E, E),  (L, 1, E)
    ff_w1_ref, ff_b1_ref,          # (L, E, FF), (L, 1, FF)
    ff_w2_ref, ff_b2_ref,          # (L, FF, E), (L, 1, E)
    ln1_g_ref, ln1_b_ref,          # (L, 1, E) each
    ln2_g_ref, ln2_b_ref,
    ln3_g_ref, ln3_b_ref,
    fc_w_ref, fc_b_ref,            # (E, O), (1, O)
    out_ref,                       # (B*T, O)   batch-major output slab
    *, T, S, B, E, H, L):
    Dh = E // H
    scale = 1.0 / math.sqrt(Dh)

    def matmul(x, w, b):
        y = jax.lax.dot_general(x, w, (((1,), (0,)), ((), ())),
                                preferred_element_type=jnp.float32)
        return y + b

    def layernorm(x, g, b):
        mu = jnp.mean(x, axis=-1, keepdims=True)
        var = jnp.mean((x - mu) ** 2, axis=-1, keepdims=True)
        return (x - mu) * jax.lax.rsqrt(var + 1e-5) * g + b

    def attention(q2d, k2d, v2d, Tq, Tk):
        # q2d: (B*Tq, E), k2d/v2d: (B*Tk, E).  Batch-major rows, heads packed along lanes.
        # Fully unrolled over (B, H) inside the single kernel -- no grid-step overhead.
        rows = []
        for b in range(B):
            q_b = q2d[b * Tq:(b + 1) * Tq, :]
            k_b = k2d[b * Tk:(b + 1) * Tk, :]
            v_b = v2d[b * Tk:(b + 1) * Tk, :]
            heads = []
            for h in range(H):
                qh = q_b[:, h * Dh:(h + 1) * Dh]             # (Tq, Dh)
                kh = k_b[:, h * Dh:(h + 1) * Dh]             # (Tk, Dh)
                vh = v_b[:, h * Dh:(h + 1) * Dh]             # (Tk, Dh)
                # scores: contract the head dim of q and k directly (no k.T materialization)
                s = jax.lax.dot_general(qh, kh, (((1,), (1,)), ((), ())),
                                        preferred_element_type=jnp.float32) * scale
                m = jnp.max(s, axis=-1, keepdims=True)
                p = jnp.exp(s - m)
                p = p * pl.reciprocal(jnp.sum(p, axis=-1, keepdims=True), approx=True)
                heads.append(jax.lax.dot_general(p, vh, (((1,), (0,)), ((), ())),
                                                 preferred_element_type=jnp.float32))
            rows.append(jnp.concatenate(heads, axis=-1))      # (Tq, E)
        return jnp.concatenate(rows, axis=0)                  # (B*Tq, E)

    mem2d = mem_ref[...].astype(jnp.float32)                  # (B*S, E), stays in VMEM
    x = jnp.zeros((B * T, E), jnp.float32)                    # tgt = torch.zeros(...)

    for l in range(L):                                        # static unroll over layers
        # ---- self-attention block (packed QKV projection: one (E,3E) matmul) ----
        qkv = matmul(x, sa_qkv_w_ref[l], sa_qkv_b_ref[l])     # (B*T, 3E)
        sa = attention(qkv[:, 0:E], qkv[:, E:2 * E], qkv[:, 2 * E:3 * E], T, T)
        sa = matmul(sa, sa_wo_ref[l], sa_bo_ref[l])
        x = layernorm(x + sa, ln1_g_ref[l], ln1_b_ref[l])

        # ---- cross-attention block (packed KV projection of memory) ----
        qc = matmul(x, ca_q_w_ref[l], ca_q_b_ref[l])          # (B*T, E)
        kv = matmul(mem2d, ca_kv_w_ref[l], ca_kv_b_ref[l])    # (B*S, 2E)
        ca = attention(qc, kv[:, 0:E], kv[:, E:2 * E], T, S)
        ca = matmul(ca, ca_wo_ref[l], ca_bo_ref[l])
        x = layernorm(x + ca, ln2_g_ref[l], ln2_b_ref[l])

        # ---- feed-forward block (w1 + relu + w2 fused) ----
        h1 = jnp.maximum(matmul(x, ff_w1_ref[l], ff_b1_ref[l]), 0.0)
        ff = matmul(h1, ff_w2_ref[l], ff_b2_ref[l])
        x = layernorm(x + ff, ln3_g_ref[l], ln3_b_ref[l])

    # ---- final fc, single lane-contiguous HBM store ----
    out_ref[...] = matmul(x, fc_w_ref[...], fc_b_ref[...]).astype(out_ref.dtype)


# ----------------------------- Wrapper -----------------------------

def transformer_decoder_forward(seq_len, memory, params, nhead):
    """Matches TransformerDecoder.forward(seq_len, memory): tgt = zeros, seq-major I/O."""
    S, B, E = memory.shape
    T = int(seq_len)
    L = params["sa_qkv_w"].shape[0]
    O = params["fc_w"].shape[1]

    # One-time layout change outside the kernel: (S, B, E) -> batch-major 2-D slab.
    mem2d = memory.transpose(1, 0, 2).reshape(B * S, E)

    kernel = functools.partial(_fused_decoder_kernel, T=T, S=S, B=B, E=E, H=nhead, L=L)
    out2d = pl.pallas_call(
        kernel,
        out_shape=jax.ShapeDtypeStruct((B * T, O), jnp.float32),
        # No grid / no BlockSpecs: every operand is small and placed whole in VMEM.
    )(
        mem2d,
        params["sa_qkv_w"], params["sa_qkv_b"],
        params["sa_wo"], params["sa_bo"],
        params["ca_q_w"], params["ca_q_b"],
        params["ca_kv_w"], params["ca_kv_b"],
        params["ca_wo"], params["ca_bo"],
        params["ff_w1"], params["ff_b1"],
        params["ff_w2"], params["ff_b2"],
        params["ln1_g"], params["ln1_b"],
        params["ln2_g"], params["ln2_b"],
        params["ln3_g"], params["ln3_b"],
        params["fc_w"], params["fc_b"],
    )
    return out2d.reshape(B, T, O).transpose(1, 0, 2)          # back to (T, B, O)


# ----------------------------- Param init -----------------------------

def init_params(key, E, FF, output_size, num_layers, dtype=jnp.float32):
    """Random params in the packed/stacked layout the fused kernel expects.

    Note: weights are (in, out); importing from PyTorch would require transposing its
    (out, in) weights and splitting in_proj_weight into the packed q|k|v layout used here.
    """
    L = num_layers
    s = 0.05
    ks = jax.random.split(key, 16)

    def w(k, shape):
        return s * jax.random.normal(k, shape, dtype)

    return {
        "sa_qkv_w": w(ks[0], (L, E, 3 * E)),
        "sa_qkv_b": w(ks[1], (L, 1, 3 * E)),
        "sa_wo":    w(ks[2], (L, E, E)),
        "sa_bo":    w(ks[3], (L, 1, E)),
        "ca_q_w":   w(ks[4], (L, E, E)),
        "ca_q_b":   w(ks[5], (L, 1, E)),
        "ca_kv_w":  w(ks[6], (L, E, 2 * E)),
        "ca_kv_b":  w(ks[7], (L, 1, 2 * E)),
        "ca_wo":    w(ks[8], (L, E, E)),
        "ca_bo":    w(ks[9], (L, 1, E)),
        "ff_w1":    w(ks[10], (L, E, FF)),
        "ff_b1":    w(ks[11], (L, 1, FF)),
        "ff_w2":    w(ks[12], (L, FF, E)),
        "ff_b2":    w(ks[13], (L, 1, E)),
        "ln1_g": jnp.ones((L, 1, E), dtype), "ln1_b": jnp.zeros((L, 1, E), dtype),
        "ln2_g": jnp.ones((L, 1, E), dtype), "ln2_b": jnp.zeros((L, 1, E), dtype),
        "ln3_g": jnp.ones((L, 1, E), dtype), "ln3_b": jnp.zeros((L, 1, E), dtype),
        "fc_w": w(ks[14], (E, output_size)),
        "fc_b": w(ks[15], (1, output_size)),
    }


# ----------------------------- Main -----------------------------

if __name__ == "__main__":
    # Small shapes consistent with the module: hidden=input=32, ff=64, nhead=4, 2 layers.
    seq_len = 8
    B, mem_len = 2, 8
    E, FF, nhead, num_layers, input_size = 32, 64, 4, 2, 32

    key = jax.random.PRNGKey(0)
    kmem, kpar = jax.random.split(key)
    memory = jax.random.normal(kmem, (mem_len, B, E), jnp.float32)  # (S, B, E), seq-major
    params = init_params(kpar, E, FF, input_size, num_layers)

    out = transformer_decoder_forward(seq_len, memory, params, nhead)
    out = jax.block_until_ready(out)
    assert out.shape == (seq_len, B, input_size)
    assert bool(jnp.all(jnp.isfinite(out)))
    print("KERNEL_OK")
</pallas_src>

<mosaic_0001>
module attributes {stable_mosaic.version = 11 : i64} {
  func.func @_fused_decoder_kernel(%arg0: memref<16x32xf32, #tpu.memory_space<vmem>>, %arg1: memref<2x32x96xf32, #tpu.memory_space<vmem>>, %arg2: memref<2x1x96xf32, #tpu.memory_space<vmem>>, %arg3: memref<2x32x32xf32, #tpu.memory_space<vmem>>, %arg4: memref<2x1x32xf32, #tpu.memory_space<vmem>>, %arg5: memref<2x32x32xf32, #tpu.memory_space<vmem>>, %arg6: memref<2x1x32xf32, #tpu.memory_space<vmem>>, %arg7: memref<2x32x64xf32, #tpu.memory_space<vmem>>, %arg8: memref<2x1x64xf32, #tpu.memory_space<vmem>>, %arg9: memref<2x32x32xf32, #tpu.memory_space<vmem>>, %arg10: memref<2x1x32xf32, #tpu.memory_space<vmem>>, %arg11: memref<2x32x64xf32, #tpu.memory_space<vmem>>, %arg12: memref<2x1x64xf32, #tpu.memory_space<vmem>>, %arg13: memref<2x64x32xf32, #tpu.memory_space<vmem>>, %arg14: memref<2x1x32xf32, #tpu.memory_space<vmem>>, %arg15: memref<2x1x32xf32, #tpu.memory_space<vmem>>, %arg16: memref<2x1x32xf32, #tpu.memory_space<vmem>>, %arg17: memref<2x1x32xf32, #tpu.memory_space<vmem>>, %arg18: memref<2x1x32xf32, #tpu.memory_space<vmem>>, %arg19: memref<2x1x32xf32, #tpu.memory_space<vmem>>, %arg20: memref<2x1x32xf32, #tpu.memory_space<vmem>>, %arg21: memref<32x32xf32, #tpu.memory_space<vmem>>, %arg22: memref<1x32xf32, #tpu.memory_space<vmem>>, %arg23: memref<16x32xf32, #tpu.memory_space<vmem>>) attributes {dimension_semantics = [], scalar_prefetch = 0 : i64, scratch_operands = 0 : i64, tpu.core_type = #tpu.core_type<tc>} {
    %c0 = arith.constant 0 : index
    %c0_0 = arith.constant 0 : index
    %0 = vector.load %arg0[%c0, %c0_0] : memref<16x32xf32, #tpu.memory_space<vmem>>, vector<16x32xf32>
    %cst = arith.constant 0.000000e+00 : f32
    %1 = vector.broadcast %cst : f32 to vector<16x32xf32>
    %c0_1 = arith.constant 0 : index
    %c0_2 = arith.constant 0 : index
    %c0_3 = arith.constant 0 : index
    %2 = vector.load %arg1[%c0_1, %c0_2, %c0_3] : memref<2x32x96xf32, #tpu.memory_space<vmem>>, vector<1x32x96xf32>
    %3 = vector.shape_cast %2 : vector<1x32x96xf32> to vector<32x96xf32>
    %c0_4 = arith.constant 0 : index
    %c0_5 = arith.constant 0 : index
    %c0_6 = arith.constant 0 : index
    %4 = vector.load %arg2[%c0_4, %c0_5, %c0_6] : memref<2x1x96xf32, #tpu.memory_space<vmem>>, vector<1x1x96xf32>
    %5 = vector.shape_cast %4 : vector<1x1x96xf32> to vector<1x96xf32>
    %cst_7 = arith.constant dense<0.000000e+00> : vector<16x96xf32>
    %6 = tpu.matmul %1, %3, %cst_7 {dimension_numbers = #tpu.dot_dimension_numbers<[1], [0], [0], [1], [0, 0, 1, 1], [], []>} : vector<16x32xf32>, vector<32x96xf32>, vector<16x96xf32> -> vector<16x96xf32>
    %7 = vector.broadcast %5 : vector<1x96xf32> to vector<16x96xf32>
    %8 = arith.addf %6, %7 : vector<16x96xf32>
    %9 = vector.extract_strided_slice %8 {offsets = [0, 0], sizes = [16, 32], strides = [1, 1]} : vector<16x96xf32> to vector<16x32xf32>
    %10 = vector.extract_strided_slice %8 {offsets = [0, 32], sizes = [16, 32], strides = [1, 1]} : vector<16x96xf32> to vector<16x32xf32>
    %11 = vector.extract_strided_slice %8 {offsets = [0, 64], sizes = [16, 32], strides = [1, 1]} : vector<16x96xf32> to vector<16x32xf32>
    %12 = vector.extract_strided_slice %9 {offsets = [0, 0], sizes = [8, 32], strides = [1, 1]} : vector<16x32xf32> to vector<8x32xf32>
    %13 = vector.extract_strided_slice %10 {offsets = [0, 0], sizes = [8, 32], strides = [1, 1]} : vector<16x32xf32> to vector<8x32xf32>
    %14 = vector.extract_strided_slice %11 {offsets = [0, 0], sizes = [8, 32], strides = [1, 1]} : vector<16x32xf32> to vector<8x32xf32>
    %15 = vector.extract_strided_slice %12 {offsets = [0, 0], sizes = [8, 8], strides = [1, 1]} : vector<8x32xf32> to vector<8x8xf32>
    %16 = vector.extract_strided_slice %13 {offsets = [0, 0], sizes = [8, 8], strides = [1, 1]} : vector<8x32xf32> to vector<8x8xf32>
    %17 = vector.extract_strided_slice %14 {offsets = [0, 0], sizes = [8, 8], strides = [1, 1]} : vector<8x32xf32> to vector<8x8xf32>
    %cst_8 = arith.constant dense<0.000000e+00> : vector<8x8xf32>
    %18 = tpu.matmul %15, %16, %cst_8 {dimension_numbers = #tpu.dot_dimension_numbers<[1], [1], [0], [0], [0, 0, 1, 0], [], []>} : vector<8x8xf32>, vector<8x8xf32>, vector<8x8xf32> -> vector<8x8xf32>
    %cst_9 = arith.constant 0.353553385 : f32
    %19 = vector.broadcast %cst_9 : f32 to vector<8x8xf32>
    %20 = arith.mulf %18, %19 : vector<8x8xf32>
    %cst_10 = arith.constant dense<0xFF800000> : vector<8xf32>
    %21 = vector.multi_reduction <maximumf>, %20, %cst_10 [1] : vector<8x8xf32> to vector<8xf32>
    %22 = vector.shape_cast %21 : vector<8xf32> to vector<8x1xf32>
    %23 = vector.broadcast %22 : vector<8x1xf32> to vector<8x8xf32>
    %24 = arith.subf %20, %23 : vector<8x8xf32>
    %25 = math.exp %24 : vector<8x8xf32>
    %cst_11 = arith.constant dense<0.000000e+00> : vector<8xf32>
    %26 = vector.multi_reduction <add>, %25, %cst_11 [1] : vector<8x8xf32> to vector<8xf32>
    %27 = vector.shape_cast %26 : vector<8xf32> to vector<8x1xf32>
    %28 = tpu.reciprocal %27 {approx = true} : vector<8x1xf32> -> vector<8x1xf32>
    %29 = vector.broadcast %28 : vector<8x1xf32> to vector<8x8xf32>
    %30 = arith.mulf %25, %29 : vector<8x8xf32>
    %cst_12 = arith.constant dense<0.000000e+00> : vector<8x8xf32>
    %31 = tpu.matmul %30, %17, %cst_12 {dimension_numbers = #tpu.dot_dimension_numbers<[1], [0], [0], [1], [0, 0, 1, 1], [], []>} : vector<8x8xf32>, vector<8x8xf32>, vector<8x8xf32> -> vector<8x8xf32>
    %32 = vector.extract_strided_slice %12 {offsets = [0, 8], sizes = [8, 8], strides = [1, 1]} : vector<8x32xf32> to vector<8x8xf32>
    %33 = vector.extract_strided_slice %13 {offsets = [0, 8], sizes = [8, 8], strides = [1, 1]} : vector<8x32xf32> to vector<8x8xf32>
    %34 = vector.extract_strided_slice %14 {offsets = [0, 8], sizes = [8, 8], strides = [1, 1]} : vector<8x32xf32> to vector<8x8xf32>
    %cst_13 = arith.constant dense<0.000000e+00> : vector<8x8xf32>
    %35 = tpu.matmul %32, %33, %cst_13 {dimension_numbers = #tpu.dot_dimension_numbers<[1], [1], [0], [0], [0, 0, 1, 0], [], []>} : vector<8x8xf32>, vector<8x8xf32>, vector<8x8xf32> -> vector<8x8xf32>
    %cst_14 = arith.constant 0.353553385 : f32
    %36 = vector.broadcast %cst_14 : f32 to vector<8x8xf32>
    %37 = arith.mulf %35, %36 : vector<8x8xf32>
    %cst_15 = arith.constant dense<0xFF800000> : vector<8xf32>
    %38 = vector.multi_reduction <maximumf>, %37, %cst_15 [1] : vector<8x8xf32> to vector<8xf32>
    %39 = vector.shape_cast %38 : vector<8xf32> to vector<8x1xf32>
    %40 = vector.broadcast %39 : vector<8x1xf32> to vector<8x8xf32>
    %41 = arith.subf %37, %40 : vector<8x8xf32>
    %42 = math.exp %41 : vector<8x8xf32>
    %cst_16 = arith.constant dense<0.000000e+00> : vector<8xf32>
    %43 = vector.multi_reduction <add>, %42, %cst_16 [1] : vector<8x8xf32> to vector<8xf32>
    %44 = vector.shape_cast %43 : vector<8xf32> to vector<8x1xf32>
    %45 = tpu.reciprocal %44 {approx = true} : vector<8x1xf32> -> vector<8x1xf32>
    %46 = vector.broadcast %45 : vector<8x1xf32> to vector<8x8xf32>
    %47 = arith.mulf %42, %46 : vector<8x8xf32>
    %cst_17 = arith.constant dense<0.000000e+00> : vector<8x8xf32>
    %48 = tpu.matmul %47, %34, %cst_17 {dimension_numbers = #tpu.dot_dimension_numbers<[1], [0], [0], [1], [0, 0, 1, 1], [], []>} : vector<8x8xf32>, vector<8x8xf32>, vector<8x8xf32> -> vector<8x8xf32>
    %49 = vector.extract_strided_slice %12 {offsets = [0, 16], sizes = [8, 8], strides = [1, 1]} : vector<8x32xf32> to vector<8x8xf32>
    %50 = vector.extract_strided_slice %13 {offsets = [0, 16], sizes = [8, 8], strides = [1, 1]} : vector<8x32xf32> to vector<8x8xf32>
    %51 = vector.extract_strided_slice %14 {offsets = [0, 16], sizes = [8, 8], strides = [1, 1]} : vector<8x32xf32> to vector<8x8xf32>
    %cst_18 = arith.constant dense<0.000000e+00> : vector<8x8xf32>
    %52 = tpu.matmul %49, %50, %cst_18 {dimension_numbers = #tpu.dot_dimension_numbers<[1], [1], [0], [0], [0, 0, 1, 0], [], []>} : vector<8x8xf32>, vector<8x8xf32>, vector<8x8xf32> -> vector<8x8xf32>
    %cst_19 = arith.constant 0.353553385 : f32
    %53 = vector.broadcast %cst_19 : f32 to vector<8x8xf32>
    %54 = arith.mulf %52, %53 : vector<8x8xf32>
    %cst_20 = arith.constant dense<0xFF800000> : vector<8xf32>
    %55 = vector.multi_reduction <maximumf>, %54, %cst_20 [1] : vector<8x8xf32> to vector<8xf32>
    %56 = vector.shape_cast %55 : vector<8xf32> to vector<8x1xf32>
    %57 = vector.broadcast %56 : vector<8x1xf32> to vector<8x8xf32>
    %58 = arith.subf %54, %57 : vector<8x8xf32>
    %59 = math.exp %58 : vector<8x8xf32>
    %cst_21 = arith.constant dense<0.000000e+00> : vector<8xf32>
    %60 = vector.multi_reduction <add>, %59, %cst_21 [1] : vector<8x8xf32> to vector<8xf32>
    %61 = vector.shape_cast %60 : vector<8xf32> to vector<8x1xf32>
    %62 = tpu.reciprocal %61 {approx = true} : vector<8x1xf32> -> vector<8x1xf32>
    %63 = vector.broadcast %62 : vector<8x1xf32> to vector<8x8xf32>
    %64 = arith.mulf %59, %63 : vector<8x8xf32>
    %cst_22 = arith.constant dense<0.000000e+00> : vector<8x8xf32>
    %65 = tpu.matmul %64, %51, %cst_22 {dimension_numbers = #tpu.dot_dimension_numbers<[1], [0], [0], [1], [0, 0, 1, 1], [], []>} : vector<8x8xf32>, vector<8x8xf32>, vector<8x8xf32> -> vector<8x8xf32>
    %66 = vector.extract_strided_slice %12 {offsets = [0, 24], sizes = [8, 8], strides = [1, 1]} : vector<8x32xf32> to vector<8x8xf32>
    %67 = vector.extract_strided_slice %13 {offsets = [0, 24], sizes = [8, 8], strides = [1, 1]} : vector<8x32xf32> to vector<8x8xf32>
    %68 = vector.extract_strided_slice %14 {offsets = [0, 24], sizes = [8, 8], strides = [1, 1]} : vector<8x32xf32> to vector<8x8xf32>
    %cst_23 = arith.constant dense<0.000000e+00> : vector<8x8xf32>
    %69 = tpu.matmul %66, %67, %cst_23 {dimension_numbers = #tpu.dot_dimension_numbers<[1], [1], [0], [0], [0, 0, 1, 0], [], []>} : vector<8x8xf32>, vector<8x8xf32>, vector<8x8xf32> -> vector<8x8xf32>
    %cst_24 = arith.constant 0.353553385 : f32
    %70 = vector.broadcast %cst_24 : f32 to vector<8x8xf32>
    %71 = arith.mulf %69, %70 : vector<8x8xf32>
    %cst_25 = arith.constant dense<0xFF800000> : vector<8xf32>
    %72 = vector.multi_reduction <maximumf>, %71, %cst_25 [1] : vector<8x8xf32> to vector<8xf32>
    %73 = vector.shape_cast %72 : vector<8xf32> to vector<8x1xf32>
    %74 = vector.broadcast %73 : vector<8x1xf32> to vector<8x8xf32>
    %75 = arith.subf %71, %74 : vector<8x8xf32>
    %76 = math.exp %75 : vector<8x8xf32>
    %cst_26 = arith.constant dense<0.000000e+00> : vector<8xf32>
    %77 = vector.multi_reduction <add>, %76, %cst_26 [1] : vector<8x8xf32> to vector<8xf32>
    %78 = vector.shape_cast %77 : vector<8xf32> to vector<8x1xf32>
    %79 = tpu.reciprocal %78 {approx = true} : vector<8x1xf32> -> vector<8x1xf32>
    %80 = vector.broadcast %79 : vector<8x1xf32> to vector<8x8xf32>
    %81 = arith.mulf %76, %80 : vector<8x8xf32>
    %cst_27 = arith.constant dense<0.000000e+00> : vector<8x8xf32>
    %82 = tpu.matmul %81, %68, %cst_27 {dimension_numbers = #tpu.dot_dimension_numbers<[1], [0], [0], [1], [0, 0, 1, 1], [], []>} : vector<8x8xf32>, vector<8x8xf32>, vector<8x8xf32> -> vector<8x8xf32>
    %83 = tpu.concatenate %31, %48, %65, %82 in 1 : vector<8x8xf32>, vector<8x8xf32>, vector<8x8xf32>, vector<8x8xf32> -> vector<8x32xf32>
    %84 = vector.extract_strided_slice %9 {offsets = [8, 0], sizes = [8, 32], strides = [1, 1]} : vector<16x32xf32> to vector<8x32xf32>
    %85 = vector.extract_strided_slice %10 {offsets = [8, 0], sizes = [8, 32], strides = [1, 1]} : vector<16x32xf32> to vector<8x32xf32>
    %86 = vector.extract_strided_slice %11 {offsets = [8, 0], sizes = [8, 32], strides = [1, 1]} : vector<16x32xf32> to vector<8x32xf32>
    %87 = vector.extract_strided_slice %84 {offsets = [0, 0], sizes = [8, 8], strides = [1, 1]} : vector<8x32xf32> to vector<8x8xf32>
    %88 = vector.extract_strided_slice %85 {offsets = [0, 0], sizes = [8, 8], strides = [1, 1]} : vector<8x32xf32> to vector<8x8xf32>
    %89 = vector.extract_strided_slice %86 {offsets = [0, 0], sizes = [8, 8], strides = [1, 1]} : vector<8x32xf32> to vector<8x8xf32>
    %cst_28 = arith.constant dense<0.000000e+00> : vector<8x8xf32>
    %90 = tpu.matmul %87, %88, %cst_28 {dimension_numbers = #tpu.dot_dimension_numbers<[1], [1], [0], [0], [0, 0, 1, 0], [], []>} : vector<8x8xf32>, vector<8x8xf32>, vector<8x8xf32> -> vector<8x8xf32>
    %cst_29 = arith.constant 0.353553385 : f32
    %91 = vector.broadcast %cst_29 : f32 to vector<8x8xf32>
    %92 = arith.mulf %90, %91 : vector<8x8xf32>
    %cst_30 = arith.constant dense<0xFF800000> : vector<8xf32>
    %93 = vector.multi_reduction <maximumf>, %92, %cst_30 [1] : vector<8x8xf32> to vector<8xf32>
    %94 = vector.shape_cast %93 : vector<8xf32> to vector<8x1xf32>
    %95 = vector.broadcast %94 : vector<8x1xf32> to vector<8x8xf32>
    %96 = arith.subf %92, %95 : vector<8x8xf32>
    %97 = math.exp %96 : vector<8x8xf32>
    %cst_31 = arith.constant dense<0.000000e+00> : vector<8xf32>
    %98 = vector.multi_reduction <add>, %97, %cst_31 [1] : vector<8x8xf32> to vector<8xf32>
    %99 = vector.shape_cast %98 : vector<8xf32> to vector<8x1xf32>
    %100 = tpu.reciprocal %99 {approx = true} : vector<8x1xf32> -> vector<8x1xf32>
    %101 = vector.broadcast %100 : vector<8x1xf32> to vector<8x8xf32>
    %102 = arith.mulf %97, %101 : vector<8x8xf32>
    %cst_32 = arith.constant dense<0.000000e+00> : vector<8x8xf32>
    %103 = tpu.matmul %102, %89, %cst_32 {dimension_numbers = #tpu.dot_dimension_numbers<[1], [0], [0], [1], [0, 0, 1, 1], [], []>} : vector<8x8xf32>, vector<8x8xf32>, vector<8x8xf32> -> vector<8x8xf32>
    %104 = vector.extract_strided_slice %84 {offsets = [0, 8], sizes = [8, 8], strides = [1, 1]} : vector<8x32xf32> to vector<8x8xf32>
    %105 = vector.extract_strided_slice %85 {offsets = [0, 8], sizes = [8, 8], strides = [1, 1]} : vector<8x32xf32> to vector<8x8xf32>
    %106 = vector.extract_strided_slice %86 {offsets = [0, 8], sizes = [8, 8], strides = [1, 1]} : vector<8x32xf32> to vector<8x8xf32>
    %cst_33 = arith.constant dense<0.000000e+00> : vector<8x8xf32>
    %107 = tpu.matmul %104, %105, %cst_33 {dimension_numbers = #tpu.dot_dimension_numbers<[1], [1], [0], [0], [0, 0, 1, 0], [], []>} : vector<8x8xf32>, vector<8x8xf32>, vector<8x8xf32> -> vector<8x8xf32>
    %cst_34 = arith.constant 0.353553385 : f32
    %108 = vector.broadcast %cst_34 : f32 to vector<8x8xf32>
    %109 = arith.mulf %107, %108 : vector<8x8xf32>
    %cst_35 = arith.constant dense<0xFF800000> : vector<8xf32>
    %110 = vector.multi_reduction <maximumf>, %109, %cst_35 [1] : vector<8x8xf32> to vector<8xf32>
    %111 = vector.shape_cast %110 : vector<8xf32> to vector<8x1xf32>
    %112 = vector.broadcast %111 : vector<8x1xf32> to vector<8x8xf32>
    %113 = arith.subf %109, %112 : vector<8x8xf32>
    %114 = math.exp %113 : vector<8x8xf32>
    %cst_36 = arith.constant dense<0.000000e+00> : vector<8xf32>
    %115 = vector.multi_reduction <add>, %114, %cst_36 [1] : vector<8x8xf32> to vector<8xf32>
    %116 = vector.shape_cast %115 : vector<8xf32> to vector<8x1xf32>
    %117 = tpu.reciprocal %116 {approx = true} : vector<8x1xf32> -> vector<8x1xf32>
    %118 = vector.broadcast %117 : vector<8x1xf32> to vector<8x8xf32>
    %119 = arith.mulf %114, %118 : vector<8x8xf32>
    %cst_37 = arith.constant dense<0.000000e+00> : vector<8x8xf32>
    %120 = tpu.matmul %119, %106, %cst_37 {dimension_numbers = #tpu.dot_dimension_numbers<[1], [0], [0], [1], [0, 0, 1, 1], [], []>} : vector<8x8xf32>, vector<8x8xf32>, vector<8x8xf32> -> vector<8x8xf32>
    %121 = vector.extract_strided_slice %84 {offsets = [0, 16], sizes = [8, 8], strides = [1, 1]} : vector<8x32xf32> to vector<8x8xf32>
    %122 = vector.extract_strided_slice %85 {offsets = [0, 16], sizes = [8, 8], strides = [1, 1]} : vector<8x32xf32> to vector<8x8xf32>
    %123 = vector.extract_strided_slice %86 {offsets = [0, 16], sizes = [8, 8], strides = [1, 1]} : vector<8x32xf32> to vector<8x8xf32>
    %cst_38 = arith.constant dense<0.000000e+00> : vector<8x8xf32>
    %124 = tpu.matmul %121, %122, %cst_38 {dimension_numbers = #tpu.dot_dimension_numbers<[1], [1], [0], [0], [0, 0, 1, 0], [], []>} : vector<8x8xf32>, vector<8x8xf32>, vector<8x8xf32> -> vector<8x8xf32>
    %cst_39 = arith.constant 0.353553385 : f32
    %125 = vector.broadcast %cst_39 : f32 to vector<8x8xf32>
    %126 = arith.mulf %124, %125 : vector<8x8xf32>
    %cst_40 = arith.constant dense<0xFF800000> : vector<8xf32>
    %127 = vector.multi_reduction <maximumf>, %126, %cst_40 [1] : vector<8x8xf32> to vector<8xf32>
    %128 = vector.shape_cast %127 : vector<8xf32> to vector<8x1xf32>
    %129 = vector.broadcast %128 : vector<8x1xf32> to vector<8x8xf32>
    %130 = arith.subf %126, %129 : vector<8x8xf32>
    %131 = math.exp %130 : vector<8x8xf32>
    %cst_41 = arith.constant dense<0.000000e+00> : vector<8xf32>
    %132 = vector.multi_reduction <add>, %131, %cst_41 [1] : vector<8x8xf32> to vector<8xf32>
    %133 = vector.shape_cast %132 : vector<8xf32> to vector<8x1xf32>
    %134 = tpu.reciprocal %133 {approx = true} : vector<8x1xf32> -> vector<8x1xf32>
    %135 = vector.broadcast %134 : vector<8x1xf32> to vector<8x8xf32>
    %136 = arith.mulf %131, %135 : vector<8x8xf32>
    %cst_42 = arith.constant dense<0.000000e+00> : vector<8x8xf32>
    %137 = tpu.matmul %136, %123, %cst_42 {dimension_numbers = #tpu.dot_dimension_numbers<[1], [0], [0], [1], [0, 0, 1, 1], [], []>} : vector<8x8xf32>, vector<8x8xf32>, vector<8x8xf32> -> vector<8x8xf32>
    %138 = vector.extract_strided_slice %84 {offsets = [0, 24], sizes = [8, 8], strides = [1, 1]} : vector<8x32xf32> to vector<8x8xf32>
    %139 = vector.extract_strided_slice %85 {offsets = [0, 24], sizes = [8, 8], strides = [1, 1]} : vector<8x32xf32> to vector<8x8xf32>
    %140 = vector.extract_strided_slice %86 {offsets = [0, 24], sizes = [8, 8], strides = [1, 1]} : vector<8x32xf32> to vector<8x8xf32>
    %cst_43 = arith.constant dense<0.000000e+00> : vector<8x8xf32>
    %141 = tpu.matmul %138, %139, %cst_43 {dimension_numbers = #tpu.dot_dimension_numbers<[1], [1], [0], [0], [0, 0, 1, 0], [], []>} : vector<8x8xf32>, vector<8x8xf32>, vector<8x8xf32> -> vector<8x8xf32>
    %cst_44 = arith.constant 0.353553385 : f32
    %142 = vector.broadcast %cst_44 : f32 to vector<8x8xf32>
    %143 = arith.mulf %141, %142 : vector<8x8xf32>
    %cst_45 = arith.constant dense<0xFF800000> : vector<8xf32>
    %144 = vector.multi_reduction <maximumf>, %143, %cst_45 [1] : vector<8x8xf32> to vector<8xf32>
    %145 = vector.shape_cast %144 : vector<8xf32> to vector<8x1xf32>
    %146 = vector.broadcast %145 : vector<8x1xf32> to vector<8x8xf32>
    %147 = arith.subf %143, %146 : vector<8x8xf32>
    %148 = math.exp %147 : vector<8x8xf32>
    %cst_46 = arith.constant dense<0.000000e+00> : vector<8xf32>
    %149 = vector.multi_reduction <add>, %148, %cst_46 [1] : vector<8x8xf32> to vector<8xf32>
    %150 = vector.shape_cast %149 : vector<8xf32> to vector<8x1xf32>
    %151 = tpu.reciprocal %150 {approx = true} : vector<8x1xf32> -> vector<8x1xf32>
    %152 = vector.broadcast %151 : vector<8x1xf32> to vector<8x8xf32>
    %153 = arith.mulf %148, %152 : vector<8x8xf32>
    %cst_47 = arith.constant dense<0.000000e+00> : vector<8x8xf32>
    %154 = tpu.matmul %153, %140, %cst_47 {dimension_numbers = #tpu.dot_dimension_numbers<[1], [0], [0], [1], [0, 0, 1, 1], [], []>} : vector<8x8xf32>, vector<8x8xf32>, vector<8x8xf32> -> vector<8x8xf32>
    %155 = tpu.concatenate %103, %120, %137, %154 in 1 : vector<8x8xf32>, vector<8x8xf32>, vector<8x8xf32>, vector<8x8xf32> -> vector<8x32xf32>
    %156 = tpu.concatenate %83, %155 in 0 : vector<8x32xf32>, vector<8x32xf32> -> vector<16x32xf32>
    %c0_48 = arith.constant 0 : index
    %c0_49 = arith.constant 0 : index
    %c0_50 = arith.constant 0 : index
    %157 = vector.load %arg3[%c0_48, %c0_49, %c0_50] : memref<2x32x32xf32, #tpu.memory_space<vmem>>, vector<1x32x32xf32>
    %158 = vector.shape_cast %157 : vector<1x32x32xf32> to vector<32x32xf32>
    %c0_51 = arith.constant 0 : index
    %c0_52 = arith.constant 0 : index
    %c0_53 = arith.constant 0 : index
    %159 = vector.load %arg4[%c0_51, %c0_52, %c0_53] : memref<2x1x32xf32, #tpu.memory_space<vmem>>, vector<1x1x32xf32>
    %160 = vector.shape_cast %159 : vector<1x1x32xf32> to vector<1x32xf32>
    %cst_54 = arith.constant dense<0.000000e+00> : vector<16x32xf32>
    %161 = tpu.matmul %156, %158, %cst_54 {dimension_numbers = #tpu.dot_dimension_numbers<[1], [0], [0], [1], [0, 0, 1, 1], [], []>} : vector<16x32xf32>, vector<32x32xf32>, vector<16x32xf32> -> vector<16x32xf32>
    %162 = vector.broadcast %160 : vector<1x32xf32> to vector<16x32xf32>
    %163 = arith.addf %161, %162 : vector<16x32xf32>
    %164 = arith.addf %1, %163 : vector<16x32xf32>
    %c0_55 = arith.constant 0 : index
    %c0_56 = arith.constant 0 : index
    %c0_57 = arith.constant 0 : index
    %165 = vector.load %arg15[%c0_55, %c0_56, %c0_57] : memref<2x1x32xf32, #tpu.memory_space<vmem>>, vector<1x1x32xf32>
    %166 = vector.shape_cast %165 : vector<1x1x32xf32> to vector<1x32xf32>
    %c0_58 = arith.constant 0 : index
    %c0_59 = arith.constant 0 : index
    %c0_60 = arith.constant 0 : index
    %167 = vector.load %arg16[%c0_58, %c0_59, %c0_60] : memref<2x1x32xf32, #tpu.memory_space<vmem>>, vector<1x1x32xf32>
    %168 = vector.shape_cast %167 : vector<1x1x32xf32> to vector<1x32xf32>
    %cst_61 = arith.constant dense<0.000000e+00> : vector<16xf32>
    %169 = vector.multi_reduction <add>, %164, %cst_61 [1] : vector<16x32xf32> to vector<16xf32>
    %170 = vector.shape_cast %169 : vector<16xf32> to vector<16x1xf32>
    %cst_62 = arith.constant 3.200000e+01 : f32
    %171 = vector.broadcast %cst_62 : f32 to vector<16x1xf32>
    %172 = arith.divf %170, %171 : vector<16x1xf32>
    %173 = vector.broadcast %172 : vector<16x1xf32> to vector<16x32xf32>
    %174 = arith.subf %164, %173 : vector<16x32xf32>
    %175 = arith.mulf %174, %174 : vector<16x32xf32>
    %cst_63 = arith.constant dense<0.000000e+00> : vector<16xf32>
    %176 = vector.multi_reduction <add>, %175, %cst_63 [1] : vector<16x32xf32> to vector<16xf32>
    %177 = vector.shape_cast %176 : vector<16xf32> to vector<16x1xf32>
    %cst_64 = arith.constant 3.200000e+01 : f32
    %178 = vector.broadcast %cst_64 : f32 to vector<16x1xf32>
    %179 = arith.divf %177, %178 : vector<16x1xf32>
    %180 = vector.broadcast %172 : vector<16x1xf32> to vector<16x32xf32>
    %181 = arith.subf %164, %180 : vector<16x32xf32>
    %cst_65 = arith.constant 9.99999974E-6 : f32
    %182 = vector.broadcast %cst_65 : f32 to vector<16x1xf32>
    %183 = arith.addf %179, %182 : vector<16x1xf32>
    %184 = math.rsqrt %183 : vector<16x1xf32>
    %185 = vector.broadcast %184 : vector<16x1xf32> to vector<16x32xf32>
    %186 = arith.mulf %181, %185 : vector<16x32xf32>
    %187 = vector.broadcast %166 : vector<1x32xf32> to vector<16x32xf32>
    %188 = arith.mulf %186, %187 : vector<16x32xf32>
    %189 = vector.broadcast %168 : vector<1x32xf32> to vector<16x32xf32>
    %190 = arith.addf %188, %189 : vector<16x32xf32>
    %c0_66 = arith.constant 0 : index
    %c0_67 = arith.constant 0 : index
    %c0_68 = arith.constant 0 : index
    %191 = vector.load %arg5[%c0_66, %c0_67, %c0_68] : memref<2x32x32xf32, #tpu.memory_space<vmem>>, vector<1x32x32xf32>
    %192 = vector.shape_cast %191 : vector<1x32x32xf32> to vector<32x32xf32>
    %c0_69 = arith.constant 0 : index
    %c0_70 = arith.constant 0 : index
    %c0_71 = arith.constant 0 : index
    %193 = vector.load %arg6[%c0_69, %c0_70, %c0_71] : memref<2x1x32xf32, #tpu.memory_space<vmem>>, vector<1x1x32xf32>
    %194 = vector.shape_cast %193 : vector<1x1x32xf32> to vector<1x32xf32>
    %cst_72 = arith.constant dense<0.000000e+00> : vector<16x32xf32>
    %195 = tpu.matmul %190, %192, %cst_72 {dimension_numbers = #tpu.dot_dimension_numbers<[1], [0], [0], [1], [0, 0, 1, 1], [], []>} : vector<16x32xf32>, vector<32x32xf32>, vector<16x32xf32> -> vector<16x32xf32>
    %196 = vector.broadcast %194 : vector<1x32xf32> to vector<16x32xf32>
    %197 = arith.addf %195, %196 : vector<16x32xf32>
    %c0_73 = arith.constant 0 : index
    %c0_74 = arith.constant 0 : index
    %c0_75 = arith.constant 0 : index
    %198 = vector.load %arg7[%c0_73, %c0_74, %c0_75] : memref<2x32x64xf32, #tpu.memory_space<vmem>>, vector<1x32x64xf32>
    %199 = vector.shape_cast %198 : vector<1x32x64xf32> to vector<32x64xf32>
    %c0_76 = arith.constant 0 : index
    %c0_77 = arith.constant 0 : index
    %c0_78 = arith.constant 0 : index
    %200 = vector.load %arg8[%c0_76, %c0_77, %c0_78] : memref<2x1x64xf32, #tpu.memory_space<vmem>>, vector<1x1x64xf32>
    %201 = vector.shape_cast %200 : vector<1x1x64xf32> to vector<1x64xf32>
    %cst_79 = arith.constant dense<0.000000e+00> : vector<16x64xf32>
    %202 = tpu.matmul %0, %199, %cst_79 {dimension_numbers = #tpu.dot_dimension_numbers<[1], [0], [0], [1], [0, 0, 1, 1], [], []>} : vector<16x32xf32>, vector<32x64xf32>, vector<16x64xf32> -> vector<16x64xf32>
    %203 = vector.broadcast %201 : vector<1x64xf32> to vector<16x64xf32>
    %204 = arith.addf %202, %203 : vector<16x64xf32>
    %205 = vector.extract_strided_slice %204 {offsets = [0, 0], sizes = [16, 32], strides = [1, 1]} : vector<16x64xf32> to vector<16x32xf32>
    %206 = vector.extract_strided_slice %204 {offsets = [0, 32], sizes = [16, 32], strides = [1, 1]} : vector<16x64xf32> to vector<16x32xf32>
    %207 = vector.extract_strided_slice %197 {offsets = [0, 0], sizes = [8, 32], strides = [1, 1]} : vector<16x32xf32> to vector<8x32xf32>
    %208 = vector.extract_strided_slice %205 {offsets = [0, 0], sizes = [8, 32], strides = [1, 1]} : vector<16x32xf32> to vector<8x32xf32>
    %209 = vector.extract_strided_slice %206 {offsets = [0, 0], sizes = [8, 32], strides = [1, 1]} : vector<16x32xf32> to vector<8x32xf32>
    %210 = vector.extract_strided_slice %207 {offsets = [0, 0], sizes = [8, 8], strides = [1, 1]} : vector<8x32xf32> to vector<8x8xf32>
    %211 = vector.extract_strided_slice %208 {offsets = [0, 0], sizes = [8, 8], strides = [1, 1]} : vector<8x32xf32> to vector<8x8xf32>
    %212 = vector.extract_strided_slice %209 {offsets = [0, 0], sizes = [8, 8], strides = [1, 1]} : vector<8x32xf32> to vector<8x8xf32>
    %cst_80 = arith.constant dense<0.000000e+00> : vector<8x8xf32>
    %213 = tpu.matmul %210, %211, %cst_80 {dimension_numbers = #tpu.dot_dimension_numbers<[1], [1], [0], [0], [0, 0, 1, 0], [], []>} : vector<8x8xf32>, vector<8x8xf32>, vector<8x8xf32> -> vector<8x8xf32>
    %cst_81 = arith.constant 0.353553385 : f32
    %214 = vector.broadcast %cst_81 : f32 to vector<8x8xf32>
    %215 = arith.mulf %213, %214 : vector<8x8xf32>
    %cst_82 = arith.constant dense<0xFF800000> : vector<8xf32>
    %216 = vector.multi_reduction <maximumf>, %215, %cst_82 [1] : vector<8x8xf32> to vector<8xf32>
    %217 = vector.shape_cast %216 : vector<8xf32> to vector<8x1xf32>
    %218 = vector.broadcast %217 : vector<8x1xf32> to vector<8x8xf32>
    %219 = arith.subf %215, %218 : vector<8x8xf32>
    %220 = math.exp %219 : vector<8x8xf32>
    %cst_83 = arith.constant dense<0.000000e+00> : vector<8xf32>
    %221 = vector.multi_reduction <add>, %220, %cst_83 [1] : vector<8x8xf32> to vector<8xf32>
    %222 = vector.shape_cast %221 : vector<8xf32> to vector<8x1xf32>
    %223 = tpu.reciprocal %222 {approx = true} : vector<8x1xf32> -> vector<8x1xf32>
    %224 = vector.broadcast %223 : vector<8x1xf32> to vector<8x8xf32>
    %225 = arith.mulf %220, %224 : vector<8x8xf32>
    %cst_84 = arith.constant dense<0.000000e+00> : vector<8x8xf32>
    %226 = tpu.matmul %225, %212, %cst_84 {dimension_numbers = #tpu.dot_dimension_numbers<[1], [0], [0], [1], [0, 0, 1, 1], [], []>} : vector<8x8xf32>, vector<8x8xf32>, vector<8x8xf32> -> vector<8x8xf32>
    %227 = vector.extract_strided_slice %207 {offsets = [0, 8], sizes = [8, 8], strides = [1, 1]} : vector<8x32xf32> to vector<8x8xf32>
    %228 = vector.extract_strided_slice %208 {offsets = [0, 8], sizes = [8, 8], strides = [1, 1]} : vector<8x32xf32> to vector<8x8xf32>
    %229 = vector.extract_strided_slice %209 {offsets = [0, 8], sizes = [8, 8], strides = [1, 1]} : vector<8x32xf32> to vector<8x8xf32>
    %cst_85 = arith.constant dense<0.000000e+00> : vector<8x8xf32>
    %230 = tpu.matmul %227, %228, %cst_85 {dimension_numbers = #tpu.dot_dimension_numbers<[1], [1], [0], [0], [0, 0, 1, 0], [], []>} : vector<8x8xf32>, vector<8x8xf32>, vector<8x8xf32> -> vector<8x8xf32>
    %cst_86 = arith.constant 0.353553385 : f32
    %231 = vector.broadcast %cst_86 : f32 to vector<8x8xf32>
    %232 = arith.mulf %230, %231 : vector<8x8xf32>
    %cst_87 = arith.constant dense<0xFF800000> : vector<8xf32>
    %233 = vector.multi_reduction <maximumf>, %232, %cst_87 [1] : vector<8x8xf32> to vector<8xf32>
    %234 = vector.shape_cast %233 : vector<8xf32> to vector<8x1xf32>
    %235 = vector.broadcast %234 : vector<8x1xf32> to vector<8x8xf32>
    %236 = arith.subf %232, %235 : vector<8x8xf32>
    %237 = math.exp %236 : vector<8x8xf32>
    %cst_88 = arith.constant dense<0.000000e+00> : vector<8xf32>
    %238 = vector.multi_reduction <add>, %237, %cst_88 [1] : vector<8x8xf32> to vector<8xf32>
    %239 = vector.shape_cast %238 : vector<8xf32> to vector<8x1xf32>
    %240 = tpu.reciprocal %239 {approx = true} : vector<8x1xf32> -> vector<8x1xf32>
    %241 = vector.broadcast %240 : vector<8x1xf32> to vector<8x8xf32>
    %242 = arith.mulf %237, %241 : vector<8x8xf32>
    %cst_89 = arith.constant dense<0.000000e+00> : vector<8x8xf32>
    %243 = tpu.matmul %242, %229, %cst_89 {dimension_numbers = #tpu.dot_dimension_numbers<[1], [0], [0], [1], [0, 0, 1, 1], [], []>} : vector<8x8xf32>, vector<8x8xf32>, vector<8x8xf32> -> vector<8x8xf32>
    %244 = vector.extract_strided_slice %207 {offsets = [0, 16], sizes = [8, 8], strides = [1, 1]} : vector<8x32xf32> to vector<8x8xf32>
    %245 = vector.extract_strided_slice %208 {offsets = [0, 16], sizes = [8, 8], strides = [1, 1]} : vector<8x32xf32> to vector<8x8xf32>
    %246 = vector.extract_strided_slice %209 {offsets = [0, 16], sizes = [8, 8], strides = [1, 1]} : vector<8x32xf32> to vector<8x8xf32>
    %cst_90 = arith.constant dense<0.000000e+00> : vector<8x8xf32>
    %247 = tpu.matmul %244, %245, %cst_90 {dimension_numbers = #tpu.dot_dimension_numbers<[1], [1], [0], [0], [0, 0, 1, 0], [], []>} : vector<8x8xf32>, vector<8x8xf32>, vector<8x8xf32> -> vector<8x8xf32>
    %cst_91 = arith.constant 0.353553385 : f32
    %248 = vector.broadcast %cst_91 : f32 to vector<8x8xf32>
    %249 = arith.mulf %247, %248 : vector<8x8xf32>
    %cst_92 = arith.constant dense<0xFF800000> : vector<8xf32>
    %250 = vector.multi_reduction <maximumf>, %249, %cst_92 [1] : vector<8x8xf32> to vector<8xf32>
    %251 = vector.shape_cast %250 : vector<8xf32> to vector<8x1xf32>
    %252 = vector.broadcast %251 : vector<8x1xf32> to vector<8x8xf32>
    %253 = arith.subf %249, %252 : vector<8x8xf32>
    %254 = math.exp %253 : vector<8x8xf32>
    %cst_93 = arith.constant dense<0.000000e+00> : vector<8xf32>
    %255 = vector.multi_reduction <add>, %254, %cst_93 [1] : vector<8x8xf32> to vector<8xf32>
    %256 = vector.shape_cast %255 : vector<8xf32> to vector<8x1xf32>
    %257 = tpu.reciprocal %256 {approx = true} : vector<8x1xf32> -> vector<8x1xf32>
    %258 = vector.broadcast %257 : vector<8x1xf32> to vector<8x8xf32>
    %259 = arith.mulf %254, %258 : vector<8x8xf32>
    %cst_94 = arith.constant dense<0.000000e+00> : vector<8x8xf32>
    %260 = tpu.matmul %259, %246, %cst_94 {dimension_numbers = #tpu.dot_dimension_numbers<[1], [0], [0], [1], [0, 0, 1, 1], [], []>} : vector<8x8xf32>, vector<8x8xf32>, vector<8x8xf32> -> vector<8x8xf32>
    %261 = vector.extract_strided_slice %207 {offsets = [0, 24], sizes = [8, 8], strides = [1, 1]} : vector<8x32xf32> to vector<8x8xf32>
    %262 = vector.extract_strided_slice %208 {offsets = [0, 24], sizes = [8, 8], strides = [1, 1]} : vector<8x32xf32> to vector<8x8xf32>
    %263 = vector.extract_strided_slice %209 {offsets = [0, 24], sizes = [8, 8], strides = [1, 1]} : vector<8x32xf32> to vector<8x8xf32>
    %cst_95 = arith.constant dense<0.000000e+00> : vector<8x8xf32>
    %264 = tpu.matmul %261, %262, %cst_95 {dimension_numbers = #tpu.dot_dimension_numbers<[1], [1], [0], [0], [0, 0, 1, 0], [], []>} : vector<8x8xf32>, vector<8x8xf32>, vector<8x8xf32> -> vector<8x8xf32>
    %cst_96 = arith.constant 0.353553385 : f32
    %265 = vector.broadcast %cst_96 : f32 to vector<8x8xf32>
    %266 = arith.mulf %264, %265 : vector<8x8xf32>
    %cst_97 = arith.constant dense<0xFF800000> : vector<8xf32>
    %267 = vector.multi_reduction <maximumf>, %266, %cst_97 [1] : vector<8x8xf32> to vector<8xf32>
    %268 = vector.shape_cast %267 : vector<8xf32> to vector<8x1xf32>
    %269 = vector.broadcast %268 : vector<8x1xf32> to vector<8x8xf32>
    %270 = arith.subf %266, %269 : vector<8x8xf32>
    %271 = math.exp %270 : vector<8x8xf32>
    %cst_98 = arith.constant dense<0.000000e+00> : vector<8xf32>
    %272 = vector.multi_reduction <add>, %271, %cst_98 [1] : vector<8x8xf32> to vector<8xf32>
    %273 = vector.shape_cast %272 : vector<8xf32> to vector<8x1xf32>
    %274 = tpu.reciprocal %273 {approx = true} : vector<8x1xf32> -> vector<8x1xf32>
    %275 = vector.broadcast %274 : vector<8x1xf32> to vector<8x8xf32>
    %276 = arith.mulf %271, %275 : vector<8x8xf32>
    %cst_99 = arith.constant dense<0.000000e+00> : vector<8x8xf32>
    %277 = tpu.matmul %276, %263, %cst_99 {dimension_numbers = #tpu.dot_dimension_numbers<[1], [0], [0], [1], [0, 0, 1, 1], [], []>} : vector<8x8xf32>, vector<8x8xf32>, vector<8x8xf32> -> vector<8x8xf32>
    %278 = tpu.concatenate %226, %243, %260, %277 in 1 : vector<8x8xf32>, vector<8x8xf32>, vector<8x8xf32>, vector<8x8xf32> -> vector<8x32xf32>
    %279 = vector.extract_strided_slice %197 {offsets = [8, 0], sizes = [8, 32], strides = [1, 1]} : vector<16x32xf32> to vector<8x32xf32>
    %280 = vector.extract_strided_slice %205 {offsets = [8, 0], sizes = [8, 32], strides = [1, 1]} : vector<16x32xf32> to vector<8x32xf32>
    %281 = vector.extract_strided_slice %206 {offsets = [8, 0], sizes = [8, 32], strides = [1, 1]} : vector<16x32xf32> to vector<8x32xf32>
    %282 = vector.extract_strided_slice %279 {offsets = [0, 0], sizes = [8, 8], strides = [1, 1]} : vector<8x32xf32> to vector<8x8xf32>
    %283 = vector.extract_strided_slice %280 {offsets = [0, 0], sizes = [8, 8], strides = [1, 1]} : vector<8x32xf32> to vector<8x8xf32>
    %284 = vector.extract_strided_slice %281 {offsets = [0, 0], sizes = [8, 8], strides = [1, 1]} : vector<8x32xf32> to vector<8x8xf32>
    %cst_100 = arith.constant dense<0.000000e+00> : vector<8x8xf32>
    %285 = tpu.matmul %282, %283, %cst_100 {dimension_numbers = #tpu.dot_dimension_numbers<[1], [1], [0], [0], [0, 0, 1, 0], [], []>} : vector<8x8xf32>, vector<8x8xf32>, vector<8x8xf32> -> vector<8x8xf32>
    %cst_101 = arith.constant 0.353553385 : f32
    %286 = vector.broadcast %cst_101 : f32 to vector<8x8xf32>
    %287 = arith.mulf %285, %286 : vector<8x8xf32>
    %cst_102 = arith.constant dense<0xFF800000> : vector<8xf32>
    %288 = vector.multi_reduction <maximumf>, %287, %cst_102 [1] : vector<8x8xf32> to vector<8xf32>
    %289 = vector.shape_cast %288 : vector<8xf32> to vector<8x1xf32>
    %290 = vector.broadcast %289 : vector<8x1xf32> to vector<8x8xf32>
    %291 = arith.subf %287, %290 : vector<8x8xf32>
    %292 = math.exp %291 : vector<8x8xf32>
    %cst_103 = arith.constant dense<0.000000e+00> : vector<8xf32>
    %293 = vector.multi_reduction <add>, %292, %cst_103 [1] : vector<8x8xf32> to vector<8xf32>
    %294 = vector.shape_cast %293 : vector<8xf32> to vector<8x1xf32>
    %295 = tpu.reciprocal %294 {approx = true} : vector<8x1xf32> -> vector<8x1xf32>
    %296 = vector.broadcast %295 : vector<8x1xf32> to vector<8x8xf32>
    %297 = arith.mulf %292, %296 : vector<8x8xf32>
    %cst_104 = arith.constant dense<0.000000e+00> : vector<8x8xf32>
    %298 = tpu.matmul %297, %284, %cst_104 {dimension_numbers = #tpu.dot_dimension_numbers<[1], [0], [0], [1], [0, 0, 1, 1], [], []>} : vector<8x8xf32>, vector<8x8xf32>, vector<8x8xf32> -> vector<8x8xf32>
    %299 = vector.extract_strided_slice %279 {offsets = [0, 8], sizes = [8, 8], strides = [1, 1]} : vector<8x32xf32> to vector<8x8xf32>
    %300 = vector.extract_strided_slice %280 {offsets = [0, 8], sizes = [8, 8], strides = [1, 1]} : vector<8x32xf32> to vector<8x8xf32>
    %301 = vector.extract_strided_slice %281 {offsets = [0, 8], sizes = [8, 8], strides = [1, 1]} : vector<8x32xf32> to vector<8x8xf32>
    %cst_105 = arith.constant dense<0.000000e+00> : vector<8x8xf32>
    %302 = tpu.matmul %299, %300, %cst_105 {dimension_numbers = #tpu.dot_dimension_numbers<[1], [1], [0], [0], [0, 0, 1, 0], [], []>} : vector<8x8xf32>, vector<8x8xf32>, vector<8x8xf32> -> vector<8x8xf32>
    %cst_106 = arith.constant 0.353553385 : f32
    %303 = vector.broadcast %cst_106 : f32 to vector<8x8xf32>
    %304 = arith.mulf %302, %303 : vector<8x8xf32>
    %cst_107 = arith.constant dense<0xFF800000> : vector<8xf32>
    %305 = vector.multi_reduction <maximumf>, %304, %cst_107 [1] : vector<8x8xf32> to vector<8xf32>
    %306 = vector.shape_cast %305 : vector<8xf32> to vector<8x1xf32>
    %307 = vector.broadcast %306 : vector<8x1xf32> to vector<8x8xf32>
    %308 = arith.subf %304, %307 : vector<8x8xf32>
    %309 = math.exp %308 : vector<8x8xf32>
    %cst_108 = arith.constant dense<0.000000e+00> : vector<8xf32>
    %310 = vector.multi_reduction <add>, %309, %cst_108 [1] : vector<8x8xf32> to vector<8xf32>
    %311 = vector.shape_cast %310 : vector<8xf32> to vector<8x1xf32>
    %312 = tpu.reciprocal %311 {approx = true} : vector<8x1xf32> -> vector<8x1xf32>
    %313 = vector.broadcast %312 : vector<8x1xf32> to vector<8x8xf32>
    %314 = arith.mulf %309, %313 : vector<8x8xf32>
    %cst_109 = arith.constant dense<0.000000e+00> : vector<8x8xf32>
    %315 = tpu.matmul %314, %301, %cst_109 {dimension_numbers = #tpu.dot_dimension_numbers<[1], [0], [0], [1], [0, 0, 1, 1], [], []>} : vector<8x8xf32>, vector<8x8xf32>, vector<8x8xf32> -> vector<8x8xf32>
    %316 = vector.extract_strided_slice %279 {offsets = [0, 16], sizes = [8, 8], strides = [1, 1]} : vector<8x32xf32> to vector<8x8xf32>
    %317 = vector.extract_strided_slice %280 {offsets = [0, 16], sizes = [8, 8], strides = [1, 1]} : vector<8x32xf32> to vector<8x8xf32>
    %318 = vector.extract_strided_slice %281 {offsets = [0, 16], sizes = [8, 8], strides = [1, 1]} : vector<8x32xf32> to vector<8x8xf32>
    %cst_110 = arith.constant dense<0.000000e+00> : vector<8x8xf32>
    %319 = tpu.matmul %316, %317, %cst_110 {dimension_numbers = #tpu.dot_dimension_numbers<[1], [1], [0], [0], [0, 0, 1, 0], [], []>} : vector<8x8xf32>, vector<8x8xf32>, vector<8x8xf32> -> vector<8x8xf32>
    %cst_111 = arith.constant 0.353553385 : f32
    %320 = vector.broadcast %cst_111 : f32 to vector<8x8xf32>
    %321 = arith.mulf %319, %320 : vector<8x8xf32>
    %cst_112 = arith.constant dense<0xFF800000> : vector<8xf32>
    %322 = vector.multi_reduction <maximumf>, %321, %cst_112 [1] : vector<8x8xf32> to vector<8xf32>
    %323 = vector.shape_cast %322 : vector<8xf32> to vector<8x1xf32>
    %324 = vector.broadcast %323 : vector<8x1xf32> to vector<8x8xf32>
    %325 = arith.subf %321, %324 : vector<8x8xf32>
    %326 = math.exp %325 : vector<8x8xf32>
    %cst_113 = arith.constant dense<0.000000e+00> : vector<8xf32>
    %327 = vector.multi_reduction <add>, %326, %cst_113 [1] : vector<8x8xf32> to vector<8xf32>
    %328 = vector.shape_cast %327 : vector<8xf32> to vector<8x1xf32>
    %329 = tpu.reciprocal %328 {approx = true} : vector<8x1xf32> -> vector<8x1xf32>
    %330 = vector.broadcast %329 : vector<8x1xf32> to vector<8x8xf32>
    %331 = arith.mulf %326, %330 : vector<8x8xf32>
    %cst_114 = arith.constant dense<0.000000e+00> : vector<8x8xf32>
    %332 = tpu.matmul %331, %318, %cst_114 {dimension_numbers = #tpu.dot_dimension_numbers<[1], [0], [0], [1], [0, 0, 1, 1], [], []>} : vector<8x8xf32>, vector<8x8xf32>, vector<8x8xf32> -> vector<8x8xf32>
    %333 = vector.extract_strided_slice %279 {offsets = [0, 24], sizes = [8, 8], strides = [1, 1]} : vector<8x32xf32> to vector<8x8xf32>
    %334 = vector.extract_strided_slice %280 {offsets = [0, 24], sizes = [8, 8], strides = [1, 1]} : vector<8x32xf32> to vector<8x8xf32>
    %335 = vector.extract_strided_slice %281 {offsets = [0, 24], sizes = [8, 8], strides = [1, 1]} : vector<8x32xf32> to vector<8x8xf32>
    %cst_115 = arith.constant dense<0.000000e+00> : vector<8x8xf32>
    %336 = tpu.matmul %333, %334, %cst_115 {dimension_numbers = #tpu.dot_dimension_numbers<[1], [1], [0], [0], [0, 0, 1, 0], [], []>} : vector<8x8xf32>, vector<8x8xf32>, vector<8x8xf32> -> vector<8x8xf32>
    %cst_116 = arith.constant 0.353553385 : f32
    %337 = vector.broadcast %cst_116 : f32 to vector<8x8xf32>
    %338 = arith.mulf %336, %337 : vector<8x8xf32>
    %cst_117 = arith.constant dense<0xFF800000> : vector<8xf32>
    %339 = vector.multi_reduction <maximumf>, %338, %cst_117 [1] : vector<8x8xf32> to vector<8xf32>
    %340 = vector.shape_cast %339 : vector<8xf32> to vector<8x1xf32>
    %341 = vector.broadcast %340 : vector<8x1xf32> to vector<8x8xf32>
    %342 = arith.subf %338, %341 : vector<8x8xf32>
    %343 = math.exp %342 : vector<8x8xf32>
    %cst_118 = arith.constant dense<0.000000e+00> : vector<8xf32>
    %344 = vector.multi_reduction <add>, %343, %cst_118 [1] : vector<8x8xf32> to vector<8xf32>
    %345 = vector.shape_cast %344 : vector<8xf32> to vector<8x1xf32>
    %346 = tpu.reciprocal %345 {approx = true} : vector<8x1xf32> -> vector<8x1xf32>
    %347 = vector.broadcast %346 : vector<8x1xf32> to vector<8x8xf32>
    %348 = arith.mulf %343, %347 : vector<8x8xf32>
    %cst_119 = arith.constant dense<0.000000e+00> : vector<8x8xf32>
    %349 = tpu.matmul %348, %335, %cst_119 {dimension_numbers = #tpu.dot_dimension_numbers<[1], [0], [0], [1], [0, 0, 1, 1], [], []>} : vector<8x8xf32>, vector<8x8xf32>, vector<8x8xf32> -> vector<8x8xf32>
    %350 = tpu.concatenate %298, %315, %332, %349 in 1 : vector<8x8xf32>, vector<8x8xf32>, vector<8x8xf32>, vector<8x8xf32> -> vector<8x32xf32>
    %351 = tpu.concatenate %278, %350 in 0 : vector<8x32xf32>, vector<8x32xf32> -> vector<16x32xf32>
    %c0_120 = arith.constant 0 : index
    %c0_121 = arith.constant 0 : index
    %c0_122 = arith.constant 0 : index
    %352 = vector.load %arg9[%c0_120, %c0_121, %c0_122] : memref<2x32x32xf32, #tpu.memory_space<vmem>>, vector<1x32x32xf32>
    %353 = vector.shape_cast %352 : vector<1x32x32xf32> to vector<32x32xf32>
    %c0_123 = arith.constant 0 : index
    %c0_124 = arith.constant 0 : index
    %c0_125 = arith.constant 0 : index
    %354 = vector.load %arg10[%c0_123, %c0_124, %c0_125] : memref<2x1x32xf32, #tpu.memory_space<vmem>>, vector<1x1x32xf32>
    %355 = vector.shape_cast %354 : vector<1x1x32xf32> to vector<1x32xf32>
    %cst_126 = arith.constant dense<0.000000e+00> : vector<16x32xf32>
    %356 = tpu.matmul %351, %353, %cst_126 {dimension_numbers = #tpu.dot_dimension_numbers<[1], [0], [0], [1], [0, 0, 1, 1], [], []>} : vector<16x32xf32>, vector<32x32xf32>, vector<16x32xf32> -> vector<16x32xf32>
    %357 = vector.broadcast %355 : vector<1x32xf32> to vector<16x32xf32>
    %358 = arith.addf %356, %357 : vector<16x32xf32>
    %359 = arith.addf %190, %358 : vector<16x32xf32>
    %c0_127 = arith.constant 0 : index
    %c0_128 = arith.constant 0 : index
    %c0_129 = arith.constant 0 : index
    %360 = vector.load %arg17[%c0_127, %c0_128, %c0_129] : memref<2x1x32xf32, #tpu.memory_space<vmem>>, vector<1x1x32xf32>
    %361 = vector.shape_cast %360 : vector<1x1x32xf32> to vector<1x32xf32>
    %c0_130 = arith.constant 0 : index
    %c0_131 = arith.constant 0 : index
    %c0_132 = arith.constant 0 : index
    %362 = vector.load %arg18[%c0_130, %c0_131, %c0_132] : memref<2x1x32xf32, #tpu.memory_space<vmem>>, vector<1x1x32xf32>
    %363 = vector.shape_cast %362 : vector<1x1x32xf32> to vector<1x32xf32>
    %cst_133 = arith.constant dense<0.000000e+00> : vector<16xf32>
    %364 = vector.multi_reduction <add>, %359, %cst_133 [1] : vector<16x32xf32> to vector<16xf32>
    %365 = vector.shape_cast %364 : vector<16xf32> to vector<16x1xf32>
    %cst_134 = arith.constant 3.200000e+01 : f32
    %366 = vector.broadcast %cst_134 : f32 to vector<16x1xf32>
    %367 = arith.divf %365, %366 : vector<16x1xf32>
    %368 = vector.broadcast %367 : vector<16x1xf32> to vector<16x32xf32>
    %369 = arith.subf %359, %368 : vector<16x32xf32>
    %370 = arith.mulf %369, %369 : vector<16x32xf32>
    %cst_135 = arith.constant dense<0.000000e+00> : vector<16xf32>
    %371 = vector.multi_reduction <add>, %370, %cst_135 [1] : vector<16x32xf32> to vector<16xf32>
    %372 = vector.shape_cast %371 : vector<16xf32> to vector<16x1xf32>
    %cst_136 = arith.constant 3.200000e+01 : f32
    %373 = vector.broadcast %cst_136 : f32 to vector<16x1xf32>
    %374 = arith.divf %372, %373 : vector<16x1xf32>
    %375 = vector.broadcast %367 : vector<16x1xf32> to vector<16x32xf32>
    %376 = arith.subf %359, %375 : vector<16x32xf32>
    %cst_137 = arith.constant 9.99999974E-6 : f32
    %377 = vector.broadcast %cst_137 : f32 to vector<16x1xf32>
    %378 = arith.addf %374, %377 : vector<16x1xf32>
    %379 = math.rsqrt %378 : vector<16x1xf32>
    %380 = vector.broadcast %379 : vector<16x1xf32> to vector<16x32xf32>
    %381 = arith.mulf %376, %380 : vector<16x32xf32>
    %382 = vector.broadcast %361 : vector<1x32xf32> to vector<16x32xf32>
    %383 = arith.mulf %381, %382 : vector<16x32xf32>
    %384 = vector.broadcast %363 : vector<1x32xf32> to vector<16x32xf32>
    %385 = arith.addf %383, %384 : vector<16x32xf32>
    %c0_138 = arith.constant 0 : index
    %c0_139 = arith.constant 0 : index
    %c0_140 = arith.constant 0 : index
    %386 = vector.load %arg11[%c0_138, %c0_139, %c0_140] : memref<2x32x64xf32, #tpu.memory_space<vmem>>, vector<1x32x64xf32>
    %387 = vector.shape_cast %386 : vector<1x32x64xf32> to vector<32x64xf32>
    %c0_141 = arith.constant 0 : index
    %c0_142 = arith.constant 0 : index
    %c0_143 = arith.constant 0 : index
    %388 = vector.load %arg12[%c0_141, %c0_142, %c0_143] : memref<2x1x64xf32, #tpu.memory_space<vmem>>, vector<1x1x64xf32>
    %389 = vector.shape_cast %388 : vector<1x1x64xf32> to vector<1x64xf32>
    %cst_144 = arith.constant dense<0.000000e+00> : vector<16x64xf32>
    %390 = tpu.matmul %385, %387, %cst_144 {dimension_numbers = #tpu.dot_dimension_numbers<[1], [0], [0], [1], [0, 0, 1, 1], [], []>} : vector<16x32xf32>, vector<32x64xf32>, vector<16x64xf32> -> vector<16x64xf32>
    %391 = vector.broadcast %389 : vector<1x64xf32> to vector<16x64xf32>
    %392 = arith.addf %390, %391 : vector<16x64xf32>
    %cst_145 = arith.constant 0.000000e+00 : f32
    %393 = vector.broadcast %cst_145 : f32 to vector<16x64xf32>
    %394 = arith.maximumf %392, %393 : vector<16x64xf32>
    %c0_146 = arith.constant 0 : index
    %c0_147 = arith.constant 0 : index
    %c0_148 = arith.constant 0 : index
    %395 = vector.load %arg13[%c0_146, %c0_147, %c0_148] : memref<2x64x32xf32, #tpu.memory_space<vmem>>, vector<1x64x32xf32>
    %396 = vector.shape_cast %395 : vector<1x64x32xf32> to vector<64x32xf32>
    %c0_149 = arith.constant 0 : index
    %c0_150 = arith.constant 0 : index
    %c0_151 = arith.constant 0 : index
    %397 = vector.load %arg14[%c0_149, %c0_150, %c0_151] : memref<2x1x32xf32, #tpu.memory_space<vmem>>, vector<1x1x32xf32>
    %398 = vector.shape_cast %397 : vector<1x1x32xf32> to vector<1x32xf32>
    %cst_152 = arith.constant dense<0.000000e+00> : vector<16x32xf32>
    %399 = tpu.matmul %394, %396, %cst_152 {dimension_numbers = #tpu.dot_dimension_numbers<[1], [0], [0], [1], [0, 0, 1, 1], [], []>} : vector<16x64xf32>, vector<64x32xf32>, vector<16x32xf32> -> vector<16x32xf32>
    %400 = vector.broadcast %398 : vector<1x32xf32> to vector<16x32xf32>
    %401 = arith.addf %399, %400 : vector<16x32xf32>
    %402 = arith.addf %385, %401 : vector<16x32xf32>
    %c0_153 = arith.constant 0 : index
    %c0_154 = arith.constant 0 : index
    %c0_155 = arith.constant 0 : index
    %403 = vector.load %arg19[%c0_153, %c0_154, %c0_155] : memref<2x1x32xf32, #tpu.memory_space<vmem>>, vector<1x1x32xf32>
    %404 = vector.shape_cast %403 : vector<1x1x32xf32> to vector<1x32xf32>
    %c0_156 = arith.constant 0 : index
    %c0_157 = arith.constant 0 : index
    %c0_158 = arith.constant 0 : index
    %405 = vector.load %arg20[%c0_156, %c0_157, %c0_158] : memref<2x1x32xf32, #tpu.memory_space<vmem>>, vector<1x1x32xf32>
    %406 = vector.shape_cast %405 : vector<1x1x32xf32> to vector<1x32xf32>
    %cst_159 = arith.constant dense<0.000000e+00> : vector<16xf32>
    %407 = vector.multi_reduction <add>, %402, %cst_159 [1] : vector<16x32xf32> to vector<16xf32>
    %408 = vector.shape_cast %407 : vector<16xf32> to vector<16x1xf32>
    %cst_160 = arith.constant 3.200000e+01 : f32
    %409 = vector.broadcast %cst_160 : f32 to vector<16x1xf32>
    %410 = arith.divf %408, %409 : vector<16x1xf32>
    %411 = vector.broadcast %410 : vector<16x1xf32> to vector<16x32xf32>
    %412 = arith.subf %402, %411 : vector<16x32xf32>
    %413 = arith.mulf %412, %412 : vector<16x32xf32>
    %cst_161 = arith.constant dense<0.000000e+00> : vector<16xf32>
    %414 = vector.multi_reduction <add>, %413, %cst_161 [1] : vector<16x32xf32> to vector<16xf32>
    %415 = vector.shape_cast %414 : vector<16xf32> to vector<16x1xf32>
    %cst_162 = arith.constant 3.200000e+01 : f32
    %416 = vector.broadcast %cst_162 : f32 to vector<16x1xf32>
    %417 = arith.divf %415, %416 : vector<16x1xf32>
    %418 = vector.broadcast %410 : vector<16x1xf32> to vector<16x32xf32>
    %419 = arith.subf %402, %418 : vector<16x32xf32>
    %cst_163 = arith.constant 9.99999974E-6 : f32
    %420 = vector.broadcast %cst_163 : f32 to vector<16x1xf32>
    %421 = arith.addf %417, %420 : vector<16x1xf32>
    %422 = math.rsqrt %421 : vector<16x1xf32>
    %423 = vector.broadcast %422 : vector<16x1xf32> to vector<16x32xf32>
    %424 = arith.mulf %419, %423 : vector<16x32xf32>
    %425 = vector.broadcast %404 : vector<1x32xf32> to vector<16x32xf32>
    %426 = arith.mulf %424, %425 : vector<16x32xf32>
    %427 = vector.broadcast %406 : vector<1x32xf32> to vector<16x32xf32>
    %428 = arith.addf %426, %427 : vector<16x32xf32>
    %c1 = arith.constant 1 : index
    %c0_164 = arith.constant 0 : index
    %c0_165 = arith.constant 0 : index
    %429 = vector.load %arg1[%c1, %c0_164, %c0_165] : memref<2x32x96xf32, #tpu.memory_space<vmem>>, vector<1x32x96xf32>
    %430 = vector.shape_cast %429 : vector<1x32x96xf32> to vector<32x96xf32>
    %c1_166 = arith.constant 1 : index
    %c0_167 = arith.constant 0 : index
    %c0_168 = arith.constant 0 : index
    %431 = vector.load %arg2[%c1_166, %c0_167, %c0_168] : memref<2x1x96xf32, #tpu.memory_space<vmem>>, vector<1x1x96xf32>
    %432 = vector.shape_cast %431 : vector<1x1x96xf32> to vector<1x96xf32>
    %cst_169 = arith.constant dense<0.000000e+00> : vector<16x96xf32>
    %433 = tpu.matmul %428, %430, %cst_169 {dimension_numbers = #tpu.dot_dimension_numbers<[1], [0], [0], [1], [0, 0, 1, 1], [], []>} : vector<16x32xf32>, vector<32x96xf32>, vector<16x96xf32> -> vector<16x96xf32>
    %434 = vector.broadcast %432 : vector<1x96xf32> to vector<16x96xf32>
    %435 = arith.addf %433, %434 : vector<16x96xf32>
    %436 = vector.extract_strided_slice %435 {offsets = [0, 0], sizes = [16, 32], strides = [1, 1]} : vector<16x96xf32> to vector<16x32xf32>
    %437 = vector.extract_strided_slice %435 {offsets = [0, 32], sizes = [16, 32], strides = [1, 1]} : vector<16x96xf32> to vector<16x32xf32>
    %438 = vector.extract_strided_slice %435 {offsets = [0, 64], sizes = [16, 32], strides = [1, 1]} : vector<16x96xf32> to vector<16x32xf32>
    %439 = vector.extract_strided_slice %436 {offsets = [0, 0], sizes = [8, 32], strides = [1, 1]} : vector<16x32xf32> to vector<8x32xf32>
    %440 = vector.extract_strided_slice %437 {offsets = [0, 0], sizes = [8, 32], strides = [1, 1]} : vector<16x32xf32> to vector<8x32xf32>
    %441 = vector.extract_strided_slice %438 {offsets = [0, 0], sizes = [8, 32], strides = [1, 1]} : vector<16x32xf32> to vector<8x32xf32>
    %442 = vector.extract_strided_slice %439 {offsets = [0, 0], sizes = [8, 8], strides = [1, 1]} : vector<8x32xf32> to vector<8x8xf32>
    %443 = vector.extract_strided_slice %440 {offsets = [0, 0], sizes = [8, 8], strides = [1, 1]} : vector<8x32xf32> to vector<8x8xf32>
    %444 = vector.extract_strided_slice %441 {offsets = [0, 0], sizes = [8, 8], strides = [1, 1]} : vector<8x32xf32> to vector<8x8xf32>
    %cst_170 = arith.constant dense<0.000000e+00> : vector<8x8xf32>
    %445 = tpu.matmul %442, %443, %cst_170 {dimension_numbers = #tpu.dot_dimension_numbers<[1], [1], [0], [0], [0, 0, 1, 0], [], []>} : vector<8x8xf32>, vector<8x8xf32>, vector<8x8xf32> -> vector<8x8xf32>
    %cst_171 = arith.constant 0.353553385 : f32
    %446 = vector.broadcast %cst_171 : f32 to vector<8x8xf32>
    %447 = arith.mulf %445, %446 : vector<8x8xf32>
    %cst_172 = arith.constant dense<0xFF800000> : vector<8xf32>
    %448 = vector.multi_reduction <maximumf>, %447, %cst_172 [1] : vector<8x8xf32> to vector<8xf32>
    %449 = vector.shape_cast %448 : vector<8xf32> to vector<8x1xf32>
    %450 = vector.broadcast %449 : vector<8x1xf32> to vector<8x8xf32>
    %451 = arith.subf %447, %450 : vector<8x8xf32>
    %452 = math.exp %451 : vector<8x8xf32>
    %cst_173 = arith.constant dense<0.000000e+00> : vector<8xf32>
    %453 = vector.multi_reduction <add>, %452, %cst_173 [1] : vector<8x8xf32> to vector<8xf32>
    %454 = vector.shape_cast %453 : vector<8xf32> to vector<8x1xf32>
    %455 = tpu.reciprocal %454 {approx = true} : vector<8x1xf32> -> vector<8x1xf32>
    %456 = vector.broadcast %455 : vector<8x1xf32> to vector<8x8xf32>
    %457 = arith.mulf %452, %456 : vector<8x8xf32>
    %cst_174 = arith.constant dense<0.000000e+00> : vector<8x8xf32>
    %458 = tpu.matmul %457, %444, %cst_174 {dimension_numbers = #tpu.dot_dimension_numbers<[1], [0], [0], [1], [0, 0, 1, 1], [], []>} : vector<8x8xf32>, vector<8x8xf32>, vector<8x8xf32> -> vector<8x8xf32>
    %459 = vector.extract_strided_slice %439 {offsets = [0, 8], sizes = [8, 8], strides = [1, 1]} : vector<8x32xf32> to vector<8x8xf32>
    %460 = vector.extract_strided_slice %440 {offsets = [0, 8], sizes = [8, 8], strides = [1, 1]} : vector<8x32xf32> to vector<8x8xf32>
    %461 = vector.extract_strided_slice %441 {offsets = [0, 8], sizes = [8, 8], strides = [1, 1]} : vector<8x32xf32> to vector<8x8xf32>
    %cst_175 = arith.constant dense<0.000000e+00> : vector<8x8xf32>
    %462 = tpu.matmul %459, %460, %cst_175 {dimension_numbers = #tpu.dot_dimension_numbers<[1], [1], [0], [0], [0, 0, 1, 0], [], []>} : vector<8x8xf32>, vector<8x8xf32>, vector<8x8xf32> -> vector<8x8xf32>
    %cst_176 = arith.constant 0.353553385 : f32
    %463 = vector.broadcast %cst_176 : f32 to vector<8x8xf32>
    %464 = arith.mulf %462, %463 : vector<8x8xf32>
    %cst_177 = arith.constant dense<0xFF800000> : vector<8xf32>
    %465 = vector.multi_reduction <maximumf>, %464, %cst_177 [1] : vector<8x8xf32> to vector<8xf32>
    %466 = vector.shape_cast %465 : vector<8xf32> to vector<8x1xf32>
    %467 = vector.broadcast %466 : vector<8x1xf32> to vector<8x8xf32>
    %468 = arith.subf %464, %467 : vector<8x8xf32>
    %469 = math.exp %468 : vector<8x8xf32>
    %cst_178 = arith.constant dense<0.000000e+00> : vector<8xf32>
    %470 = vector.multi_reduction <add>, %469, %cst_178 [1] : vector<8x8xf32> to vector<8xf32>
    %471 = vector.shape_cast %470 : vector<8xf32> to vector<8x1xf32>
    %472 = tpu.reciprocal %471 {approx = true} : vector<8x1xf32> -> vector<8x1xf32>
    %473 = vector.broadcast %472 : vector<8x1xf32> to vector<8x8xf32>
    %474 = arith.mulf %469, %473 : vector<8x8xf32>
    %cst_179 = arith.constant dense<0.000000e+00> : vector<8x8xf32>
    %475 = tpu.matmul %474, %461, %cst_179 {dimension_numbers = #tpu.dot_dimension_numbers<[1], [0], [0], [1], [0, 0, 1, 1], [], []>} : vector<8x8xf32>, vector<8x8xf32>, vector<8x8xf32> -> vector<8x8xf32>
    %476 = vector.extract_strided_slice %439 {offsets = [0, 16], sizes = [8, 8], strides = [1, 1]} : vector<8x32xf32> to vector<8x8xf32>
    %477 = vector.extract_strided_slice %440 {offsets = [0, 16], sizes = [8, 8], strides = [1, 1]} : vector<8x32xf32> to vector<8x8xf32>
    %478 = vector.extract_strided_slice %441 {offsets = [0, 16], sizes = [8, 8], strides = [1, 1]} : vector<8x32xf32> to vector<8x8xf32>
    %cst_180 = arith.constant dense<0.000000e+00> : vector<8x8xf32>
    %479 = tpu.matmul %476, %477, %cst_180 {dimension_numbers = #tpu.dot_dimension_numbers<[1], [1], [0], [0], [0, 0, 1, 0], [], []>} : vector<8x8xf32>, vector<8x8xf32>, vector<8x8xf32> -> vector<8x8xf32>
    %cst_181 = arith.constant 0.353553385 : f32
    %480 = vector.broadcast %cst_181 : f32 to vector<8x8xf32>
    %481 = arith.mulf %479, %480 : vector<8x8xf32>
    %cst_182 = arith.constant dense<0xFF800000> : vector<8xf32>
    %482 = vector.multi_reduction <maximumf>, %481, %cst_182 [1] : vector<8x8xf32> to vector<8xf32>
    %483 = vector.shape_cast %482 : vector<8xf32> to vector<8x1xf32>
    %484 = vector.broadcast %483 : vector<8x1xf32> to vector<8x8xf32>
    %485 = arith.subf %481, %484 : vector<8x8xf32>
    %486 = math.exp %485 : vector<8x8xf32>
    %cst_183 = arith.constant dense<0.000000e+00> : vector<8xf32>
    %487 = vector.multi_reduction <add>, %486, %cst_183 [1] : vector<8x8xf32> to vector<8xf32>
    %488 = vector.shape_cast %487 : vector<8xf32> to vector<8x1xf32>
    %489 = tpu.reciprocal %488 {approx = true} : vector<8x1xf32> -> vector<8x1xf32>
    %490 = vector.broadcast %489 : vector<8x1xf32> to vector<8x8xf32>
    %491 = arith.mulf %486, %490 : vector<8x8xf32>
    %cst_184 = arith.constant dense<0.000000e+00> : vector<8x8xf32>
    %492 = tpu.matmul %491, %478, %cst_184 {dimension_numbers = #tpu.dot_dimension_numbers<[1], [0], [0], [1], [0, 0, 1, 1], [], []>} : vector<8x8xf32>, vector<8x8xf32>, vector<8x8xf32> -> vector<8x8xf32>
    %493 = vector.extract_strided_slice %439 {offsets = [0, 24], sizes = [8, 8], strides = [1, 1]} : vector<8x32xf32> to vector<8x8xf32>
    %494 = vector.extract_strided_slice %440 {offsets = [0, 24], sizes = [8, 8], strides = [1, 1]} : vector<8x32xf32> to vector<8x8xf32>
    %495 = vector.extract_strided_slice %441 {offsets = [0, 24], sizes = [8, 8], strides = [1, 1]} : vector<8x32xf32> to vector<8x8xf32>
    %cst_185 = arith.constant dense<0.000000e+00> : vector<8x8xf32>
    %496 = tpu.matmul %493, %494, %cst_185 {dimension_numbers = #tpu.dot_dimension_numbers<[1], [1], [0], [0], [0, 0, 1, 0], [], []>} : vector<8x8xf32>, vector<8x8xf32>, vector<8x8xf32> -> vector<8x8xf32>
    %cst_186 = arith.constant 0.353553385 : f32
    %497 = vector.broadcast %cst_186 : f32 to vector<8x8xf32>
    %498 = arith.mulf %496, %497 : vector<8x8xf32>
    %cst_187 = arith.constant dense<0xFF800000> : vector<8xf32>
    %499 = vector.multi_reduction <maximumf>, %498, %cst_187 [1] : vector<8x8xf32> to vector<8xf32>
    %500 = vector.shape_cast %499 : vector<8xf32> to vector<8x1xf32>
    %501 = vector.broadcast %500 : vector<8x1xf32> to vector<8x8xf32>
    %502 = arith.subf %498, %501 : vector<8x8xf32>
    %503 = math.exp %502 : vector<8x8xf32>
    %cst_188 = arith.constant dense<0.000000e+00> : vector<8xf32>
    %504 = vector.multi_reduction <add>, %503, %cst_188 [1] : vector<8x8xf32> to vector<8xf32>
    %505 = vector.shape_cast %504 : vector<8xf32> to vector<8x1xf32>
    %506 = tpu.reciprocal %505 {approx = true} : vector<8x1xf32> -> vector<8x1xf32>
    %507 = vector.broadcast %506 : vector<8x1xf32> to vector<8x8xf32>
    %508 = arith.mulf %503, %507 : vector<8x8xf32>
    %cst_189 = arith.constant dense<0.000000e+00> : vector<8x8xf32>
    %509 = tpu.matmul %508, %495, %cst_189 {dimension_numbers = #tpu.dot_dimension_numbers<[1], [0], [0], [1], [0, 0, 1, 1], [], []>} : vector<8x8xf32>, vector<8x8xf32>, vector<8x8xf32> -> vector<8x8xf32>
    %510 = tpu.concatenate %458, %475, %492, %509 in 1 : vector<8x8xf32>, vector<8x8xf32>, vector<8x8xf32>, vector<8x8xf32> -> vector<8x32xf32>
    %511 = vector.extract_strided_slice %436 {offsets = [8, 0], sizes = [8, 32], strides = [1, 1]} : vector<16x32xf32> to vector<8x32xf32>
    %512 = vector.extract_strided_slice %437 {offsets = [8, 0], sizes = [8, 32], strides = [1, 1]} : vector<16x32xf32> to vector<8x32xf32>
    %513 = vector.extract_strided_slice %438 {offsets = [8, 0], sizes = [8, 32], strides = [1, 1]} : vector<16x32xf32> to vector<8x32xf32>
    %514 = vector.extract_strided_slice %511 {offsets = [0, 0], sizes = [8, 8], strides = [1, 1]} : vector<8x32xf32> to vector<8x8xf32>
    %515 = vector.extract_strided_slice %512 {offsets = [0, 0], sizes = [8, 8], strides = [1, 1]} : vector<8x32xf32> to vector<8x8xf32>
    %516 = vector.extract_strided_slice %513 {offsets = [0, 0], sizes = [8, 8], strides = [1, 1]} : vector<8x32xf32> to vector<8x8xf32>
    %cst_190 = arith.constant dense<0.000000e+00> : vector<8x8xf32>
    %517 = tpu.matmul %514, %515, %cst_190 {dimension_numbers = #tpu.dot_dimension_numbers<[1], [1], [0], [0], [0, 0, 1, 0], [], []>} : vector<8x8xf32>, vector<8x8xf32>, vector<8x8xf32> -> vector<8x8xf32>
    %cst_191 = arith.constant 0.353553385 : f32
    %518 = vector.broadcast %cst_191 : f32 to vector<8x8xf32>
    %519 = arith.mulf %517, %518 : vector<8x8xf32>
    %cst_192 = arith.constant dense<0xFF800000> : vector<8xf32>
    %520 = vector.multi_reduction <maximumf>, %519, %cst_192 [1] : vector<8x8xf32> to vector<8xf32>
    %521 = vector.shape_cast %520 : vector<8xf32> to vector<8x1xf32>
    %522 = vector.broadcast %521 : vector<8x1xf32> to vector<8x8xf32>
    %523 = arith.subf %519, %522 : vector<8x8xf32>
    %524 = math.exp %523 : vector<8x8xf32>
    %cst_193 = arith.constant dense<0.000000e+00> : vector<8xf32>
    %525 = vector.multi_reduction <add>, %524, %cst_193 [1] : vector<8x8xf32> to vector<8xf32>
    %526 = vector.shape_cast %525 : vector<8xf32> to vector<8x1xf32>
    %527 = tpu.reciprocal %526 {approx = true} : vector<8x1xf32> -> vector<8x1xf32>
    %528 = vector.broadcast %527 : vector<8x1xf32> to vector<8x8xf32>
    %529 = arith.mulf %524, %528 : vector<8x8xf32>
    %cst_194 = arith.constant dense<0.000000e+00> : vector<8x8xf32>
    %530 = tpu.matmul %529, %516, %cst_194 {dimension_numbers = #tpu.dot_dimension_numbers<[1], [0], [0], [1], [0, 0, 1, 1], [], []>} : vector<8x8xf32>, vector<8x8xf32>, vector<8x8xf32> -> vector<8x8xf32>
    %531 = vector.extract_strided_slice %511 {offsets = [0, 8], sizes = [8, 8], strides = [1, 1]} : vector<8x32xf32> to vector<8x8xf32>
    %532 = vector.extract_strided_slice %512 {offsets = [0, 8], sizes = [8, 8], strides = [1, 1]} : vector<8x32xf32> to vector<8x8xf32>
    %533 = vector.extract_strided_slice %513 {offsets = [0, 8], sizes = [8, 8], strides = [1, 1]} : vector<8x32xf32> to vector<8x8xf32>
    %cst_195 = arith.constant dense<0.000000e+00> : vector<8x8xf32>
    %534 = tpu.matmul %531, %532, %cst_195 {dimension_numbers = #tpu.dot_dimension_numbers<[1], [1], [0], [0], [0, 0, 1, 0], [], []>} : vector<8x8xf32>, vector<8x8xf32>, vector<8x8xf32> -> vector<8x8xf32>
    %cst_196 = arith.constant 0.353553385 : f32
    %535 = vector.broadcast %cst_196 : f32 to vector<8x8xf32>
    %536 = arith.mulf %534, %535 : vector<8x8xf32>
    %cst_197 = arith.constant dense<0xFF800000> : vector<8xf32>
    %537 = vector.multi_reduction <maximumf>, %536, %cst_197 [1] : vector<8x8xf32> to vector<8xf32>
    %538 = vector.shape_cast %537 : vector<8xf32> to vector<8x1xf32>
    %539 = vector.broadcast %538 : vector<8x1xf32> to vector<8x8xf32>
    %540 = arith.subf %536, %539 : vector<8x8xf32>
    %541 = math.exp %540 : vector<8x8xf32>
    %cst_198 = arith.constant dense<0.000000e+00> : vector<8xf32>
    %542 = vector.multi_reduction <add>, %541, %cst_198 [1] : vector<8x8xf32> to vector<8xf32>
    %543 = vector.shape_cast %542 : vector<8xf32> to vector<8x1xf32>
    %544 = tpu.reciprocal %543 {approx = true} : vector<8x1xf32> -> vector<8x1xf32>
    %545 = vector.broadcast %544 : vector<8x1xf32> to vector<8x8xf32>
    %546 = arith.mulf %541, %545 : vector<8x8xf32>
    %cst_199 = arith.constant dense<0.000000e+00> : vector<8x8xf32>
    %547 = tpu.matmul %546, %533, %cst_199 {dimension_numbers = #tpu.dot_dimension_numbers<[1], [0], [0], [1], [0, 0, 1, 1], [], []>} : vector<8x8xf32>, vector<8x8xf32>, vector<8x8xf32> -> vector<8x8xf32>
    %548 = vector.extract_strided_slice %511 {offsets = [0, 16], sizes = [8, 8], strides = [1, 1]} : vector<8x32xf32> to vector<8x8xf32>
    %549 = vector.extract_strided_slice %512 {offsets = [0, 16], sizes = [8, 8], strides = [1, 1]} : vector<8x32xf32> to vector<8x8xf32>
    %550 = vector.extract_strided_slice %513 {offsets = [0, 16], sizes = [8, 8], strides = [1, 1]} : vector<8x32xf32> to vector<8x8xf32>
    %cst_200 = arith.constant dense<0.000000e+00> : vector<8x8xf32>
    %551 = tpu.matmul %548, %549, %cst_200 {dimension_numbers = #tpu.dot_dimension_numbers<[1], [1], [0], [0], [0, 0, 1, 0], [], []>} : vector<8x8xf32>, vector<8x8xf32>, vector<8x8xf32> -> vector<8x8xf32>
    %cst_201 = arith.constant 0.353553385 : f32
    %552 = vector.broadcast %cst_201 : f32 to vector<8x8xf32>
    %553 = arith.mulf %551, %552 : vector<8x8xf32>
    %cst_202 = arith.constant dense<0xFF800000> : vector<8xf32>
    %554 = vector.multi_reduction <maximumf>, %553, %cst_202 [1] : vector<8x8xf32> to vector<8xf32>
    %555 = vector.shape_cast %554 : vector<8xf32> to vector<8x1xf32>
    %556 = vector.broadcast %555 : vector<8x1xf32> to vector<8x8xf32>
    %557 = arith.subf %553, %556 : vector<8x8xf32>
    %558 = math.exp %557 : vector<8x8xf32>
    %cst_203 = arith.constant dense<0.000000e+00> : vector<8xf32>
    %559 = vector.multi_reduction <add>, %558, %cst_203 [1] : vector<8x8xf32> to vector<8xf32>
    %560 = vector.shape_cast %559 : vector<8xf32> to vector<8x1xf32>
    %561 = tpu.reciprocal %560 {approx = true} : vector<8x1xf32> -> vector<8x1xf32>
    %562 = vector.broadcast %561 : vector<8x1xf32> to vector<8x8xf32>
    %563 = arith.mulf %558, %562 : vector<8x8xf32>
    %cst_204 = arith.constant dense<0.000000e+00> : vector<8x8xf32>
    %564 = tpu.matmul %563, %550, %cst_204 {dimension_numbers = #tpu.dot_dimension_numbers<[1], [0], [0], [1], [0, 0, 1, 1], [], []>} : vector<8x8xf32>, vector<8x8xf32>, vector<8x8xf32> -> vector<8x8xf32>
    %565 = vector.extract_strided_slice %511 {offsets = [0, 24], sizes = [8, 8], strides = [1, 1]} : vector<8x32xf32> to vector<8x8xf32>
    %566 = vector.extract_strided_slice %512 {offsets = [0, 24], sizes = [8, 8], strides = [1, 1]} : vector<8x32xf32> to vector<8x8xf32>
    %567 = vector.extract_strided_slice %513 {offsets = [0, 24], sizes = [8, 8], strides = [1, 1]} : vector<8x32xf32> to vector<8x8xf32>
    %cst_205 = arith.constant dense<0.000000e+00> : vector<8x8xf32>
    %568 = tpu.matmul %565, %566, %cst_205 {dimension_numbers = #tpu.dot_dimension_numbers<[1], [1], [0], [0], [0, 0, 1, 0], [], []>} : vector<8x8xf32>, vector<8x8xf32>, vector<8x8xf32> -> vector<8x8xf32>
    %cst_206 = arith.constant 0.353553385 : f32
    %569 = vector.broadcast %cst_206 : f32 to vector<8x8xf32>
    %570 = arith.mulf %568, %569 : vector<8x8xf32>
    %cst_207 = arith.constant dense<0xFF800000> : vector<8xf32>
    %571 = vector.multi_reduction <maximumf>, %570, %cst_207 [1] : vector<8x8xf32> to vector<8xf32>
    %572 = vector.shape_cast %571 : vector<8xf32> to vector<8x1xf32>
    %573 = vector.broadcast %572 : vector<8x1xf32> to vector<8x8xf32>
    %574 = arith.subf %570, %573 : vector<8x8xf32>
    %575 = math.exp %574 : vector<8x8xf32>
    %cst_208 = arith.constant dense<0.000000e+00> : vector<8xf32>
    %576 = vector.multi_reduction <add>, %575, %cst_208 [1] : vector<8x8xf32> to vector<8xf32>
    %577 = vector.shape_cast %576 : vector<8xf32> to vector<8x1xf32>
    %578 = tpu.reciprocal %577 {approx = true} : vector<8x1xf32> -> vector<8x1xf32>
    %579 = vector.broadcast %578 : vector<8x1xf32> to vector<8x8xf32>
    %580 = arith.mulf %575, %579 : vector<8x8xf32>
    %cst_209 = arith.constant dense<0.000000e+00> : vector<8x8xf32>
    %581 = tpu.matmul %580, %567, %cst_209 {dimension_numbers = #tpu.dot_dimension_numbers<[1], [0], [0], [1], [0, 0, 1, 1], [], []>} : vector<8x8xf32>, vector<8x8xf32>, vector<8x8xf32> -> vector<8x8xf32>
    %582 = tpu.concatenate %530, %547, %564, %581 in 1 : vector<8x8xf32>, vector<8x8xf32>, vector<8x8xf32>, vector<8x8xf32> -> vector<8x32xf32>
    %583 = tpu.concatenate %510, %582 in 0 : vector<8x32xf32>, vector<8x32xf32> -> vector<16x32xf32>
    %c1_210 = arith.constant 1 : index
    %c0_211 = arith.constant 0 : index
    %c0_212 = arith.constant 0 : index
    %584 = vector.load %arg3[%c1_210, %c0_211, %c0_212] : memref<2x32x32xf32, #tpu.memory_space<vmem>>, vector<1x32x32xf32>
    %585 = vector.shape_cast %584 : vector<1x32x32xf32> to vector<32x32xf32>
    %c1_213 = arith.constant 1 : index
    %c0_214 = arith.constant 0 : index
    %c0_215 = arith.constant 0 : index
    %586 = vector.load %arg4[%c1_213, %c0_214, %c0_215] : memref<2x1x32xf32, #tpu.memory_space<vmem>>, vector<1x1x32xf32>
    %587 = vector.shape_cast %586 : vector<1x1x32xf32> to vector<1x32xf32>
    %cst_216 = arith.constant dense<0.000000e+00> : vector<16x32xf32>
    %588 = tpu.matmul %583, %585, %cst_216 {dimension_numbers = #tpu.dot_dimension_numbers<[1], [0], [0], [1], [0, 0, 1, 1], [], []>} : vector<16x32xf32>, vector<32x32xf32>, vector<16x32xf32> -> vector<16x32xf32>
    %589 = vector.broadcast %587 : vector<1x32xf32> to vector<16x32xf32>
    %590 = arith.addf %588, %589 : vector<16x32xf32>
    %591 = arith.addf %428, %590 : vector<16x32xf32>
    %c1_217 = arith.constant 1 : index
    %c0_218 = arith.constant 0 : index
    %c0_219 = arith.constant 0 : index
    %592 = vector.load %arg15[%c1_217, %c0_218, %c0_219] : memref<2x1x32xf32, #tpu.memory_space<vmem>>, vector<1x1x32xf32>
    %593 = vector.shape_cast %592 : vector<1x1x32xf32> to vector<1x32xf32>
    %c1_220 = arith.constant 1 : index
    %c0_221 = arith.constant 0 : index
    %c0_222 = arith.constant 0 : index
    %594 = vector.load %arg16[%c1_220, %c0_221, %c0_222] : memref<2x1x32xf32, #tpu.memory_space<vmem>>, vector<1x1x32xf32>
    %595 = vector.shape_cast %594 : vector<1x1x32xf32> to vector<1x32xf32>
    %cst_223 = arith.constant dense<0.000000e+00> : vector<16xf32>
    %596 = vector.multi_reduction <add>, %591, %cst_223 [1] : vector<16x32xf32> to vector<16xf32>
    %597 = vector.shape_cast %596 : vector<16xf32> to vector<16x1xf32>
    %cst_224 = arith.constant 3.200000e+01 : f32
    %598 = vector.broadcast %cst_224 : f32 to vector<16x1xf32>
    %599 = arith.divf %597, %598 : vector<16x1xf32>
    %600 = vector.broadcast %599 : vector<16x1xf32> to vector<16x32xf32>
    %601 = arith.subf %591, %600 : vector<16x32xf32>
    %602 = arith.mulf %601, %601 : vector<16x32xf32>
    %cst_225 = arith.constant dense<0.000000e+00> : vector<16xf32>
    %603 = vector.multi_reduction <add>, %602, %cst_225 [1] : vector<16x32xf32> to vector<16xf32>
    %604 = vector.shape_cast %603 : vector<16xf32> to vector<16x1xf32>
    %cst_226 = arith.constant 3.200000e+01 : f32
    %605 = vector.broadcast %cst_226 : f32 to vector<16x1xf32>
    %606 = arith.divf %604, %605 : vector<16x1xf32>
    %607 = vector.broadcast %599 : vector<16x1xf32> to vector<16x32xf32>
    %608 = arith.subf %591, %607 : vector<16x32xf32>
    %cst_227 = arith.constant 9.99999974E-6 : f32
    %609 = vector.broadcast %cst_227 : f32 to vector<16x1xf32>
    %610 = arith.addf %606, %609 : vector<16x1xf32>
    %611 = math.rsqrt %610 : vector<16x1xf32>
    %612 = vector.broadcast %611 : vector<16x1xf32> to vector<16x32xf32>
    %613 = arith.mulf %608, %612 : vector<16x32xf32>
    %614 = vector.broadcast %593 : vector<1x32xf32> to vector<16x32xf32>
    %615 = arith.mulf %613, %614 : vector<16x32xf32>
    %616 = vector.broadcast %595 : vector<1x32xf32> to vector<16x32xf32>
    %617 = arith.addf %615, %616 : vector<16x32xf32>
    %c1_228 = arith.constant 1 : index
    %c0_229 = arith.constant 0 : index
    %c0_230 = arith.constant 0 : index
    %618 = vector.load %arg5[%c1_228, %c0_229, %c0_230] : memref<2x32x32xf32, #tpu.memory_space<vmem>>, vector<1x32x32xf32>
    %619 = vector.shape_cast %618 : vector<1x32x32xf32> to vector<32x32xf32>
    %c1_231 = arith.constant 1 : index
    %c0_232 = arith.constant 0 : index
    %c0_233 = arith.constant 0 : index
    %620 = vector.load %arg6[%c1_231, %c0_232, %c0_233] : memref<2x1x32xf32, #tpu.memory_space<vmem>>, vector<1x1x32xf32>
    %621 = vector.shape_cast %620 : vector<1x1x32xf32> to vector<1x32xf32>
    %cst_234 = arith.constant dense<0.000000e+00> : vector<16x32xf32>
    %622 = tpu.matmul %617, %619, %cst_234 {dimension_numbers = #tpu.dot_dimension_numbers<[1], [0], [0], [1], [0, 0, 1, 1], [], []>} : vector<16x32xf32>, vector<32x32xf32>, vector<16x32xf32> -> vector<16x32xf32>
    %623 = vector.broadcast %621 : vector<1x32xf32> to vector<16x32xf32>
    %624 = arith.addf %622, %623 : vector<16x32xf32>
    %c1_235 = arith.constant 1 : index
    %c0_236 = arith.constant 0 : index
    %c0_237 = arith.constant 0 : index
    %625 = vector.load %arg7[%c1_235, %c0_236, %c0_237] : memref<2x32x64xf32, #tpu.memory_space<vmem>>, vector<1x32x64xf32>
    %626 = vector.shape_cast %625 : vector<1x32x64xf32> to vector<32x64xf32>
    %c1_238 = arith.constant 1 : index
    %c0_239 = arith.constant 0 : index
    %c0_240 = arith.constant 0 : index
    %627 = vector.load %arg8[%c1_238, %c0_239, %c0_240] : memref<2x1x64xf32, #tpu.memory_space<vmem>>, vector<1x1x64xf32>
    %628 = vector.shape_cast %627 : vector<1x1x64xf32> to vector<1x64xf32>
    %cst_241 = arith.constant dense<0.000000e+00> : vector<16x64xf32>
    %629 = tpu.matmul %0, %626, %cst_241 {dimension_numbers = #tpu.dot_dimension_numbers<[1], [0], [0], [1], [0, 0, 1, 1], [], []>} : vector<16x32xf32>, vector<32x64xf32>, vector<16x64xf32> -> vector<16x64xf32>
    %630 = vector.broadcast %628 : vector<1x64xf32> to vector<16x64xf32>
    %631 = arith.addf %629, %630 : vector<16x64xf32>
    %632 = vector.extract_strided_slice %631 {offsets = [0, 0], sizes = [16, 32], strides = [1, 1]} : vector<16x64xf32> to vector<16x32xf32>
    %633 = vector.extract_strided_slice %631 {offsets = [0, 32], sizes = [16, 32], strides = [1, 1]} : vector<16x64xf32> to vector<16x32xf32>
    %634 = vector.extract_strided_slice %624 {offsets = [0, 0], sizes = [8, 32], strides = [1, 1]} : vector<16x32xf32> to vector<8x32xf32>
    %635 = vector.extract_strided_slice %632 {offsets = [0, 0], sizes = [8, 32], strides = [1, 1]} : vector<16x32xf32> to vector<8x32xf32>
    %636 = vector.extract_strided_slice %633 {offsets = [0, 0], sizes = [8, 32], strides = [1, 1]} : vector<16x32xf32> to vector<8x32xf32>
    %637 = vector.extract_strided_slice %634 {offsets = [0, 0], sizes = [8, 8], strides = [1, 1]} : vector<8x32xf32> to vector<8x8xf32>
    %638 = vector.extract_strided_slice %635 {offsets = [0, 0], sizes = [8, 8], strides = [1, 1]} : vector<8x32xf32> to vector<8x8xf32>
    %639 = vector.extract_strided_slice %636 {offsets = [0, 0], sizes = [8, 8], strides = [1, 1]} : vector<8x32xf32> to vector<8x8xf32>
    %cst_242 = arith.constant dense<0.000000e+00> : vector<8x8xf32>
    %640 = tpu.matmul %637, %638, %cst_242 {dimension_numbers = #tpu.dot_dimension_numbers<[1], [1], [0], [0], [0, 0, 1, 0], [], []>} : vector<8x8xf32>, vector<8x8xf32>, vector<8x8xf32> -> vector<8x8xf32>
    %cst_243 = arith.constant 0.353553385 : f32
    %641 = vector.broadcast %cst_243 : f32 to vector<8x8xf32>
    %642 = arith.mulf %640, %641 : vector<8x8xf32>
    %cst_244 = arith.constant dense<0xFF800000> : vector<8xf32>
    %643 = vector.multi_reduction <maximumf>, %642, %cst_244 [1] : vector<8x8xf32> to vector<8xf32>
    %644 = vector.shape_cast %643 : vector<8xf32> to vector<8x1xf32>
    %645 = vector.broadcast %644 : vector<8x1xf32> to vector<8x8xf32>
    %646 = arith.subf %642, %645 : vector<8x8xf32>
    %647 = math.exp %646 : vector<8x8xf32>
    %cst_245 = arith.constant dense<0.000000e+00> : vector<8xf32>
    %648 = vector.multi_reduction <add>, %647, %cst_245 [1] : vector<8x8xf32> to vector<8xf32>
    %649 = vector.shape_cast %648 : vector<8xf32> to vector<8x1xf32>
    %650 = tpu.reciprocal %649 {approx = true} : vector<8x1xf32> -> vector<8x1xf32>
    %651 = vector.broadcast %650 : vector<8x1xf32> to vector<8x8xf32>
    %652 = arith.mulf %647, %651 : vector<8x8xf32>
    %cst_246 = arith.constant dense<0.000000e+00> : vector<8x8xf32>
    %653 = tpu.matmul %652, %639, %cst_246 {dimension_numbers = #tpu.dot_dimension_numbers<[1], [0], [0], [1], [0, 0, 1, 1], [], []>} : vector<8x8xf32>, vector<8x8xf32>, vector<8x8xf32> -> vector<8x8xf32>
    %654 = vector.extract_strided_slice %634 {offsets = [0, 8], sizes = [8, 8], strides = [1, 1]} : vector<8x32xf32> to vector<8x8xf32>
    %655 = vector.extract_strided_slice %635 {offsets = [0, 8], sizes = [8, 8], strides = [1, 1]} : vector<8x32xf32> to vector<8x8xf32>
    %656 = vector.extract_strided_slice %636 {offsets = [0, 8], sizes = [8, 8], strides = [1, 1]} : vector<8x32xf32> to vector<8x8xf32>
    %cst_247 = arith.constant dense<0.000000e+00> : vector<8x8xf32>
    %657 = tpu.matmul %654, %655, %cst_247 {dimension_numbers = #tpu.dot_dimension_numbers<[1], [1], [0], [0], [0, 0, 1, 0], [], []>} : vector<8x8xf32>, vector<8x8xf32>, vector<8x8xf32> -> vector<8x8xf32>
    %cst_248 = arith.constant 0.353553385 : f32
    %658 = vector.broadcast %cst_248 : f32 to vector<8x8xf32>
    %659 = arith.mulf %657, %658 : vector<8x8xf32>
    %cst_249 = arith.constant dense<0xFF800000> : vector<8xf32>
    %660 = vector.multi_reduction <maximumf>, %659, %cst_249 [1] : vector<8x8xf32> to vector<8xf32>
    %661 = vector.shape_cast %660 : vector<8xf32> to vector<8x1xf32>
    %662 = vector.broadcast %661 : vector<8x1xf32> to vector<8x8xf32>
    %663 = arith.subf %659, %662 : vector<8x8xf32>
    %664 = math.exp %663 : vector<8x8xf32>
    %cst_250 = arith.constant dense<0.000000e+00> : vector<8xf32>
    %665 = vector.multi_reduction <add>, %664, %cst_250 [1] : vector<8x8xf32> to vector<8xf32>
    %666 = vector.shape_cast %665 : vector<8xf32> to vector<8x1xf32>
    %667 = tpu.reciprocal %666 {approx = true} : vector<8x1xf32> -> vector<8x1xf32>
    %668 = vector.broadcast %667 : vector<8x1xf32> to vector<8x8xf32>
    %669 = arith.mulf %664, %668 : vector<8x8xf32>
    %cst_251 = arith.constant dense<0.000000e+00> : vector<8x8xf32>
    %670 = tpu.matmul %669, %656, %cst_251 {dimension_numbers = #tpu.dot_dimension_numbers<[1], [0], [0], [1], [0, 0, 1, 1], [], []>} : vector<8x8xf32>, vector<8x8xf32>, vector<8x8xf32> -> vector<8x8xf32>
    %671 = vector.extract_strided_slice %634 {offsets = [0, 16], sizes = [8, 8], strides = [1, 1]} : vector<8x32xf32> to vector<8x8xf32>
    %672 = vector.extract_strided_slice %635 {offsets = [0, 16], sizes = [8, 8], strides = [1, 1]} : vector<8x32xf32> to vector<8x8xf32>
    %673 = vector.extract_strided_slice %636 {offsets = [0, 16], sizes = [8, 8], strides = [1, 1]} : vector<8x32xf32> to vector<8x8xf32>
    %cst_252 = arith.constant dense<0.000000e+00> : vector<8x8xf32>
    %674 = tpu.matmul %671, %672, %cst_252 {dimension_numbers = #tpu.dot_dimension_numbers<[1], [1], [0], [0], [0, 0, 1, 0], [], []>} : vector<8x8xf32>, vector<8x8xf32>, vector<8x8xf32> -> vector<8x8xf32>
    %cst_253 = arith.constant 0.353553385 : f32
    %675 = vector.broadcast %cst_253 : f32 to vector<8x8xf32>
    %676 = arith.mulf %674, %675 : vector<8x8xf32>
    %cst_254 = arith.constant dense<0xFF800000> : vector<8xf32>
    %677 = vector.multi_reduction <maximumf>, %676, %cst_254 [1] : vector<8x8xf32> to vector<8xf32>
    %678 = vector.shape_cast %677 : vector<8xf32> to vector<8x1xf32>
    %679 = vector.broadcast %678 : vector<8x1xf32> to vector<8x8xf32>
    %680 = arith.subf %676, %679 : vector<8x8xf32>
    %681 = math.exp %680 : vector<8x8xf32>
    %cst_255 = arith.constant dense<0.000000e+00> : vector<8xf32>
    %682 = vector.multi_reduction <add>, %681, %cst_255 [1] : vector<8x8xf32> to vector<8xf32>
    %683 = vector.shape_cast %682 : vector<8xf32> to vector<8x1xf32>
    %684 = tpu.reciprocal %683 {approx = true} : vector<8x1xf32> -> vector<8x1xf32>
    %685 = vector.broadcast %684 : vector<8x1xf32> to vector<8x8xf32>
    %686 = arith.mulf %681, %685 : vector<8x8xf32>
    %cst_256 = arith.constant dense<0.000000e+00> : vector<8x8xf32>
    %687 = tpu.matmul %686, %673, %cst_256 {dimension_numbers = #tpu.dot_dimension_numbers<[1], [0], [0], [1], [0, 0, 1, 1], [], []>} : vector<8x8xf32>, vector<8x8xf32>, vector<8x8xf32> -> vector<8x8xf32>
    %688 = vector.extract_strided_slice %634 {offsets = [0, 24], sizes = [8, 8], strides = [1, 1]} : vector<8x32xf32> to vector<8x8xf32>
    %689 = vector.extract_strided_slice %635 {offsets = [0, 24], sizes = [8, 8], strides = [1, 1]} : vector<8x32xf32> to vector<8x8xf32>
    %690 = vector.extract_strided_slice %636 {offsets = [0, 24], sizes = [8, 8], strides = [1, 1]} : vector<8x32xf32> to vector<8x8xf32>
    %cst_257 = arith.constant dense<0.000000e+00> : vector<8x8xf32>
    %691 = tpu.matmul %688, %689, %cst_257 {dimension_numbers = #tpu.dot_dimension_numbers<[1], [1], [0], [0], [0, 0, 1, 0], [], []>} : vector<8x8xf32>, vector<8x8xf32>, vector<8x8xf32> -> vector<8x8xf32>
    %cst_258 = arith.constant 0.353553385 : f32
    %692 = vector.broadcast %cst_258 : f32 to vector<8x8xf32>
    %693 = arith.mulf %691, %692 : vector<8x8xf32>
    %cst_259 = arith.constant dense<0xFF800000> : vector<8xf32>
    %694 = vector.multi_reduction <maximumf>, %693, %cst_259 [1] : vector<8x8xf32> to vector<8xf32>
    %695 = vector.shape_cast %694 : vector<8xf32> to vector<8x1xf32>
    %696 = vector.broadcast %695 : vector<8x1xf32> to vector<8x8xf32>
    %697 = arith.subf %693, %696 : vector<8x8xf32>
    %698 = math.exp %697 : vector<8x8xf32>
    %cst_260 = arith.constant dense<0.000000e+00> : vector<8xf32>
    %699 = vector.multi_reduction <add>, %698, %cst_260 [1] : vector<8x8xf32> to vector<8xf32>
    %700 = vector.shape_cast %699 : vector<8xf32> to vector<8x1xf32>
    %701 = tpu.reciprocal %700 {approx = true} : vector<8x1xf32> -> vector<8x1xf32>
    %702 = vector.broadcast %701 : vector<8x1xf32> to vector<8x8xf32>
    %703 = arith.mulf %698, %702 : vector<8x8xf32>
    %cst_261 = arith.constant dense<0.000000e+00> : vector<8x8xf32>
    %704 = tpu.matmul %703, %690, %cst_261 {dimension_numbers = #tpu.dot_dimension_numbers<[1], [0], [0], [1], [0, 0, 1, 1], [], []>} : vector<8x8xf32>, vector<8x8xf32>, vector<8x8xf32> -> vector<8x8xf32>
    %705 = tpu.concatenate %653, %670, %687, %704 in 1 : vector<8x8xf32>, vector<8x8xf32>, vector<8x8xf32>, vector<8x8xf32> -> vector<8x32xf32>
    %706 = vector.extract_strided_slice %624 {offsets = [8, 0], sizes = [8, 32], strides = [1, 1]} : vector<16x32xf32> to vector<8x32xf32>
    %707 = vector.extract_strided_slice %632 {offsets = [8, 0], sizes = [8, 32], strides = [1, 1]} : vector<16x32xf32> to vector<8x32xf32>
    %708 = vector.extract_strided_slice %633 {offsets = [8, 0], sizes = [8, 32], strides = [1, 1]} : vector<16x32xf32> to vector<8x32xf32>
    %709 = vector.extract_strided_slice %706 {offsets = [0, 0], sizes = [8, 8], strides = [1, 1]} : vector<8x32xf32> to vector<8x8xf32>
    %710 = vector.extract_strided_slice %707 {offsets = [0, 0], sizes = [8, 8], strides = [1, 1]} : vector<8x32xf32> to vector<8x8xf32>
    %711 = vector.extract_strided_slice %708 {offsets = [0, 0], sizes = [8, 8], strides = [1, 1]} : vector<8x32xf32> to vector<8x8xf32>
    %cst_262 = arith.constant dense<0.000000e+00> : vector<8x8xf32>
    %712 = tpu.matmul %709, %710, %cst_262 {dimension_numbers = #tpu.dot_dimension_numbers<[1], [1], [0], [0], [0, 0, 1, 0], [], []>} : vector<8x8xf32>, vector<8x8xf32>, vector<8x8xf32> -> vector<8x8xf32>
    %cst_263 = arith.constant 0.353553385 : f32
    %713 = vector.broadcast %cst_263 : f32 to vector<8x8xf32>
    %714 = arith.mulf %712, %713 : vector<8x8xf32>
    %cst_264 = arith.constant dense<0xFF800000> : vector<8xf32>
    %715 = vector.multi_reduction <maximumf>, %714, %cst_264 [1] : vector<8x8xf32> to vector<8xf32>
    %716 = vector.shape_cast %715 : vector<8xf32> to vector<8x1xf32>
    %717 = vector.broadcast %716 : vector<8x1xf32> to vector<8x8xf32>
    %718 = arith.subf %714, %717 : vector<8x8xf32>
    %719 = math.exp %718 : vector<8x8xf32>
    %cst_265 = arith.constant dense<0.000000e+00> : vector<8xf32>
    %720 = vector.multi_reduction <add>, %719, %cst_265 [1] : vector<8x8xf32> to vector<8xf32>
    %721 = vector.shape_cast %720 : vector<8xf32> to vector<8x1xf32>
    %722 = tpu.reciprocal %721 {approx = true} : vector<8x1xf32> -> vector<8x1xf32>
    %723 = vector.broadcast %722 : vector<8x1xf32> to vector<8x8xf32>
    %724 = arith.mulf %719, %723 : vector<8x8xf32>
    %cst_266 = arith.constant dense<0.000000e+00> : vector<8x8xf32>
    %725 = tpu.matmul %724, %711, %cst_266 {dimension_numbers = #tpu.dot_dimension_numbers<[1], [0], [0], [1], [0, 0, 1, 1], [], []>} : vector<8x8xf32>, vector<8x8xf32>, vector<8x8xf32> -> vector<8x8xf32>
    %726 = vector.extract_strided_slice %706 {offsets = [0, 8], sizes = [8, 8], strides = [1, 1]} : vector<8x32xf32> to vector<8x8xf32>
    %727 = vector.extract_strided_slice %707 {offsets = [0, 8], sizes = [8, 8], strides = [1, 1]} : vector<8x32xf32> to vector<8x8xf32>
    %728 = vector.extract_strided_slice %708 {offsets = [0, 8], sizes = [8, 8], strides = [1, 1]} : vector<8x32xf32> to vector<8x8xf32>
    %cst_267 = arith.constant dense<0.000000e+00> : vector<8x8xf32>
    %729 = tpu.matmul %726, %727, %cst_267 {dimension_numbers = #tpu.dot_dimension_numbers<[1], [1], [0], [0], [0, 0, 1, 0], [], []>} : vector<8x8xf32>, vector<8x8xf32>, vector<8x8xf32> -> vector<8x8xf32>
    %cst_268 = arith.constant 0.353553385 : f32
    %730 = vector.broadcast %cst_268 : f32 to vector<8x8xf32>
    %731 = arith.mulf %729, %730 : vector<8x8xf32>
    %cst_269 = arith.constant dense<0xFF800000> : vector<8xf32>
    %732 = vector.multi_reduction <maximumf>, %731, %cst_269 [1] : vector<8x8xf32> to vector<8xf32>
    %733 = vector.shape_cast %732 : vector<8xf32> to vector<8x1xf32>
    %734 = vector.broadcast %733 : vector<8x1xf32> to vector<8x8xf32>
    %735 = arith.subf %731, %734 : vector<8x8xf32>
    %736 = math.exp %735 : vector<8x8xf32>
    %cst_270 = arith.constant dense<0.000000e+00> : vector<8xf32>
    %737 = vector.multi_reduction <add>, %736, %cst_270 [1] : vector<8x8xf32> to vector<8xf32>
    %738 = vector.shape_cast %737 : vector<8xf32> to vector<8x1xf32>
    %739 = tpu.reciprocal %738 {approx = true} : vector<8x1xf32> -> vector<8x1xf32>
    %740 = vector.broadcast %739 : vector<8x1xf32> to vector<8x8xf32>
    %741 = arith.mulf %736, %740 : vector<8x8xf32>
    %cst_271 = arith.constant dense<0.000000e+00> : vector<8x8xf32>
    %742 = tpu.matmul %741, %728, %cst_271 {dimension_numbers = #tpu.dot_dimension_numbers<[1], [0], [0], [1], [0, 0, 1, 1], [], []>} : vector<8x8xf32>, vector<8x8xf32>, vector<8x8xf32> -> vector<8x8xf32>
    %743 = vector.extract_strided_slice %706 {offsets = [0, 16], sizes = [8, 8], strides = [1, 1]} : vector<8x32xf32> to vector<8x8xf32>
    %744 = vector.extract_strided_slice %707 {offsets = [0, 16], sizes = [8, 8], strides = [1, 1]} : vector<8x32xf32> to vector<8x8xf32>
    %745 = vector.extract_strided_slice %708 {offsets = [0, 16], sizes = [8, 8], strides = [1, 1]} : vector<8x32xf32> to vector<8x8xf32>
    %cst_272 = arith.constant dense<0.000000e+00> : vector<8x8xf32>
    %746 = tpu.matmul %743, %744, %cst_272 {dimension_numbers = #tpu.dot_dimension_numbers<[1], [1], [0], [0], [0, 0, 1, 0], [], []>} : vector<8x8xf32>, vector<8x8xf32>, vector<8x8xf32> -> vector<8x8xf32>
    %cst_273 = arith.constant 0.353553385 : f32
    %747 = vector.broadcast %cst_273 : f32 to vector<8x8xf32>
    %748 = arith.mulf %746, %747 : vector<8x8xf32>
    %cst_274 = arith.constant dense<0xFF800000> : vector<8xf32>
    %749 = vector.multi_reduction <maximumf>, %748, %cst_274 [1] : vector<8x8xf32> to vector<8xf32>
    %750 = vector.shape_cast %749 : vector<8xf32> to vector<8x1xf32>
    %751 = vector.broadcast %750 : vector<8x1xf32> to vector<8x8xf32>
    %752 = arith.subf %748, %751 : vector<8x8xf32>
    %753 = math.exp %752 : vector<8x8xf32>
    %cst_275 = arith.constant dense<0.000000e+00> : vector<8xf32>
    %754 = vector.multi_reduction <add>, %753, %cst_275 [1] : vector<8x8xf32> to vector<8xf32>
    %755 = vector.shape_cast %754 : vector<8xf32> to vector<8x1xf32>
    %756 = tpu.reciprocal %755 {approx = true} : vector<8x1xf32> -> vector<8x1xf32>
    %757 = vector.broadcast %756 : vector<8x1xf32> to vector<8x8xf32>
    %758 = arith.mulf %753, %757 : vector<8x8xf32>
    %cst_276 = arith.constant dense<0.000000e+00> : vector<8x8xf32>
    %759 = tpu.matmul %758, %745, %cst_276 {dimension_numbers = #tpu.dot_dimension_numbers<[1], [0], [0], [1], [0, 0, 1, 1], [], []>} : vector<8x8xf32>, vector<8x8xf32>, vector<8x8xf32> -> vector<8x8xf32>
    %760 = vector.extract_strided_slice %706 {offsets = [0, 24], sizes = [8, 8], strides = [1, 1]} : vector<8x32xf32> to vector<8x8xf32>
    %761 = vector.extract_strided_slice %707 {offsets = [0, 24], sizes = [8, 8], strides = [1, 1]} : vector<8x32xf32> to vector<8x8xf32>
    %762 = vector.extract_strided_slice %708 {offsets = [0, 24], sizes = [8, 8], strides = [1, 1]} : vector<8x32xf32> to vector<8x8xf32>
    %cst_277 = arith.constant dense<0.000000e+00> : vector<8x8xf32>
    %763 = tpu.matmul %760, %761, %cst_277 {dimension_numbers = #tpu.dot_dimension_numbers<[1], [1], [0], [0], [0, 0, 1, 0], [], []>} : vector<8x8xf32>, vector<8x8xf32>, vector<8x8xf32> -> vector<8x8xf32>
    %cst_278 = arith.constant 0.353553385 : f32
    %764 = vector.broadcast %cst_278 : f32 to vector<8x8xf32>
    %765 = arith.mulf %763, %764 : vector<8x8xf32>
    %cst_279 = arith.constant dense<0xFF800000> : vector<8xf32>
    %766 = vector.multi_reduction <maximumf>, %765, %cst_279 [1] : vector<8x8xf32> to vector<8xf32>
    %767 = vector.shape_cast %766 : vector<8xf32> to vector<8x1xf32>
    %768 = vector.broadcast %767 : vector<8x1xf32> to vector<8x8xf32>
    %769 = arith.subf %765, %768 : vector<8x8xf32>
    %770 = math.exp %769 : vector<8x8xf32>
    %cst_280 = arith.constant dense<0.000000e+00> : vector<8xf32>
    %771 = vector.multi_reduction <add>, %770, %cst_280 [1] : vector<8x8xf32> to vector<8xf32>
    %772 = vector.shape_cast %771 : vector<8xf32> to vector<8x1xf32>
    %773 = tpu.reciprocal %772 {approx = true} : vector<8x1xf32> -> vector<8x1xf32>
    %774 = vector.broadcast %773 : vector<8x1xf32> to vector<8x8xf32>
    %775 = arith.mulf %770, %774 : vector<8x8xf32>
    %cst_281 = arith.constant dense<0.000000e+00> : vector<8x8xf32>
    %776 = tpu.matmul %775, %762, %cst_281 {dimension_numbers = #tpu.dot_dimension_numbers<[1], [0], [0], [1], [0, 0, 1, 1], [], []>} : vector<8x8xf32>, vector<8x8xf32>, vector<8x8xf32> -> vector<8x8xf32>
    %777 = tpu.concatenate %725, %742, %759, %776 in 1 : vector<8x8xf32>, vector<8x8xf32>, vector<8x8xf32>, vector<8x8xf32> -> vector<8x32xf32>
    %778 = tpu.concatenate %705, %777 in 0 : vector<8x32xf32>, vector<8x32xf32> -> vector<16x32xf32>
    %c1_282 = arith.constant 1 : index
    %c0_283 = arith.constant 0 : index
    %c0_284 = arith.constant 0 : index
    %779 = vector.load %arg9[%c1_282, %c0_283, %c0_284] : memref<2x32x32xf32, #tpu.memory_space<vmem>>, vector<1x32x32xf32>
    %780 = vector.shape_cast %779 : vector<1x32x32xf32> to vector<32x32xf32>
    %c1_285 = arith.constant 1 : index
    %c0_286 = arith.constant 0 : index
    %c0_287 = arith.constant 0 : index
    %781 = vector.load %arg10[%c1_285, %c0_286, %c0_287] : memref<2x1x32xf32, #tpu.memory_space<vmem>>, vector<1x1x32xf32>
    %782 = vector.shape_cast %781 : vector<1x1x32xf32> to vector<1x32xf32>
    %cst_288 = arith.constant dense<0.000000e+00> : vector<16x32xf32>
    %783 = tpu.matmul %778, %780, %cst_288 {dimension_numbers = #tpu.dot_dimension_numbers<[1], [0], [0], [1], [0, 0, 1, 1], [], []>} : vector<16x32xf32>, vector<32x32xf32>, vector<16x32xf32> -> vector<16x32xf32>
    %784 = vector.broadcast %782 : vector<1x32xf32> to vector<16x32xf32>
    %785 = arith.addf %783, %784 : vector<16x32xf32>
    %786 = arith.addf %617, %785 : vector<16x32xf32>
    %c1_289 = arith.constant 1 : index
    %c0_290 = arith.constant 0 : index
    %c0_291 = arith.constant 0 : index
    %787 = vector.load %arg17[%c1_289, %c0_290, %c0_291] : memref<2x1x32xf32, #tpu.memory_space<vmem>>, vector<1x1x32xf32>
    %788 = vector.shape_cast %787 : vector<1x1x32xf32> to vector<1x32xf32>
    %c1_292 = arith.constant 1 : index
    %c0_293 = arith.constant 0 : index
    %c0_294 = arith.constant 0 : index
    %789 = vector.load %arg18[%c1_292, %c0_293, %c0_294] : memref<2x1x32xf32, #tpu.memory_space<vmem>>, vector<1x1x32xf32>
    %790 = vector.shape_cast %789 : vector<1x1x32xf32> to vector<1x32xf32>
    %cst_295 = arith.constant dense<0.000000e+00> : vector<16xf32>
    %791 = vector.multi_reduction <add>, %786, %cst_295 [1] : vector<16x32xf32> to vector<16xf32>
    %792 = vector.shape_cast %791 : vector<16xf32> to vector<16x1xf32>
    %cst_296 = arith.constant 3.200000e+01 : f32
    %793 = vector.broadcast %cst_296 : f32 to vector<16x1xf32>
    %794 = arith.divf %792, %793 : vector<16x1xf32>
    %795 = vector.broadcast %794 : vector<16x1xf32> to vector<16x32xf32>
    %796 = arith.subf %786, %795 : vector<16x32xf32>
    %797 = arith.mulf %796, %796 : vector<16x32xf32>
    %cst_297 = arith.constant dense<0.000000e+00> : vector<16xf32>
    %798 = vector.multi_reduction <add>, %797, %cst_297 [1] : vector<16x32xf32> to vector<16xf32>
    %799 = vector.shape_cast %798 : vector<16xf32> to vector<16x1xf32>
    %cst_298 = arith.constant 3.200000e+01 : f32
    %800 = vector.broadcast %cst_298 : f32 to vector<16x1xf32>
    %801 = arith.divf %799, %800 : vector<16x1xf32>
    %802 = vector.broadcast %794 : vector<16x1xf32> to vector<16x32xf32>
    %803 = arith.subf %786, %802 : vector<16x32xf32>
    %cst_299 = arith.constant 9.99999974E-6 : f32
    %804 = vector.broadcast %cst_299 : f32 to vector<16x1xf32>
    %805 = arith.addf %801, %804 : vector<16x1xf32>
    %806 = math.rsqrt %805 : vector<16x1xf32>
    %807 = vector.broadcast %806 : vector<16x1xf32> to vector<16x32xf32>
    %808 = arith.mulf %803, %807 : vector<16x32xf32>
    %809 = vector.broadcast %788 : vector<1x32xf32> to vector<16x32xf32>
    %810 = arith.mulf %808, %809 : vector<16x32xf32>
    %811 = vector.broadcast %790 : vector<1x32xf32> to vector<16x32xf32>
    %812 = arith.addf %810, %811 : vector<16x32xf32>
    %c1_300 = arith.constant 1 : index
    %c0_301 = arith.constant 0 : index
    %c0_302 = arith.constant 0 : index
    %813 = vector.load %arg11[%c1_300, %c0_301, %c0_302] : memref<2x32x64xf32, #tpu.memory_space<vmem>>, vector<1x32x64xf32>
    %814 = vector.shape_cast %813 : vector<1x32x64xf32> to vector<32x64xf32>
    %c1_303 = arith.constant 1 : index
    %c0_304 = arith.constant 0 : index
    %c0_305 = arith.constant 0 : index
    %815 = vector.load %arg12[%c1_303, %c0_304, %c0_305] : memref<2x1x64xf32, #tpu.memory_space<vmem>>, vector<1x1x64xf32>
    %816 = vector.shape_cast %815 : vector<1x1x64xf32> to vector<1x64xf32>
    %cst_306 = arith.constant dense<0.000000e+00> : vector<16x64xf32>
    %817 = tpu.matmul %812, %814, %cst_306 {dimension_numbers = #tpu.dot_dimension_numbers<[1], [0], [0], [1], [0, 0, 1, 1], [], []>} : vector<16x32xf32>, vector<32x64xf32>, vector<16x64xf32> -> vector<16x64xf32>
    %818 = vector.broadcast %816 : vector<1x64xf32> to vector<16x64xf32>
    %819 = arith.addf %817, %818 : vector<16x64xf32>
    %cst_307 = arith.constant 0.000000e+00 : f32
    %820 = vector.broadcast %cst_307 : f32 to vector<16x64xf32>
    %821 = arith.maximumf %819, %820 : vector<16x64xf32>
    %c1_308 = arith.constant 1 : index
    %c0_309 = arith.constant 0 : index
    %c0_310 = arith.constant 0 : index
    %822 = vector.load %arg13[%c1_308, %c0_309, %c0_310] : memref<2x64x32xf32, #tpu.memory_space<vmem>>, vector<1x64x32xf32>
    %823 = vector.shape_cast %822 : vector<1x64x32xf32> to vector<64x32xf32>
    %c1_311 = arith.constant 1 : index
    %c0_312 = arith.constant 0 : index
    %c0_313 = arith.constant 0 : index
    %824 = vector.load %arg14[%c1_311, %c0_312, %c0_313] : memref<2x1x32xf32, #tpu.memory_space<vmem>>, vector<1x1x32xf32>
    %825 = vector.shape_cast %824 : vector<1x1x32xf32> to vector<1x32xf32>
    %cst_314 = arith.constant dense<0.000000e+00> : vector<16x32xf32>
    %826 = tpu.matmul %821, %823, %cst_314 {dimension_numbers = #tpu.dot_dimension_numbers<[1], [0], [0], [1], [0, 0, 1, 1], [], []>} : vector<16x64xf32>, vector<64x32xf32>, vector<16x32xf32> -> vector<16x32xf32>
    %827 = vector.broadcast %825 : vector<1x32xf32> to vector<16x32xf32>
    %828 = arith.addf %826, %827 : vector<16x32xf32>
    %829 = arith.addf %812, %828 : vector<16x32xf32>
    %c1_315 = arith.constant 1 : index
    %c0_316 = arith.constant 0 : index
    %c0_317 = arith.constant 0 : index
    %830 = vector.load %arg19[%c1_315, %c0_316, %c0_317] : memref<2x1x32xf32, #tpu.memory_space<vmem>>, vector<1x1x32xf32>
    %831 = vector.shape_cast %830 : vector<1x1x32xf32> to vector<1x32xf32>
    %c1_318 = arith.constant 1 : index
    %c0_319 = arith.constant 0 : index
    %c0_320 = arith.constant 0 : index
    %832 = vector.load %arg20[%c1_318, %c0_319, %c0_320] : memref<2x1x32xf32, #tpu.memory_space<vmem>>, vector<1x1x32xf32>
    %833 = vector.shape_cast %832 : vector<1x1x32xf32> to vector<1x32xf32>
    %cst_321 = arith.constant dense<0.000000e+00> : vector<16xf32>
    %834 = vector.multi_reduction <add>, %829, %cst_321 [1] : vector<16x32xf32> to vector<16xf32>
    %835 = vector.shape_cast %834 : vector<16xf32> to vector<16x1xf32>
    %cst_322 = arith.constant 3.200000e+01 : f32
    %836 = vector.broadcast %cst_322 : f32 to vector<16x1xf32>
    %837 = arith.divf %835, %836 : vector<16x1xf32>
    %838 = vector.broadcast %837 : vector<16x1xf32> to vector<16x32xf32>
    %839 = arith.subf %829, %838 : vector<16x32xf32>
    %840 = arith.mulf %839, %839 : vector<16x32xf32>
    %cst_323 = arith.constant dense<0.000000e+00> : vector<16xf32>
    %841 = vector.multi_reduction <add>, %840, %cst_323 [1] : vector<16x32xf32> to vector<16xf32>
    %842 = vector.shape_cast %841 : vector<16xf32> to vector<16x1xf32>
    %cst_324 = arith.constant 3.200000e+01 : f32
    %843 = vector.broadcast %cst_324 : f32 to vector<16x1xf32>
    %844 = arith.divf %842, %843 : vector<16x1xf32>
    %845 = vector.broadcast %837 : vector<16x1xf32> to vector<16x32xf32>
    %846 = arith.subf %829, %845 : vector<16x32xf32>
    %cst_325 = arith.constant 9.99999974E-6 : f32
    %847 = vector.broadcast %cst_325 : f32 to vector<16x1xf32>
    %848 = arith.addf %844, %847 : vector<16x1xf32>
    %849 = math.rsqrt %848 : vector<16x1xf32>
    %850 = vector.broadcast %849 : vector<16x1xf32> to vector<16x32xf32>
    %851 = arith.mulf %846, %850 : vector<16x32xf32>
    %852 = vector.broadcast %831 : vector<1x32xf32> to vector<16x32xf32>
    %853 = arith.mulf %851, %852 : vector<16x32xf32>
    %854 = vector.broadcast %833 : vector<1x32xf32> to vector<16x32xf32>
    %855 = arith.addf %853, %854 : vector<16x32xf32>
    %c0_326 = arith.constant 0 : index
    %c0_327 = arith.constant 0 : index
    %856 = vector.load %arg21[%c0_326, %c0_327] : memref<32x32xf32, #tpu.memory_space<vmem>>, vector<32x32xf32>
    %c0_328 = arith.constant 0 : index
    %c0_329 = arith.constant 0 : index
    %857 = vector.load %arg22[%c0_328, %c0_329] : memref<1x32xf32, #tpu.memory_space<vmem>>, vector<1x32xf32>
    %cst_330 = arith.constant dense<0.000000e+00> : vector<16x32xf32>
    %858 = tpu.matmul %855, %856, %cst_330 {dimension_numbers = #tpu.dot_dimension_numbers<[1], [0], [0], [1], [0, 0, 1, 1], [], []>} : vector<16x32xf32>, vector<32x32xf32>, vector<16x32xf32> -> vector<16x32xf32>
    %859 = vector.broadcast %857 : vector<1x32xf32> to vector<16x32xf32>
    %860 = arith.addf %858, %859 : vector<16x32xf32>
    %c0_331 = arith.constant 0 : index
    %c0_332 = arith.constant 0 : index
    %861 = vector.load %arg23[%c0_331, %c0_332] : memref<16x32xf32, #tpu.memory_space<vmem>>, vector<16x32xf32>
    tpu.vector_store %arg23[%c0_331, %c0_332], %860 {strides = array<i32>} : memref<16x32xf32, #tpu.memory_space<vmem>>, vector<16x32xf32>,
    return
  }
}

</mosaic_0001>

<bundles_post_ra>
// kernel: tpu_custom_call.1
= control target key start
LH: loop header
LB: loop body
LE: loop exit
PB: predicated region body
PF: predicated region fallthrough
CT: control target
= control target key end

     0   :  { %s9912_s0 = inlined_call_operand.hbm [shape: f32[16,32], index: 0, kind: input, shape index: {}]   ;;  %s9913_s1 = inlined_call_operand.vmem [shape: f32[2,32,96], index: 1, kind: input, shape index: {}]   ;;  %s9914_s2 = inlined_call_operand.vmem [shape: f32[2,1,96], index: 2, kind: input, shape index: {}]   ;;  %s9915_s3 = inlined_call_operand.vmem [shape: f32[2,32,32], index: 3, kind: input, shape index: {}]   ;;  %s9916_s4 = inlined_call_operand.hbm [shape: f32[2,1,32], index: 4, kind: input, shape index: {}]   ;;  %s9917_s5 = inlined_call_operand.vmem [shape: f32[2,32,32], index: 5, kind: input, shape index: {}]   ;;  %s9918_s6 = inlined_call_operand.hbm [shape: f32[2,1,32], index: 6, kind: input, shape index: {}]   ;;  %s9919_s7 = inlined_call_operand.hbm [shape: f32[2,32,64], index: 7, kind: input, shape index: {}]   ;;  %s9920_s8 = inlined_call_operand.hbm [shape: f32[2,1,64], index: 8, kind: input, shape index: {}]   ;;  %s9921_s9 = inlined_call_operand.hbm [shape: f32[2,32,32], index: 9, kind: input, shape index: {}]   ;;  %s9922_s10 = inlined_call_operand.vmem [shape: f32[2,1,32], index: 10, kind: input, shape index: {}]   ;;  %s9923_s11 = inlined_call_operand.hbm [shape: f32[2,32,64], index: 11, kind: input, shape index: {}]   ;;  %s9924_s12 = inlined_call_operand.vmem [shape: f32[2,1,64], index: 12, kind: input, shape index: {}]   ;;  %s9925_s13 = inlined_call_operand.vmem [shape: f32[2,64,32], index: 13, kind: input, shape index: {}]   ;;  %s9926_s14 = inlined_call_operand.vmem [shape: f32[2,1,32], index: 14, kind: input, shape index: {}]   ;;  %s9927_s15 = inlined_call_operand.vmem [shape: f32[2,1,32], index: 15, kind: input, shape index: {}]   ;;  %s9928_s16 = inlined_call_operand.vmem [shape: f32[2,1,32], index: 16, kind: input, shape index: {}]   ;;  %s9929_s17 = inlined_call_operand.vmem [shape: f32[2,1,32], index: 17, kind: input, shape index: {}]   ;;  %s9930_s18 = inlined_call_operand.vmem [shape: f32[2,1,32], index: 18, kind: input, shape index: {}]   ;;  %s9931_s19 = inlined_call_operand.vmem [shape: f32[2,1,32], index: 19, kind: input, shape index: {}]   ;;  %s9932_s20 = inlined_call_operand.vmem [shape: f32[2,1,32], index: 20, kind: input, shape index: {}]   ;;  %s9933_s21 = inlined_call_operand.vmem [shape: f32[32,32], index: 21, kind: input, shape index: {}]   ;;  %s9934_s22 = inlined_call_operand.vmem [shape: f32[1,32], index: 22, kind: input, shape index: {}]   ;;  %s9935_s23 = inlined_call_operand.hbm [shape: f32[16,32], index: 23, kind: output, shape index: {}]  }
   0x1   :  { %9965 = sst [smem:[#allocation20_spill]] %s9912_s0 }
   0x2   :  { %9966 = sst [smem:[#allocation21_spill]] %s9913_s1 }
   0x3   :  { %9967 = sst [smem:[#allocation22_spill]] %s9914_s2 }
   0x4   :  { %9968 = sst [smem:[#allocation23_spill]] %s9915_s3 }
   0x5   :  { %9969 = sst [smem:[#allocation24_spill]] %s9916_s4 }
   0x6   :  { %9970 = sst [smem:[#allocation25_spill]] %s9917_s5 }
   0x7   :  { %9971 = sst [smem:[#allocation26_spill]] %s9918_s6 }
   0x8   :  { %9972 = sst [smem:[#allocation27_spill]] %s9919_s7 }
   0x9   :  { %9973 = sst [smem:[#allocation28_spill]] %s9933_s21 }
   0xa   :  { %9974 = sst [smem:[#allocation29_spill]] %s9934_s22 }
   0xb   :  { %9975 = sst [smem:[#allocation30_spill]] %s9935_s23 }
   0xc   :  { %28 = vsyncpa [#allocation3], 0 }
   0xd   :  { %29 = vsyncpa [#allocation6], 0 }
   0xe   :  { %30 = vsyncpa [#allocation9], 0 }
   0xf   :  { %31 = vsyncpa [#allocation12], 0 }
  0x10   :  { %32 = vsyncpa [#allocation4], 0  ;;  %s8709_s4 = smov [#allocation5]   ;;  %s9976_s5 = sld [smem:[#allocation24_spill]] }
  0x11   :  { %s56_s30 = sshll.u32 %s8709_s4, 4  ;;  %s57_s30 = int_to_ptr.vmem [resolvable:$true] %s56_s30 }
  0x16   :  { %s8523_s1 = scalar_lea.hbm %s9976_s5, 32 }
  0x17   :  { %p8524_p0 = scmp.ne.s32.totalorder %s9976_s5, %s8523_s1  ;;  %p8527_p1 = scmp.lt.u32.totalorder %s8523_s1, %s9976_s5 }
  0x19   :  { %p8529_p2 = pnand %p8527_p1, %p8524_p0 }
  0x1b   :  { %8532 = shalt.err (!%p8529_p2)
}
  0x1c   :  { %s8533_s7 = scalar_lea.vmem %s57_s30, 32  ;;  %p8538_p4 = scmp.lt.s32.totalorder %s57_s30, %s57_s30 }
  0x1d   :  { %p8534_p3 = scmp.ne.s32.totalorder %s57_s30, %s8533_s7  ;;  %p8539_p5 = scmp.lt.s32.totalorder %s8533_s7, %s8533_s7 }
  0x1f   :  { %p8540_p6 = por %p8539_p5, %p8538_p4 }
  0x21   :  { %p8541_p7 = pnand %p8540_p6, %p8534_p3 }
  0x23   :  { %8544 = shalt.err (!%p8541_p7)
}
  0x24   :  { %s9946_s28 = smov 16   ;;  %s8711_s29 = smov 1  }
  0x25   :  { %62 = dma.hbm_to_vmem [thread:$0]  %s9976_s5, 32, %s57_s30, [#allocation6], %s9946_s28, %s9946_s28, %s8711_s29  }
  0x26   :  { %s8712_s4 = smov [#allocation8]   ;;  %s8713_s25 = smov [#allocation11]  }
  0x27   :  { %s82_s24 = sshll.u32 %s8712_s4, 4  ;;  %s106_s1 = sshll.u32 %s8713_s25, 4  ;;  %s83_s24 = int_to_ptr.vmem [resolvable:$true] %s82_s24  ;;  %s107_s1 = int_to_ptr.vmem [resolvable:$true] %s106_s1 }
  0x28   :  { %s9977_s6 = sld [smem:[#allocation27_spill]] }
  0x2e   :  { %s8545_s27 = scalar_lea.hbm %s9977_s6, 1024 }
  0x2f   :  { %p8546_p8 = scmp.ne.s32.totalorder %s9977_s6, %s8545_s27  ;;  %p8549_p9 = scmp.lt.u32.totalorder %s8545_s27, %s9977_s6 }
  0x31   :  { %p8551_p10 = pnand %p8549_p9, %p8546_p8 }
  0x33   :  { %8554 = shalt.err (!%p8551_p10)
}
  0x34   :  { %s8555_s30 = scalar_lea.vmem %s83_s24, 1024  ;;  %p8560_p12 = scmp.lt.s32.totalorder %s83_s24, %s83_s24 }
  0x35   :  { %p8556_p11 = scmp.ne.s32.totalorder %s83_s24, %s8555_s30  ;;  %p8561_p13 = scmp.lt.s32.totalorder %s8555_s30, %s8555_s30 }
  0x37   :  { %p8562_p0 = por %p8561_p13, %p8560_p12 }
  0x39   :  { %p8563_p1 = pnand %p8562_p0, %p8556_p11 }
  0x3b   :  { %8566 = shalt.err (!%p8563_p1)
}
  0x3c   :  { %s9948_s5 = smov 128   ;;  %s9959_s3 = smov 8  }
  0x3d   :  { %88 = dma.hbm_to_vmem [thread:$0]  %s9977_s6, 1024, %s83_s24, [#allocation9], %s9948_s5, %s9948_s5, %s9959_s3  }
  0x3e   :  { %s8567_s4 = scalar_lea.hbm %s9921_s9, 1024 }
  0x3f   :  { %p8568_p2 = scmp.ne.s32.totalorder %s9921_s9, %s8567_s4  ;;  %p8571_p3 = scmp.lt.u32.totalorder %s8567_s4, %s9921_s9 }
  0x41   :  { %p8573_p4 = pnand %p8571_p3, %p8568_p2 }
  0x43   :  { %8576 = shalt.err (!%p8573_p4)
}
  0x44   :  { %s8577_s7 = scalar_lea.vmem %s107_s1, 1024  ;;  %p8582_p6 = scmp.lt.s32.totalorder %s107_s1, %s107_s1 }
  0x45   :  { %p8578_p5 = scmp.ne.s32.totalorder %s107_s1, %s8577_s7  ;;  %p8583_p7 = scmp.lt.s32.totalorder %s8577_s7, %s8577_s7 }
  0x47   :  { %p8584_p8 = por %p8583_p7, %p8582_p6 }
  0x49   :  { %p8585_p9 = pnand %p8584_p8, %p8578_p5 }
  0x4b   :  { %8588 = shalt.err (!%p8585_p9)
}
  0x4c   :  { %112 = dma.hbm_to_vmem [thread:$0]  %s9921_s9, 1024, %s107_s1, [#allocation12], %s9948_s5, %s9948_s5, %s9959_s3  }
  0x4d   :  { %s8716_s30 = smov [#allocation2]   ;;  %s8717_s0 = smov [#allocation7]  }
  0x4e   :  { %s38_s23 = sshll.u32 %s8716_s30, 4  ;;  %s70_s21 = sshll.u32 %s8717_s0, 4  ;;  %s39_s23 = int_to_ptr.vmem [resolvable:$true] %s38_s23  ;;  %s71_s21 = int_to_ptr.vmem [resolvable:$true] %s70_s21 }
  0x4f   :  { %s9978_s25 = sld [smem:[#allocation20_spill]] }
  0x55   :  { %s8589_s26 = scalar_lea.hbm %s9978_s25, 256 }
  0x56   :  { %p8590_p10 = scmp.ne.s32.totalorder %s9978_s25, %s8589_s26  ;;  %p8593_p11 = scmp.lt.u32.totalorder %s8589_s26, %s9978_s25 }
  0x58   :  { %p8595_p12 = pnand %p8593_p11, %p8590_p10 }
  0x5a   :  { %8598 = shalt.err (!%p8595_p12)
}
  0x5b   :  { %s8599_s9 = scalar_lea.vmem %s39_s23, 256  ;;  %p8604_p0 = scmp.lt.s32.totalorder %s39_s23, %s39_s23 }
  0x5c   :  { %p8600_p13 = scmp.ne.s32.totalorder %s39_s23, %s8599_s9  ;;  %p8605_p1 = scmp.lt.s32.totalorder %s8599_s9, %s8599_s9 }
  0x5e   :  { %p8606_p2 = por %p8605_p1, %p8604_p0 }
  0x60   :  { %p8607_p3 = pnand %p8606_p2, %p8600_p13 }
  0x62   :  { %8610 = shalt.err (!%p8607_p3)
}
  0x63   :  { %44 = dma.hbm_to_vmem [thread:$0]  %s9978_s25, 256, %s39_s23, [#allocation3], %s9948_s5, %s9948_s5, %s9959_s3  }
  0x64   :  { %s9979_s30 = sld [smem:[#allocation26_spill]] }
  0x6a   :  { %s8611_s0 = scalar_lea.hbm %s9979_s30, 32 }
  0x6b   :  { %p8612_p4 = scmp.ne.s32.totalorder %s9979_s30, %s8611_s0  ;;  %p8615_p5 = scmp.lt.u32.totalorder %s8611_s0, %s9979_s30 }
  0x6d   :  { %p8617_p6 = pnand %p8615_p5, %p8612_p4 }
  0x6f   :  { %8620 = shalt.err (!%p8617_p6)
}
  0x70   :  { %s8621_s27 = scalar_lea.vmem %s71_s21, 32  ;;  %p8626_p8 = scmp.lt.s32.totalorder %s71_s21, %s71_s21 }
  0x71   :  { %p8622_p7 = scmp.ne.s32.totalorder %s71_s21, %s8621_s27  ;;  %p8627_p9 = scmp.lt.s32.totalorder %s8621_s27, %s8621_s27 }
  0x73   :  { %p8628_p10 = por %p8627_p9, %p8626_p8 }
  0x75   :  { %p8629_p11 = pnand %p8628_p10, %p8622_p7 }
  0x77   :  { %8632 = shalt.err (!%p8629_p11)
}
  0x78   :  { %s9980_s23 = smov 16   ;;  %s8718_s9 = smov [#allocation10]  }
  0x79   :  { %76 = dma.hbm_to_vmem [thread:$0]  %s9979_s30, 32, %s71_s21, [#allocation6], %s9980_s23, %s9980_s23, %s8711_s29  }
  0x7a   :  { %s94_s1 = sshll.u32 %s8718_s9, 4  ;;  %s8719_s24 = smov [#allocation13]   ;;  %s95_s1 = int_to_ptr.vmem [resolvable:$true] %s94_s1 }
  0x7b   :  { %s120_s6 = sshll.u32 %s8719_s24, 4  ;;  %s8633_s22 = scalar_lea.hbm %s9920_s8, 32  ;;  %s121_s6 = int_to_ptr.vmem [resolvable:$true] %s120_s6 }
  0x7c   :  { %p8634_p12 = scmp.ne.s32.totalorder %s9920_s8, %s8633_s22  ;;  %p8637_p13 = scmp.lt.u32.totalorder %s8633_s22, %s9920_s8 }
  0x7e   :  { %p8639_p0 = pnand %p8637_p13, %p8634_p12 }
  0x80   :  { %8642 = shalt.err (!%p8639_p0)
}
  0x81   :  { %s8643_s21 = scalar_lea.vmem %s95_s1, 32  ;;  %p8648_p2 = scmp.lt.s32.totalorder %s95_s1, %s95_s1 }
  0x82   :  { %p8644_p1 = scmp.ne.s32.totalorder %s95_s1, %s8643_s21  ;;  %p8649_p3 = scmp.lt.s32.totalorder %s8643_s21, %s8643_s21 }
  0x84   :  { %p8650_p4 = por %p8649_p3, %p8648_p2 }
  0x86   :  { %p8651_p5 = pnand %p8650_p4, %p8644_p1 }
  0x88   :  { %8654 = shalt.err (!%p8651_p5)
}
  0x89   :  { %100 = dma.hbm_to_vmem [thread:$0]  %s9920_s8, 32, %s95_s1, [#allocation9], %s9980_s23, %s9980_s23, %s8711_s29  }
  0x8a   :  { %s8655_s24 = scalar_lea.hbm %s9923_s11, 1024 }
  0x8b   :  { %p8656_p6 = scmp.ne.s32.totalorder %s9923_s11, %s8655_s24  ;;  %p8659_p7 = scmp.lt.u32.totalorder %s8655_s24, %s9923_s11 }
  0x8d   :  { %p8661_p8 = pnand %p8659_p7, %p8656_p6 }
  0x8f   :  { %8664 = shalt.err (!%p8661_p8)
}
  0x90   :  { %s8665_s26 = scalar_lea.vmem %s121_s6, 1024  ;;  %p8670_p10 = scmp.lt.s32.totalorder %s121_s6, %s121_s6 }
  0x91   :  { %p8666_p9 = scmp.ne.s32.totalorder %s121_s6, %s8665_s26  ;;  %p8671_p11 = scmp.lt.s32.totalorder %s8665_s26, %s8665_s26 }
  0x93   :  { %p8672_p12 = por %p8671_p11, %p8670_p10 }
  0x95   :  { %p8673_p13 = pnand %p8672_p12, %p8666_p9 }
  0x97   :  { %8676 = shalt.err (!%p8673_p13)
}
  0x98   :  { %126 = dma.hbm_to_vmem [thread:$0]  %s9923_s11, 1024, %s121_s6, [#allocation12], %s9948_s5, %s9948_s5, %s9959_s3  }
  0x99   :  { %8699 = dma.done.wait [#allocation3], 256  }
  0x9a   :  { %8700 = vsyncadd [#allocation3], 4294967040 }
  0x9b   :  { %8701 = dma.done.wait [#allocation6], 64  }
  0x9c   :  { %8702 = vsyncadd [#allocation6], 4294967232 }
  0x9d   :  { %8703 = dma.done.wait [#allocation9], 1056  }
  0x9e   :  { %8704 = vsyncadd [#allocation9], 4294966240 }
  0x9f   :  { %8705 = dma.done.wait [#allocation12], 2048  }
  0xa0   :  { %8706 = vsyncadd [#allocation12], 4294965248  ;;  %v8720_v0 = vmov 0.0   ;;  %s9981_s27 = sld [smem:[#allocation21_spill]]  ;;  %vm8721_vm0 = vmmov 0   ;;  %s9982_s28 = sld [smem:[#allocation22_spill]] }
  0xa1   :  { %7714 = vmatprep.mubr.f32.mxu0 %v8720_v0  ;;  %7717 = vmatprep.subr.mxu1 %v8720_v0  ;;  %s9955_s0 = smov 64   ;;  %s8723_s22 = smov 96   ;;  %vm265_vm1 = vcmask 64512   ;;  %vm939_vm2 = vcmask 130048   ;;  %vm941_vm3 = vcmask 195584   ;;  %vm183_vm4 = vcmask 261120  }
  0xa2   :  { %7719 = vmatprep.mubr.msk.f32.mxu1 %vm8721_vm0, %v8720_v0  ;;  %s8724_s4 = smov 88   ;;  %s8725_s26 = smov 120   ;;  %vm3545_vm5 = vcmask 523264  }
  0xa3   :  { %s9963_s8 = smov 80   ;;  %s8727_s29 = smov 112  }
  0xa4   :  { %s8728_s1 = smov 104   ;;  %s9961_s2 = smov 72  }
  0xa5   :  { %s9949_s21 = smov 48   ;;  %s9953_s30 = smov 56  }
  0xa6   :  { %v172_v1 = vld [vmem:[%s9981_s27] sm:$0xff]  ;;  %v173_v2 = vld [vmem:[%s9981_s27 + $0x8] sm:$0xff]  ;;  %v174_v3 = vld [vmem:[%s9981_s27 + $0x10] sm:$0xff]  ;;  %s9951_s11 = smov 40   ;;  %s9983_s7 = sld [smem:[#allocation23_spill]] }
  0xa7   :  { %v8207_v4 = vpack.c.bf16 %v173_v2, %v172_v1  ;;  %v175_v5 = vld [vmem:[%s9981_s27 + $0x18] sm:$0xff]  ;;  %v7299_v7 = vld [vmem:[%s9982_s28] ss:$0 sm:$0xff]  ;;  %s9957_s6 = smov 24   ;;  %s9988_s25 = smov 64  }
  0xa8   :  { %v8211_v6 = vpack.c.bf16 %v175_v5, %v174_v3  ;;  %s9989_s9 = smov 56   ;;  %s9990_s24 = smov 40  }
  0xa9   :  { %8208 = vmatprep.subr.bf16.mxu0 %v8207_v4 }
  0xaa   :  { %8210 = vmatpush3.bf16.msra.mxu0 %v8207_v4 }
  0xab   :  { %8212 = vmatprep.subr.bf16.mxu0 %v8211_v6 }
  0xae   :  { %8214 = vmatpush3.bf16.msra.mxu0 %v8211_v6 }
  0xaf   :  { %7737 = vmatprep.subr.mxu0 %v8720_v0 }
  0xb1   :  { %7715 = vmatmul.mubr.f32.vlgmr.msra.gmra.mrb[0].mxu0 %v8720_v0 }
  0xb2   :  { %7739 = vmatprep.mubr.msk.f32.mxu0 %vm8721_vm0, %v8720_v0 }
 0x184   :  { %v7716_v8 = vpop.f32.mrb[0].mxu0 }
 0x185   :  { %v8983_v9 = vadd.f32 %v7716_v8, %v7299_v7  ;;  %v253_v10 = vpop.f32.mrb[1].mxu0 }
 0x186   :  { %v8985_v11 = vadd.f32 %v7299_v7, %v253_v10 }
 0x188   :  { %352 = vrot.lane.b32.xlu1 %v8985_v11, %s9955_s0  ;;  %263 = vrot.lane.b32.xlu0 %v8985_v11, %s8723_s22 }
 0x18c   :  { %430 = vrot.lane.b32.xlu1 %v8985_v11, %s8724_s4 }
 0x190   :  { %428 = vrot.lane.b32.xlu1 %v8985_v11, %s8725_s26 }
 0x194   :  { %596 = vrot.lane.b32.xlu1 %v8985_v11, %s9963_s8 }
 0x198   :  { %594 = vrot.lane.b32.xlu1 %v8985_v11, %s8727_s29 }
 0x19c   :  { %760 = vrot.lane.b32.xlu1 %v8985_v11, %s8728_s1 }
 0x1fa   :  { %v353_v12 = vpop.permute.xlu1 %352  ;;  %v264_v13 = vpop.permute.xlu0 %263 }
 0x1fb   :  { %7718 = vmatpush3.xpose.msk.msra.mxu1 %vm265_vm1, %v264_v13 }
 0x1fc   :  { %7722 = vmatprep.subr.mxu1 %v8720_v0 }
 0x1fe   :  { %v431_v14 = vpop.permute.xlu1 %430  ;;  %7720 = vmatmul.mubr.msk.f32.vlgmr.msra.gmra.mrb[0].mxu1 %vm265_vm1, %v8985_v11 }
 0x1ff   :  { %7723 = vmatpush3.msra.mxu1 %v353_v12  ;;  %7724 = vmatprep.mubr.msk.f32.mxu1 %vm8721_vm0, %v8720_v0 }
 0x200   :  { %7727 = vmatprep.subr.mxu1 %v8720_v0 }
 0x202   :  { %v429_v15 = vpop.permute.xlu1 %428 }
 0x206   :  { %v597_v16 = vpop.permute.xlu1 %596 }
 0x207   :  { %7738 = vmatpush3.xpose.msk.msra.mxu0 %vm265_vm1, %v597_v16 }
 0x208   :  { %7747 = vmatprep.subr.mxu0 %v8720_v0 }
 0x20a   :  { %v595_v17 = vpop.permute.xlu1 %594 }
 0x20b   :  { %7740 = vmatmul.mubr.msk.f32.vlgmr.msra.gmra.mrb[2].mxu0 %vm265_vm1, %v595_v17 }
 0x20c   :  { %7749 = vmatprep.mubr.msk.f32.mxu0 %vm8721_vm0, %v8720_v0 }
 0x20e   :  { %v761_v30 = vpop.permute.xlu1 %760 }
 0x2d1   :  { %v336_v18 = vpop.f32.mrb[0].mxu1 }
 0x2d2   :  { %v340_v19 = vmul.f32 0.35355338, %v336_v18  ;;  %v7721_v20 = vpop.f32.mrb[1].mxu1 }
 0x2d4   :  { %v341_v21 = vsel %vm265_vm1, %v340_v19, -inf }
 0x2d5   :  { %342 = vmax.xlane.f32.xlu0 %v341_v21 }
 0x2de   :  { %v668_v22 = vpop.f32.mrb[2].mxu0 }
 0x2df   :  { %v7741_v23 = vpop.f32.mrb[3].mxu0  ;;  %v9020_v24 = vmul.f32 0.35355338, %v668_v22 }
 0x2e1   :  { %v673_v25 = vsel %vm265_vm1, %v9020_v24, -inf }
 0x2eb   :  { %762 = vrot.lane.b32.xlu0 %v8985_v11, %s9961_s2 }
 0x2ef   :  { %1274 = vrot.lane.b32.xlu0 %v8983_v9, %s8727_s29 }
 0x2f3   :  { %1440 = vrot.lane.b32.xlu0 %v8983_v9, %s8728_s1 }
 0x312   :  { %674 = vmax.xlane.f32.xlu0 %v673_v25 }
 0x362   :  { %v343_v26 = vpop.xlane.xlu0 %342 }
 0x363   :  { %v344_v27 = vsub.f32 %v340_v19, %v343_v26 }
 0x365   :  { %v345_v28 = vmul.f32 1.442695, %v344_v27 }
 0x366   :  { %v763_v29 = vpop.permute.xlu0 %762 }
 0x367   :  { %8369 = vpow2.f32 %v345_v28  ;;  %7748 = vmatpush3.xpose.msk.msra.mxu0 %vm265_vm1, %v763_v29 }
 0x368   :  { %7757 = vmatprep.subr.mxu0 %v8720_v0 }
 0x36a   :  { %7750 = vmatmul.mubr.msk.f32.vlgmr.msra.gmra.mrb[4].mxu0 %vm265_vm1, %v761_v30  ;;  %v1275_v40 = vpop.permute.xlu0 %1274 }
 0x36b   :  { %7759 = vmatprep.mubr.msk.f32.mxu0 %vm8721_vm0, %v8720_v0 }
 0x36e   :  { %v1441_v42 = vpop.permute.xlu0 %1440 }
 0x371   :  { %v8370_v31 = vpop.eup %8369 }
 0x372   :  { %v347_v32 = vsel %vm265_vm1, %v8370_v31, 0.0 }
 0x373   :  { %348 = vadd.xlane.f32.xlu1 %v347_v32 }
 0x384   :  { %944 = vrot.lane.b32.xlu1 %v8983_v9, %s8723_s22 }
 0x388   :  { %1110 = vrot.lane.b32.xlu1 %v8983_v9, %s8724_s4 }
 0x38c   :  { %1108 = vrot.lane.b32.xlu1 %v8983_v9, %s8725_s26 }
 0x390   :  { %1276 = vrot.lane.b32.xlu1 %v8983_v9, %s9963_s8 }
 0x394   :  { %1442 = vrot.lane.b32.xlu1 %v8983_v9, %s9961_s2 }
 0x39f   :  { %v675_v47 = vpop.xlane.xlu0 %674 }
 0x3a0   :  { %v676_v51 = vsub.f32 %v9020_v24, %v675_v47 }
 0x3a2   :  { %v677_v54 = vmul.f32 1.442695, %v676_v51 }
 0x400   :  { %v349_v33 = vpop.xlane.xlu1 %348 }
 0x401   :  { %8371 = vrcp.f32 %v349_v33 }
 0x402   :  { %8373 = vpow2.f32 %v677_v54 }
 0x404   :  { %v945_v34 = vpop.permute.xlu1 %944 }
 0x405   :  { %7758 = vmatpush3.xpose.msk.msra.mxu0 %vm265_vm1, %v945_v34 }
 0x406   :  { %7767 = vmatprep.subr.mxu0 %v8720_v0 }
 0x408   :  { %v1111_v35 = vpop.permute.xlu1 %1110  ;;  %7760 = vmatmul.mubr.msk.f32.vlgmr.msra.gmra.mrb[6].mxu0 %vm265_vm1, %v8983_v9 }
 0x409   :  { %7768 = vmatpush3.xpose.msk.msra.mxu0 %vm265_vm1, %v1111_v35  ;;  %7769 = vmatprep.mubr.msk.f32.mxu0 %vm8721_vm0, %v8720_v0 }
 0x40a   :  { %7777 = vmatprep.subr.mxu0 %v8720_v0 }
 0x40b   :  { %v8372_v36 = vpop.eup %8371 }
 0x40c   :  { %v1109_v37 = vpop.permute.xlu1 %1108  ;;  %v351_v38 = vmul.f32 %v8372_v36, %v8370_v31  ;;  %v9074_v13 = vpop.eup %8373 }
 0x40d   :  { %7770 = vmatmul.mubr.msk.f32.vlgmr.msra.gmra.mrb[8].mxu0 %vm265_vm1, %v1109_v37  ;;  %v679_v16 = vsel %vm265_vm1, %v9074_v13, 0.0 }
 0x40e   :  { %7725 = vmatmul.mubr.msk.f32.vlgmr.msra.gmra.mrb[2].mxu1 %vm265_vm1, %v351_v38  ;;  %7779 = vmatprep.mubr.msk.f32.mxu0 %vm8721_vm0, %v8720_v0 }
 0x40f   :  { %7728 = vmatpush3.xpose.msk.msra.mxu1 %vm265_vm1, %v431_v14  ;;  %7729 = vmatprep.mubr.msk.f32.mxu1 %vm8721_vm0, %v8720_v0 }
 0x410   :  { %v1277_v39 = vpop.permute.xlu1 %1276  ;;  %7732 = vmatprep.subr.mxu1 %v8720_v0 }
 0x411   :  { %7778 = vmatpush3.xpose.msk.msra.mxu0 %vm265_vm1, %v1277_v39 }
 0x412   :  { %7730 = vmatmul.mubr.msk.f32.vlgmr.msra.gmra.mrb[4].mxu1 %vm265_vm1, %v429_v15  ;;  %7787 = vmatprep.subr.mxu0 %v8720_v0 }
 0x413   :  { %7734 = vmatprep.mubr.msk.f32.mxu1 %vm8721_vm0, %v8720_v0 }
 0x414   :  { %v1443_v41 = vpop.permute.xlu1 %1442  ;;  %7780 = vmatmul.mubr.msk.f32.vlgmr.msra.gmra.mrb[10].mxu0 %vm265_vm1, %v1275_v40 }
 0x415   :  { %7788 = vmatpush3.xpose.msk.msra.mxu0 %vm265_vm1, %v1443_v41  ;;  %7789 = vmatprep.mubr.msk.f32.mxu0 %vm8721_vm0, %v8720_v0 }
 0x418   :  { %7790 = vmatmul.mubr.msk.f32.vlgmr.msra.gmra.mrb[12].mxu0 %vm265_vm1, %v1441_v42 }
 0x43d   :  { %v834_v43 = vpop.f32.mrb[4].mxu0 }
 0x43e   :  { %v838_v44 = vmul.f32 0.35355338, %v834_v43  ;;  %v7751_v45 = vpop.f32.mrb[5].mxu0 }
 0x440   :  { %v839_v46 = vsel %vm265_vm1, %v838_v44, -inf }
 0x441   :  { %840 = vmax.xlane.f32.xlu0 %v839_v46 }
 0x4ce   :  { %v841_v49 = vpop.xlane.xlu0 %840 }
 0x4cf   :  { %v842_v52 = vsub.f32 %v838_v44, %v841_v49 }
 0x4d1   :  { %v843_v59 = vmul.f32 1.442695, %v842_v52 }
 0x4d3   :  { %8375 = vpow2.f32 %v843_v59 }
 0x4db   :  { %v1016_v48 = vpop.f32.mrb[6].mxu0 }
 0x4dc   :  { %v7761_v50 = vpop.f32.mrb[7].mxu0  ;;  %v1020_v2 = vmul.f32 0.35355338, %v1016_v48 }
 0x4dd   :  { %v9077_v15 = vpop.eup %8375 }
 0x4de   :  { %v1021_v10 = vsel %vm265_vm1, %v1020_v2, -inf  ;;  %v845_v17 = vsel %vm265_vm1, %v9077_v15, 0.0 }
 0x4e0   :  { %v1182_v53 = vpop.f32.mrb[8].mxu0 }
 0x4e1   :  { %v1186_v55 = vmul.f32 0.35355338, %v1182_v53  ;;  %v9068_v56 = vpop.f32.mrb[2].mxu1  ;;  %v7771_v57 = vpop.f32.mrb[9].mxu0 }
 0x4e2   :  { %v7726_v58 = vpop.f32.mrb[3].mxu1 }
 0x4e3   :  { %v1187_v60 = vsel %vm265_vm1, %v1186_v55, -inf }
 0x4e4   :  { %1188 = vmax.xlane.f32.xlu0 %v1187_v60 }
 0x4e5   :  { %v502_v61 = vpop.f32.mrb[4].mxu1 }
 0x4e6   :  { %v506_v62 = vmul.f32 0.35355338, %v502_v61  ;;  %v7731_v63 = vpop.f32.mrb[5].mxu1 }
 0x4e7   :  { %v1348_v1 = vpop.f32.mrb[10].mxu0 }
 0x4e8   :  { %v7781_v3 = vpop.f32.mrb[11].mxu0  ;;  %v507_v4 = vsel %vm265_vm1, %v506_v62, -inf  ;;  %v1352_v6 = vmul.f32 0.35355338, %v1348_v1 }
 0x4e9   :  { %508 = vmax.xlane.f32.xlu1 %v507_v4 }
 0x4ea   :  { %v1353_v14 = vsel %vm265_vm1, %v1352_v6, -inf }
 0x4eb   :  { %v1514_v5 = vpop.f32.mrb[12].mxu0 }
 0x4ec   :  { %v1518_v7 = vmul.f32 0.35355338, %v1514_v5  ;;  %v7791_v8 = vpop.f32.mrb[13].mxu0 }
 0x4ed   :  { %1022 = vmax.xlane.f32.xlu1 %v1021_v10  ;;  %v1621_v10 = vld [vmem:[%s9983_s7] sm:$0xff] }
 0x4ee   :  { %v1519_v12 = vsel %vm265_vm1, %v1518_v7, -inf }
 0x4ef   :  { %1520 = vmax.xlane.f32.xlu0 %v1519_v12  ;;  %v1622_v12 = vld [vmem:[%s9983_s7 + $0x8] sm:$0xff] }
 0x4f1   :  { %1354 = vmax.xlane.f32.xlu1 %v1353_v14  ;;  %v8215_v14 = vpack.c.bf16 %v1622_v12, %v1621_v10 }
 0x4f3   :  { %680 = vadd.xlane.f32.xlu0 %v679_v16  ;;  %8216 = vmatprep.subr.bf16.mxu0 %v8215_v14  ;;  %v1623_v16 = vld [vmem:[%s9983_s7 + $0x10] sm:$0xff] }
 0x4f4   :  { %8218 = vmatpush3.bf16.msra.mxu0 %v8215_v14 }
 0x4f5   :  { %846 = vadd.xlane.f32.xlu1 %v845_v17  ;;  %v1624_v17 = vld [vmem:[%s9983_s7 + $0x18] sm:$0xff] }
 0x571   :  { %v1189_v18 = vpop.xlane.xlu0 %1188 }
 0x572   :  { %v1190_v19 = vsub.f32 %v1186_v55, %v1189_v18 }
 0x574   :  { %v1191_v20 = vmul.f32 1.442695, %v1190_v19  ;;  %v8219_v19 = vpack.c.bf16 %v1624_v17, %v1623_v16  ;;  %v7327_v16 = vld [vmem:[%s9927_s15] ss:$0 sm:$0xff] }
 0x576   :  { %8377 = vpow2.f32 %v1191_v20  ;;  %v509_v21 = vpop.xlane.xlu1 %508  ;;  %8220 = vmatprep.subr.bf16.mxu0 %v8219_v19 }
 0x577   :  { %v510_v39 = vsub.f32 %v506_v62, %v509_v21  ;;  %8222 = vmatpush3.bf16.msra.mxu0 %v8219_v19 }
 0x579   :  { %v511_v40 = vmul.f32 1.442695, %v510_v39 }
 0x57a   :  { %v1023_v22 = vpop.xlane.xlu1 %1022 }
 0x57b   :  { %v1024_v23 = vsub.f32 %v1020_v2, %v1023_v22 }
 0x57c   :  { %v1521_v24 = vpop.xlane.xlu0 %1520 }
 0x57d   :  { %v1025_v25 = vmul.f32 1.442695, %v1024_v23  ;;  %v1522_v26 = vsub.f32 %v1518_v7, %v1521_v24 }
 0x57e   :  { %v1355_v27 = vpop.xlane.xlu1 %1354 }
 0x57f   :  { %8379 = vpow2.f32 %v1025_v25  ;;  %v1523_v28 = vmul.f32 1.442695, %v1522_v26  ;;  %v1356_v29 = vsub.f32 %v1352_v6, %v1355_v27 }
 0x580   :  { %v9083_v30 = vpop.eup %8377  ;;  %v681_v43 = vpop.xlane.xlu0 %680 }
 0x581   :  { %8381 = vpow2.f32 %v1523_v28  ;;  %v1357_v31 = vmul.f32 1.442695, %v1356_v29  ;;  %v1193_v32 = vsel %vm265_vm1, %v9083_v30, 0.0 }
 0x582   :  { %1194 = vadd.xlane.f32.xlu1 %v1193_v32  ;;  %v847_v47 = vpop.xlane.xlu1 %846 }
 0x583   :  { %8383 = vpow2.f32 %v1357_v31 }
 0x584   :  { %8385 = vpow2.f32 %v511_v40 }
 0x589   :  { %v9087_v33 = vpop.eup %8379 }
 0x58a   :  { %v1027_v34 = vsel %vm265_vm1, %v9087_v33, 0.0 }
 0x58b   :  { %v9091_v35 = vpop.eup %8381  ;;  %1028 = vadd.xlane.f32.xlu0 %v1027_v34 }
 0x58c   :  { %v1525_v36 = vsel %vm265_vm1, %v9091_v35, 0.0 }
 0x58d   :  { %v9095_v37 = vpop.eup %8383  ;;  %1526 = vadd.xlane.f32.xlu1 %v1525_v36 }
 0x58e   :  { %v1359_v38 = vsel %vm265_vm1, %v9095_v37, 0.0  ;;  %v8386_v41 = vpop.eup %8385 }
 0x58f   :  { %1360 = vadd.xlane.f32.xlu0 %v1359_v38  ;;  %v513_v42 = vsel %vm265_vm1, %v8386_v41, 0.0 }
 0x59e   :  { %684 = vrot.lane.b32.xlu1 %v8985_v11, %s9949_s21 }
 0x5a5   :  { %518 = vrot.lane.b32.xlu0 %v8985_v11, %s9953_s30 }
 0x5a9   :  { %1032 = vrot.lane.b32.xlu0 %v8983_v9, %s9955_s0  ;;  %s9991_s0 = smov 48  }
 0x5ad   :  { %1364 = vrot.lane.b32.xlu0 %v8983_v9, %s9949_s21  ;;  %s9987_s21 = smov 72  }
 0x5c2   :  { %514 = vadd.xlane.f32.xlu1 %v513_v42 }
 0x5d3   :  { %850 = vrot.lane.b32.xlu1 %v8985_v11, %s9951_s11 }
 0x5d7   :  { %1198 = vrot.lane.b32.xlu1 %v8983_v9, %s9953_s30  ;;  %s9984_s30 = sld [smem:[#allocation25_spill]] }
 0x5db   :  { %1530 = vrot.lane.b32.xlu1 %v8983_v9, %s9951_s11  ;;  %s9985_s11 = smov 24  }
 0x60f   :  { %v1195_v48 = vpop.xlane.xlu1 %1194 }
 0x618   :  { %v1029_v44 = vpop.xlane.xlu0 %1028 }
 0x61a   :  { %v1527_v49 = vpop.xlane.xlu1 %1526 }
 0x61c   :  { %v1361_v45 = vpop.xlane.xlu0 %1360 }
 0x61e   :  { %v685_v50 = vpop.permute.xlu1 %684 }
 0x620   :  { %v519_v46 = vpop.permute.xlu0 %518 }
 0x621   :  { %7733 = vmatpush3.msra.mxu1 %v519_v46 }
 0x622   :  { %7742 = vmatprep.subr.mxu1 %v8720_v0 }
 0x624   :  { %v1033_v59 = vpop.permute.xlu0 %1032 }
 0x628   :  { %v1365_v2 = vpop.permute.xlu0 %1364 }
 0x64f   :  { %v515_v51 = vpop.xlane.xlu1 %514 }
 0x650   :  { %8387 = vrcp.f32 %v515_v51 }
 0x651   :  { %8389 = vrcp.f32 %v681_v43 }
 0x652   :  { %8391 = vrcp.f32 %v847_v47 }
 0x653   :  { %8393 = vrcp.f32 %v1029_v44  ;;  %v851_v55 = vpop.permute.xlu1 %850 }
 0x654   :  { %8395 = vrcp.f32 %v1195_v48 }
 0x655   :  { %8397 = vrcp.f32 %v1361_v45 }
 0x656   :  { %8399 = vrcp.f32 %v1527_v49 }
 0x657   :  { %v1199_v62 = vpop.permute.xlu1 %1198 }
 0x65a   :  { %v8388_v11 = vpop.eup %8387 }
 0x65b   :  { %v517_v52 = vmul.f32 %v8388_v11, %v8386_v41  ;;  %v8390_v53 = vpop.eup %8389  ;;  %v1531_v5 = vpop.permute.xlu1 %1530 }
 0x65c   :  { %v683_v9 = vmul.f32 %v8390_v53, %v9074_v13  ;;  %v8392_v54 = vpop.eup %8391 }
 0x65d   :  { %7735 = vmatmul.mubr.msk.f32.vlgmr.msra.gmra.mrb[6].mxu1 %vm265_vm1, %v517_v52  ;;  %v849_v57 = vmul.f32 %v8392_v54, %v9077_v15  ;;  %v8394_v58 = vpop.eup %8393 }
 0x65e   :  { %7743 = vmatpush3.msra.mxu1 %v685_v50  ;;  %7744 = vmatprep.mubr.msk.f32.mxu1 %vm8721_vm0, %v8720_v0  ;;  %v1031_v60 = vmul.f32 %v8394_v58, %v9087_v33  ;;  %v8396_v61 = vpop.eup %8395 }
 0x65f   :  { %7752 = vmatprep.subr.mxu1 %v8720_v0  ;;  %v1197_v63 = vmul.f32 %v8396_v61, %v9083_v30  ;;  %v8398_v1 = vpop.eup %8397  ;;  %v170_v61 = vld [vmem:[#allocation2] sm:$0xff] }
 0x660   :  { %v1363_v3 = vmul.f32 %v8398_v1, %v9095_v37  ;;  %v8400_v4 = vpop.eup %8399  ;;  %v1761_v1 = vld [vmem:[%s9984_s30 + $0x8] sm:$0xff] }
 0x661   :  { %7745 = vmatmul.mubr.msk.f32.vlgmr.msra.gmra.mrb[8].mxu1 %vm265_vm1, %v683_v9  ;;  %v1529_v6 = vmul.f32 %v8400_v4, %v9091_v35  ;;  %v1763_v4 = vld [vmem:[%s9984_s30 + $0x18] sm:$0xff] }
 0x662   :  { %7753 = vmatpush3.msra.mxu1 %v851_v55  ;;  %7754 = vmatprep.mubr.msk.f32.mxu1 %vm8721_vm0, %v8720_v0  ;;  %v1852_v55 = vld [vmem:[#allocation8] sm:$0xff] }
 0x663   :  { %7762 = vmatprep.subr.mxu1 %v8720_v0 }
 0x665   :  { %7755 = vmatmul.mubr.msk.f32.vlgmr.msra.gmra.mrb[10].mxu1 %vm265_vm1, %v849_v57  ;;  %v1853_v57 = vld [vmem:[#allocation8 + $0x8] sm:$0xff] }
 0x666   :  { %7763 = vmatpush3.msra.mxu1 %v1033_v59  ;;  %7764 = vmatprep.mubr.msk.f32.mxu1 %vm8721_vm0, %v8720_v0  ;;  %v8231_v58 = vpack.c.bf16 %v1853_v57, %v1852_v55  ;;  %v1854_v59 = vld [vmem:[#allocation8 + $0x10] sm:$0xff] }
 0x667   :  { %7772 = vmatprep.subr.mxu1 %v8720_v0 }
 0x668   :  { %8232 = vmatprep.subr.bf16.mxu0 %v8231_v58 }
 0x669   :  { %7765 = vmatmul.mubr.msk.f32.vlgmr.msra.gmra.mrb[12].mxu1 %vm265_vm1, %v1031_v60  ;;  %v1855_v60 = vld [vmem:[#allocation8 + $0x18] sm:$0xff] }
 0x66a   :  { %7773 = vmatpush3.msra.mxu1 %v1199_v62  ;;  %7774 = vmatprep.mubr.msk.f32.mxu1 %vm8721_vm0, %v8720_v0  ;;  %v8235_v62 = vpack.c.bf16 %v1855_v60, %v1854_v59 }
 0x66b   :  { %7782 = vmatprep.subr.mxu1 %v8720_v0 }
 0x66d   :  { %7775 = vmatmul.mubr.msk.f32.vlgmr.msra.gmra.mrb[14].mxu1 %vm265_vm1, %v1197_v63  ;;  %v1760_v63 = vld [vmem:[%s9984_s30] sm:$0xff] }
 0x66e   :  { %7783 = vmatpush3.msra.mxu1 %v1365_v2  ;;  %7784 = vmatprep.mubr.msk.f32.mxu1 %vm8721_vm0, %v8720_v0  ;;  %v8223_v2 = vpack.c.bf16 %v1761_v1, %v1760_v63 }
 0x66f   :  { %7792 = vmatprep.subr.mxu1 %v8720_v0 }
 0x671   :  { %7785 = vmatmul.mubr.msk.f32.vlgmr.msra.gmra.mrb[16].mxu1 %vm265_vm1, %v1363_v3  ;;  %v1762_v3 = vld [vmem:[%s9984_s30 + $0x10] sm:$0xff] }
 0x672   :  { %7793 = vmatpush3.msra.mxu1 %v1531_v5  ;;  %7794 = vmatprep.mubr.msk.f32.mxu1 %vm8721_vm0, %v8720_v0  ;;  %v8227_v5 = vpack.c.bf16 %v1763_v4, %v1762_v3 }
 0x673   :  { %8224 = vmatprep.subr.bf16.mxu1 %v8223_v2 }
 0x675   :  { %7795 = vmatmul.mubr.msk.f32.vlgmr.msra.gmra.mrb[18].mxu1 %vm265_vm1, %v1529_v6  ;;  %v171_v6 = vld [vmem:[#allocation2 + $0x8] sm:$0xff] }
 0x676   :  { %8226 = vmatpush3.bf16.msra.mxu1 %v8223_v2 }
 0x677   :  { %8228 = vmatprep.subr.bf16.mxu1 %v8227_v5 }
 0x67a   :  { %8230 = vmatpush3.bf16.msra.mxu1 %v8227_v5 }
 0x67b   :  { %7830 = vmatprep.subr.mxu1 %v8720_v0 }
 0x730   :  { %v590_v7 = vpop.f32.mrb[6].mxu1 }
 0x731   :  { %927 = vrot.lane.b32.xlu0 %v590_v7, %s9959_s3  ;;  %v7736_v8 = vpop.f32.mrb[7].mxu1 }
 0x734   :  { %v756_v13 = vpop.f32.mrb[8].mxu1 }
 0x735   :  { %931 = vrot.lane.b32.xlu1 %v756_v13, %s9980_s23  ;;  %v7746_v15 = vpop.f32.mrb[9].mxu1 }
 0x738   :  { %v922_v18 = vpop.f32.mrb[10].mxu1 }
 0x739   :  { %935 = vrot.lane.b32.xlu1 %v922_v18, %s9957_s6  ;;  %v7756_v20 = vpop.f32.mrb[11].mxu1  ;;  %v7328_v18 = vld [vmem:[%s9928_s16] ss:$0 sm:$0xff] }
 0x73c   :  { %v1104_v21 = vpop.f32.mrb[12].mxu1 }
 0x73d   :  { %v7766_v22 = vpop.f32.mrb[13].mxu1 }
 0x740   :  { %v1270_v23 = vpop.f32.mrb[14].mxu1 }
 0x741   :  { %1607 = vrot.lane.b32.xlu0 %v1270_v23, %s9959_s3  ;;  %v7776_v24 = vpop.f32.mrb[15].mxu1 }
 0x744   :  { %v1436_v25 = vpop.f32.mrb[16].mxu1 }
 0x745   :  { %1611 = vrot.lane.b32.xlu0 %v1436_v25, %s9980_s23  ;;  %v7786_v26 = vpop.f32.mrb[17].mxu1  ;;  %v7332_v25 = vld [vmem:[#allocation10] ss:$0 sm:$0xff] }
 0x748   :  { %v1602_v27 = vpop.f32.mrb[18].mxu1 }
 0x749   :  { %1615 = vrot.lane.b32.xlu1 %v1602_v27, %s9957_s6  ;;  %v7796_v28 = vpop.f32.mrb[19].mxu1 }
 0x7a3   :  { %v928_v29 = vpop.permute.xlu0 %927 }
 0x7a4   :  { %v938_v31 = vsel %vm265_vm1, %v9068_v56, %v928_v29  ;;  %v7324_v56 = vld [vmem:[#allocation5] ss:$0 sm:$0xff] }
 0x7a7   :  { %v932_v30 = vpop.permute.xlu1 %931 }
 0x7a8   :  { %v940_v32 = vsel %vm939_vm2, %v938_v31, %v932_v30  ;;  %v7329_v31 = vld [vmem:[#allocation7] ss:$0 sm:$0xff] }
 0x7ab   :  { %v936_v33 = vpop.permute.xlu1 %935 }
 0x7ac   :  { %v942_v34 = vsel %vm941_vm3, %v940_v32, %v936_v33 }
 0x7ad   :  { %7805 = vmatprep.mubr.msk.f32.mxu0 %vm183_vm4, %v942_v34 }
 0x7b3   :  { %v1608_v35 = vpop.permute.xlu0 %1607 }
 0x7b4   :  { %v1618_v37 = vsel %vm265_vm1, %v1104_v21, %v1608_v35 }
 0x7b7   :  { %v1612_v36 = vpop.permute.xlu0 %1611 }
 0x7b8   :  { %v1619_v38 = vsel %vm939_vm2, %v1618_v37, %v1612_v36 }
 0x7bb   :  { %v1616_v39 = vpop.permute.xlu1 %1615 }
 0x7bc   :  { %v1620_v40 = vsel %vm941_vm3, %v1619_v38, %v1616_v39 }
 0x7bd   :  { %7806 = vmatmul.mubr.msk.f32.vlgmr.msra.gmra.mrb[14].mxu0 %vm183_vm4, %v1620_v40 }
 0x7be   :  { %7827 = vmatprep.mubr.msk.f32.mxu0 %vm183_vm4, %v170_v61  ;;  %8234 = vmatpush3.bf16.msra.mxu0 %v8231_v58 }
 0x7bf   :  { %8236 = vmatprep.subr.bf16.mxu0 %v8235_v62 }
 0x7c2   :  { %8238 = vmatpush3.bf16.msra.mxu0 %v8235_v62 }
 0x7c3   :  { %7840 = vmatprep.subr.mxu0 %v8720_v0 }
 0x7c5   :  { %7828 = vmatmul.mubr.msk.f32.vlgmr.msra.gmra.mrb[16].mxu0 %vm183_vm4, %v171_v6 }
 0x7c6   :  { %7842 = vmatprep.mubr.msk.f32.mxu0 %vm8721_vm0, %v8720_v0 }
 0x890   :  { %v7807_v41 = vpop.f32.mrb[14].mxu0 }
 0x891   :  { %v1710_v42 = vadd.f32 %v7807_v41, %v7324_v56  ;;  %v1704_v43 = vpop.f32.mrb[15].mxu0 }
 0x892   :  { %v1705_v44 = vadd.f32 %v7324_v56, %v1704_v43 }
 0x893   :  { %v1720_v45 = vsel %vm183_vm4, %v1710_v42, 0.0 }
 0x894   :  { %1721 = vadd.xlane.f32.xlu1 %v1720_v45  ;;  %v1717_v46 = vsel %vm183_vm4, %v1705_v44, 0.0 }
 0x895   :  { %1718 = vadd.xlane.f32.xlu0 %v1717_v46 }
 0x898   :  { %v7829_v26 = vpop.f32.mrb[16].mxu0 }
 0x899   :  { %v9210_v27 = vadd.f32 %v7829_v26, %v7332_v25  ;;  %v1935_v28 = vpop.f32.mrb[17].mxu0 }
 0x89a   :  { %v9212_v29 = vadd.f32 %v7332_v25, %v1935_v28 }
 0x8a5   :  { %2110 = vrot.lane.b32.xlu1 %v9212_v29, %s8725_s26 }
 0x8a9   :  { %2276 = vrot.lane.b32.xlu1 %v9212_v29, %s8727_s29 }
 0x921   :  { %v1722_v47 = vpop.xlane.xlu1 %1721 }
 0x922   :  { %v1725_v48 = vmul.f32 0.03125, %v1722_v47  ;;  %v1719_v49 = vpop.xlane.xlu0 %1718 }
 0x923   :  { %v1724_v50 = vmul.f32 0.03125, %v1719_v49 }
 0x924   :  { %v1727_v51 = vsub.f32 %v1710_v42, %v1725_v48 }
 0x925   :  { %v1726_v11 = vsub.f32 %v1705_v44, %v1724_v50  ;;  %v2111_v30 = vpop.permute.xlu1 %2110 }
 0x926   :  { %v1729_v9 = vmul.f32 %v1727_v51, %v1727_v51  ;;  %7841 = vmatpush3.xpose.msk.msra.mxu0 %vm265_vm1, %v2111_v30 }
 0x927   :  { %v1728_v52 = vmul.f32 %v1726_v11, %v1726_v11  ;;  %7850 = vmatprep.subr.mxu0 %v8720_v0 }
 0x928   :  { %v1733_v54 = vsel %vm183_vm4, %v1729_v9, 0.0 }
 0x929   :  { %v1730_v53 = vsel %vm183_vm4, %v1728_v52, 0.0  ;;  %v2277_v36 = vpop.permute.xlu1 %2276 }
 0x92a   :  { %1731 = vadd.xlane.f32.xlu0 %v1730_v53 }
 0x92e   :  { %1734 = vadd.xlane.f32.xlu0 %v1733_v54 }
 0x9b7   :  { %v1732_v7 = vpop.xlane.xlu0 %1731 }
 0x9b8   :  { %v1736_v8 = vmul.f32 0.03125, %v1732_v7 }
 0x9ba   :  { %v1738_v10 = vadd.f32 1e-05, %v1736_v8 }
 0x9bb   :  { %v1735_v12 = vpop.xlane.xlu0 %1734 }
 0x9bc   :  { %8401 = vrsqrt.f32 %v1738_v10  ;;  %v1737_v13 = vmul.f32 0.03125, %v1735_v12 }
 0x9be   :  { %v1739_v14 = vadd.f32 1e-05, %v1737_v13 }
 0x9c0   :  { %8403 = vrsqrt.f32 %v1739_v14 }
 0x9c6   :  { %v8402_v15 = vpop.eup %8401 }
 0x9c7   :  { %v1742_v17 = vmul.f32 %v8402_v15, %v1726_v11 }
 0x9c9   :  { %v1750_v19 = vmul.f32 %v7327_v16, %v1742_v17 }
 0x9ca   :  { %v8404_v20 = vpop.eup %8403 }
 0x9cb   :  { %v1743_v21 = vmul.f32 %v8404_v20, %v1727_v51  ;;  %v9200_v22 = vadd.f32 %v7328_v18, %v1750_v19 }
 0x9cd   :  { %v1751_v23 = vmul.f32 %v7327_v16, %v1743_v21  ;;  %7816 = vmatprep.mubr.msk.f32.mxu1 %vm183_vm4, %v9200_v22 }
 0x9cf   :  { %v9204_v24 = vadd.f32 %v7328_v18, %v1751_v23 }
 0x9d1   :  { %7817 = vmatmul.mubr.msk.f32.vlgmr.msra.gmra.mrb[20].mxu1 %vm183_vm4, %v9204_v24 }
 0x9d2   :  { %7832 = vmatprep.mubr.msk.f32.mxu1 %vm8721_vm0, %v8720_v0  ;;  %7831 = vmatpush3.xpose.msk.msra.mxu1 %vm265_vm1, %v9212_v29 }
 0x9d3   :  { %7835 = vmatprep.subr.mxu1 %v8720_v0 }
 0xaa4   :  { %v7818_v32 = vpop.f32.mrb[20].mxu1 }
 0xaa5   :  { %v1843_v33 = vpop.f32.mrb[21].mxu1  ;;  %v1849_v35 = vadd.f32 %v7818_v32, %v7329_v31 }
 0xaa6   :  { %v1844_v34 = vadd.f32 %v7329_v31, %v1843_v33 }
 0xaa8   :  { %2108 = vrot.lane.b32.xlu0 %v1844_v34, %s8725_s26  ;;  %2274 = vrot.lane.b32.xlu1 %v1844_v34, %s8727_s29 }
 0xaa9   :  { %7833 = vmatmul.mubr.msk.f32.vlgmr.msra.gmra.mrb[22].mxu1 %vm265_vm1, %v1844_v34 }
 0xaaa   :  { %7837 = vmatprep.mubr.msk.f32.mxu1 %vm8721_vm0, %v8720_v0 }
 0xaac   :  { %2442 = vrot.lane.b32.xlu0 %v9212_v29, %s8728_s1  ;;  %2440 = vrot.lane.b32.xlu1 %v1844_v34, %s8728_s1 }
 0xab0   :  { %2787 = vrot.lane.b32.xlu0 %v9210_v27, %s8725_s26  ;;  %2785 = vrot.lane.b32.xlu1 %v1849_v35, %s8725_s26 }
 0xab4   :  { %2953 = vrot.lane.b32.xlu0 %v9210_v27, %s8727_s29  ;;  %2951 = vrot.lane.b32.xlu1 %v1849_v35, %s8727_s29 }
 0xab8   :  { %3119 = vrot.lane.b32.xlu0 %v9210_v27, %s8728_s1  ;;  %3117 = vrot.lane.b32.xlu1 %v1849_v35, %s8728_s1 }
 0xabc   :  { %2032 = vrot.lane.b32.xlu0 %v9212_v29, %s8723_s22  ;;  %2198 = vrot.lane.b32.xlu1 %v9212_v29, %s8724_s4 }
 0xb1a   :  { %v2109_v37 = vpop.permute.xlu0 %2108  ;;  %v2275_v38 = vpop.permute.xlu1 %2274 }
 0xb1b   :  { %7843 = vmatmul.mubr.msk.f32.vlgmr.msra.gmra.mrb[18].mxu0 %vm265_vm1, %v2109_v37 }
 0xb1c   :  { %7851 = vmatpush3.xpose.msk.msra.mxu0 %vm265_vm1, %v2277_v36  ;;  %7852 = vmatprep.mubr.msk.f32.mxu0 %vm8721_vm0, %v8720_v0 }
 0xb1d   :  { %7860 = vmatprep.subr.mxu0 %v8720_v0 }
 0xb1e   :  { %v2443_v39 = vpop.permute.xlu0 %2442  ;;  %v2441_v40 = vpop.permute.xlu1 %2440 }
 0xb1f   :  { %7853 = vmatmul.mubr.msk.f32.vlgmr.msra.gmra.mrb[20].mxu0 %vm265_vm1, %v2275_v38 }
 0xb20   :  { %7861 = vmatpush3.xpose.msk.msra.mxu0 %vm265_vm1, %v2443_v39  ;;  %7862 = vmatprep.mubr.msk.f32.mxu0 %vm8721_vm0, %v8720_v0 }
 0xb21   :  { %7870 = vmatprep.subr.mxu0 %v8720_v0 }
 0xb22   :  { %v2788_v56 = vpop.permute.xlu0 %2787  ;;  %v2786_v41 = vpop.permute.xlu1 %2785 }
 0xb23   :  { %7863 = vmatmul.mubr.msk.f32.vlgmr.msra.gmra.mrb[22].mxu0 %vm265_vm1, %v2441_v40 }
 0xb24   :  { %7871 = vmatpush3.xpose.msk.msra.mxu0 %vm265_vm1, %v9210_v27  ;;  %7872 = vmatprep.mubr.msk.f32.mxu0 %vm8721_vm0, %v8720_v0 }
 0xb25   :  { %7880 = vmatprep.subr.mxu0 %v8720_v0 }
 0xb26   :  { %v2954_v42 = vpop.permute.xlu0 %2953  ;;  %v2952_v44 = vpop.permute.xlu1 %2951 }
 0xb27   :  { %7873 = vmatmul.mubr.msk.f32.vlgmr.msra.gmra.mrb[24].mxu0 %vm265_vm1, %v1849_v35 }
 0xb28   :  { %7881 = vmatpush3.xpose.msk.msra.mxu0 %vm265_vm1, %v2788_v56  ;;  %7882 = vmatprep.mubr.msk.f32.mxu0 %vm8721_vm0, %v8720_v0 }
 0xb29   :  { %7890 = vmatprep.subr.mxu0 %v8720_v0 }
 0xb2a   :  { %v3120_v43 = vpop.permute.xlu0 %3119  ;;  %v3118_v46 = vpop.permute.xlu1 %3117 }
 0xb2b   :  { %7883 = vmatmul.mubr.msk.f32.vlgmr.msra.gmra.mrb[26].mxu0 %vm265_vm1, %v2786_v41 }
 0xb2c   :  { %7891 = vmatpush3.xpose.msk.msra.mxu0 %vm265_vm1, %v2954_v42  ;;  %7892 = vmatprep.mubr.msk.f32.mxu0 %vm8721_vm0, %v8720_v0 }
 0xb2d   :  { %7900 = vmatprep.subr.mxu0 %v8720_v0 }
 0xb2e   :  { %v2033_v45 = vpop.permute.xlu0 %2032  ;;  %v2199_v23 = vpop.permute.xlu1 %2198 }
 0xb2f   :  { %7836 = vmatpush3.msra.mxu1 %v2033_v45  ;;  %7893 = vmatmul.mubr.msk.f32.vlgmr.msra.gmra.mrb[28].mxu0 %vm265_vm1, %v2952_v44 }
 0xb30   :  { %7901 = vmatpush3.xpose.msk.msra.mxu0 %vm265_vm1, %v3120_v43  ;;  %7902 = vmatprep.mubr.msk.f32.mxu0 %vm8721_vm0, %v8720_v0 }
 0xb31   :  { %7845 = vmatprep.subr.mxu1 %v8720_v0 }
 0xb33   :  { %7903 = vmatmul.mubr.msk.f32.vlgmr.msra.gmra.mrb[30].mxu0 %vm265_vm1, %v3118_v46 }
 0xb7c   :  { %v2016_v47 = vpop.f32.mrb[22].mxu1 }
 0xb7d   :  { %v2020_v48 = vmul.f32 0.35355338, %v2016_v47  ;;  %v7834_v49 = vpop.f32.mrb[23].mxu1 }
 0xb7f   :  { %v2021_v50 = vsel %vm265_vm1, %v2020_v48, -inf }
 0xb80   :  { %2022 = vmax.xlane.f32.xlu0 %v2021_v50 }
 0xbee   :  { %v2182_v51 = vpop.f32.mrb[18].mxu0 }
 0xbef   :  { %v2186_v11 = vmul.f32 0.35355338, %v2182_v51  ;;  %v7844_v52 = vpop.f32.mrb[19].mxu0 }
 0xbf1   :  { %v2187_v53 = vsel %vm265_vm1, %v2186_v11, -inf }
 0xbf2   :  { %2188 = vmax.xlane.f32.xlu1 %v2187_v53  ;;  %v2348_v9 = vpop.f32.mrb[20].mxu0 }
 0xbf3   :  { %v2352_v54 = vmul.f32 0.35355338, %v2348_v9  ;;  %v7854_v55 = vpop.f32.mrb[21].mxu0 }
 0xbf5   :  { %v2353_v57 = vsel %vm265_vm1, %v2352_v54, -inf }
 0xbf6   :  { %v2514_v58 = vpop.f32.mrb[22].mxu0  ;;  %2354 = vmax.xlane.f32.xlu0 %v2353_v57 }
 0xbf7   :  { %v2518_v59 = vmul.f32 0.35355338, %v2514_v58  ;;  %v7864_v60 = vpop.f32.mrb[23].mxu0 }
 0xbf9   :  { %v2519_v61 = vsel %vm265_vm1, %v2518_v59, -inf }
 0xbfa   :  { %v2693_v62 = vpop.f32.mrb[24].mxu0  ;;  %2520 = vmax.xlane.f32.xlu0 %v2519_v61 }
 0xbfb   :  { %v2697_v63 = vmul.f32 0.35355338, %v2693_v62  ;;  %v7874_v1 = vpop.f32.mrb[25].mxu0 }
 0xbfd   :  { %v2698_v2 = vsel %vm265_vm1, %v2697_v63, -inf }
 0xbfe   :  { %2699 = vmax.xlane.f32.xlu1 %v2698_v2  ;;  %v2859_v3 = vpop.f32.mrb[26].mxu0 }
 0xbff   :  { %v2863_v4 = vmul.f32 0.35355338, %v2859_v3  ;;  %v7884_v5 = vpop.f32.mrb[27].mxu0 }
 0xc01   :  { %v2864_v6 = vsel %vm265_vm1, %v2863_v4, -inf }
 0xc02   :  { %v3025_v7 = vpop.f32.mrb[28].mxu0  ;;  %2865 = vmax.xlane.f32.xlu0 %v2864_v6 }
 0xc03   :  { %v3029_v8 = vmul.f32 0.35355338, %v3025_v7  ;;  %v7894_v10 = vpop.f32.mrb[29].mxu0 }
 0xc05   :  { %v3030_v12 = vsel %vm265_vm1, %v3029_v8, -inf }
 0xc06   :  { %3031 = vmax.xlane.f32.xlu1 %v3030_v12  ;;  %v3191_v13 = vpop.f32.mrb[30].mxu0 }
 0xc07   :  { %v3195_v14 = vmul.f32 0.35355338, %v3191_v13  ;;  %v7904_v15 = vpop.f32.mrb[31].mxu0 }
 0xc09   :  { %v3196_v16 = vsel %vm265_vm1, %v3195_v14, -inf }
 0xc0a   :  { %3197 = vmax.xlane.f32.xlu0 %v3196_v16 }
 0xc0d   :  { %v2023_v17 = vpop.xlane.xlu0 %2022 }
 0xc0e   :  { %v2024_v18 = vsub.f32 %v2020_v48, %v2023_v17 }
 0xc10   :  { %v2025_v19 = vmul.f32 1.442695, %v2024_v18 }
 0xc12   :  { %8405 = vpow2.f32 %v2025_v19 }
 0xc17   :  { %2530 = vrot.lane.b32.xlu1 %v9212_v29, %s9961_s2 }
 0xc1c   :  { %v8406_v20 = vpop.eup %8405 }
 0xc1d   :  { %v2027_v21 = vsel %vm265_vm1, %v8406_v20, 0.0 }
 0xc20   :  { %2364 = vrot.lane.b32.xlu0 %v9212_v29, %s9963_s8 }
 0xc3b   :  { %2028 = vadd.xlane.f32.xlu1 %v2027_v21 }
 0xc7f   :  { %v2189_v25 = vpop.xlane.xlu1 %2188 }
 0xc80   :  { %v2190_v26 = vsub.f32 %v2186_v11, %v2189_v25 }
 0xc82   :  { %v2191_v28 = vmul.f32 1.442695, %v2190_v26 }
 0xc83   :  { %v2355_v30 = vpop.xlane.xlu0 %2354 }
 0xc84   :  { %8407 = vpow2.f32 %v2191_v28  ;;  %v2356_v31 = vsub.f32 %v2352_v54, %v2355_v30 }
 0xc86   :  { %v2357_v32 = vmul.f32 1.442695, %v2356_v31 }
 0xc87   :  { %v2521_v33 = vpop.xlane.xlu0 %2520 }
 0xc88   :  { %8409 = vpow2.f32 %v2357_v32  ;;  %v2522_v34 = vsub.f32 %v2518_v59, %v2521_v33 }
 0xc8a   :  { %v2523_v29 = vmul.f32 1.442695, %v2522_v34 }
 0xc8b   :  { %v2700_v56 = vpop.xlane.xlu1 %2699 }
 0xc8c   :  { %8411 = vpow2.f32 %v2523_v29  ;;  %v2701_v41 = vsub.f32 %v2697_v63, %v2700_v56  ;;  %v3300_v56 = vld [vmem:[#allocation11 + $0x10] sm:$0xff] }
 0xc8e   :  { %v8408_v35 = vpop.eup %8407  ;;  %v2702_v45 = vmul.f32 1.442695, %v2701_v41  ;;  %v3301_v41 = vld [vmem:[#allocation11 + $0x18] sm:$0xff] }
 0xc8f   :  { %v2193_v36 = vsel %vm265_vm1, %v8408_v35, 0.0  ;;  %v2866_v42 = vpop.xlane.xlu0 %2865 }
 0xc90   :  { %2194 = vadd.xlane.f32.xlu0 %v2193_v36  ;;  %v2867_v44 = vsub.f32 %v2863_v4, %v2866_v42  ;;  %8413 = vpow2.f32 %v2702_v45  ;;  %v8243_v42 = vpack.c.bf16 %v3301_v41, %v3300_v56  ;;  %v7362_v41 = vld [vmem:[%s9929_s17] ss:$0 sm:$0xff] }
 0xc92   :  { %v8410_v37 = vpop.eup %8409  ;;  %v2868_v48 = vmul.f32 1.442695, %v2867_v44 }
 0xc93   :  { %v2359_v38 = vsel %vm265_vm1, %v8410_v37, 0.0  ;;  %v3032_v43 = vpop.xlane.xlu1 %3031 }
 0xc94   :  { %2360 = vadd.xlane.f32.xlu1 %v2359_v38  ;;  %v3033_v46 = vsub.f32 %v3029_v8, %v3032_v43  ;;  %8415 = vpow2.f32 %v2868_v48  ;;  %v3298_v38 = vld [vmem:[#allocation11] sm:$0xff] }
 0xc96   :  { %v9291_v39 = vpop.eup %8411  ;;  %v3034_v49 = vmul.f32 1.442695, %v3033_v46 }
 0xc97   :  { %v2525_v40 = vsel %vm265_vm1, %v9291_v39, 0.0  ;;  %v3198_v47 = vpop.xlane.xlu0 %3197  ;;  %v2531_v11 = vpop.permute.xlu1 %2530 }
 0xc98   :  { %2526 = vadd.xlane.f32.xlu0 %v2525_v40  ;;  %v3199_v50 = vsub.f32 %v3195_v14, %v3198_v47  ;;  %8417 = vpow2.f32 %v3034_v49 }
 0xc9a   :  { %v3200_v51 = vmul.f32 1.442695, %v3199_v50  ;;  %v8414_v52 = vpop.eup %8413 }
 0xc9b   :  { %v2704_v54 = vsel %vm265_vm1, %v8414_v52, 0.0  ;;  %v2365_v63 = vpop.permute.xlu0 %2364 }
 0xc9c   :  { %8419 = vpow2.f32 %v3200_v51 }
 0xc9e   :  { %v9299_v53 = vpop.eup %8415 }
 0xc9f   :  { %v2870_v58 = vsel %vm265_vm1, %v9299_v53, 0.0 }
 0xca2   :  { %v9302_v55 = vpop.eup %8417 }
 0xca3   :  { %v3036_v57 = vsel %vm265_vm1, %v9302_v55, 0.0 }
 0xca5   :  { %2875 = vrot.lane.b32.xlu1 %v9210_v27, %s8724_s4 }
 0xca6   :  { %v9308_v59 = vpop.eup %8419 }
 0xca7   :  { %v3202_v60 = vsel %vm265_vm1, %v9308_v59, 0.0 }
 0xcae   :  { %2709 = vrot.lane.b32.xlu0 %v9210_v27, %s8723_s22 }
 0xcc8   :  { %v2029_v9 = vpop.xlane.xlu1 %2028 }
 0xcc9   :  { %8421 = vrcp.f32 %v2029_v9  ;;  %2705 = vadd.xlane.f32.xlu1 %v2704_v54 }
 0xccd   :  { %3037 = vadd.xlane.f32.xlu1 %v3036_v57  ;;  %2871 = vadd.xlane.f32.xlu0 %v2870_v58 }
 0xcd1   :  { %3203 = vadd.xlane.f32.xlu1 %v3202_v60 }
 0xcd3   :  { %v8422_v61 = vpop.eup %8421 }
 0xcd4   :  { %v2031_v62 = vmul.f32 %v8422_v61, %v8406_v20 }
 0xcd6   :  { %7838 = vmatmul.mubr.msk.f32.vlgmr.msra.gmra.mrb[24].mxu1 %vm265_vm1, %v2031_v62  ;;  %v7359_v62 = vld [vmem:[%s9922_s10] ss:$0 sm:$0xff] }
 0xcd7   :  { %7846 = vmatpush3.msra.mxu1 %v2199_v23  ;;  %7847 = vmatprep.mubr.msk.f32.mxu1 %vm8721_vm0, %v8720_v0 }
 0xcd8   :  { %7855 = vmatprep.subr.mxu1 %v8720_v0 }
 0xce2   :  { %3207 = vrot.lane.b32.xlu1 %v9210_v27, %s9961_s2 }
 0xce3   :  { %3041 = vrot.lane.b32.xlu0 %v9210_v27, %s9963_s8  ;;  %s9994_s8 = sld [smem:[#allocation29_spill]] }
 0xd1d   :  { %v2195_v1 = vpop.xlane.xlu0 %2194 }
 0xd1e   :  { %8423 = vrcp.f32 %v2195_v1 }
 0xd21   :  { %v2361_v2 = vpop.xlane.xlu1 %2360 }
 0xd22   :  { %8425 = vrcp.f32 %v2361_v2 }
 0xd25   :  { %v2527_v3 = vpop.xlane.xlu0 %2526  ;;  %v2876_v12 = vpop.permute.xlu1 %2875 }
 0xd26   :  { %8427 = vrcp.f32 %v2527_v3 }
 0xd28   :  { %v8424_v4 = vpop.eup %8423 }
 0xd29   :  { %v2197_v5 = vmul.f32 %v8424_v4, %v8408_v35  ;;  %v2710_v10 = vpop.permute.xlu0 %2709 }
 0xd2b   :  { %7848 = vmatmul.mubr.msk.f32.vlgmr.msra.gmra.mrb[26].mxu1 %vm265_vm1, %v2197_v5 }
 0xd2c   :  { %v8426_v6 = vpop.eup %8425  ;;  %7856 = vmatpush3.msra.mxu1 %v2365_v63  ;;  %7857 = vmatprep.mubr.msk.f32.mxu1 %vm8721_vm0, %v8720_v0 }
 0xd2d   :  { %7865 = vmatprep.subr.mxu1 %v8720_v0  ;;  %v2363_v7 = vmul.f32 %v8426_v6, %v8410_v37 }
 0xd2f   :  { %7858 = vmatmul.mubr.msk.f32.vlgmr.msra.gmra.mrb[28].mxu1 %vm265_vm1, %v2363_v7 }
 0xd30   :  { %v8428_v27 = vpop.eup %8427  ;;  %7866 = vmatpush3.msra.mxu1 %v2531_v11  ;;  %7867 = vmatprep.mubr.msk.f32.mxu1 %vm8721_vm0, %v8720_v0 }
 0xd31   :  { %7875 = vmatprep.subr.mxu1 %v8720_v0  ;;  %v2529_v8 = vmul.f32 %v8428_v27, %v9291_v39  ;;  %v3299_v39 = vld [vmem:[#allocation11 + $0x8] sm:$0xff] }
 0xd32   :  { %v8239_v40 = vpack.c.bf16 %v3299_v39, %v3298_v38 }
 0xd33   :  { %7868 = vmatmul.mubr.msk.f32.vlgmr.msra.gmra.mrb[30].mxu1 %vm265_vm1, %v2529_v8 }
 0xd34   :  { %7876 = vmatpush3.msra.mxu1 %v2710_v10  ;;  %7877 = vmatprep.mubr.msk.f32.mxu1 %vm8721_vm0, %v8720_v0 }
 0xd35   :  { %7885 = vmatprep.subr.mxu1 %v8720_v0  ;;  %8240 = vmatprep.subr.bf16.mxu0 %v8239_v40 }
 0xd36   :  { %8242 = vmatpush3.bf16.msra.mxu0 %v8239_v40 }
 0xd37   :  { %8244 = vmatprep.subr.bf16.mxu0 %v8243_v42 }
 0xd3a   :  { %8246 = vmatpush3.bf16.msra.mxu0 %v8243_v42 }
 0xd56   :  { %v2706_v13 = vpop.xlane.xlu1 %2705 }
 0xd57   :  { %8429 = vrcp.f32 %v2706_v13 }
 0xd5a   :  { %v3038_v14 = vpop.xlane.xlu1 %3037  ;;  %v2872_v15 = vpop.xlane.xlu0 %2871 }
 0xd5b   :  { %8431 = vrcp.f32 %v2872_v15 }
 0xd5c   :  { %8433 = vrcp.f32 %v3038_v14 }
 0xd5e   :  { %v3204_v16 = vpop.xlane.xlu1 %3203  ;;  %v3042_v23 = vpop.permute.xlu0 %3041 }
 0xd5f   :  { %8435 = vrcp.f32 %v3204_v16 }
 0xd61   :  { %v8430_v17 = vpop.eup %8429 }
 0xd62   :  { %v2708_v18 = vmul.f32 %v8430_v17, %v8414_v52  ;;  %v3208_v28 = vpop.permute.xlu1 %3207 }
 0xd64   :  { %7878 = vmatmul.mubr.msk.f32.vlgmr.msra.gmra.mrb[32].mxu1 %vm265_vm1, %v2708_v18  ;;  %v3437_v18 = vld [vmem:[#allocation13 + $0x8] sm:$0xff] }
 0xd65   :  { %7886 = vmatpush3.msra.mxu1 %v2876_v12  ;;  %7887 = vmatprep.mubr.msk.f32.mxu1 %vm8721_vm0, %v8720_v0  ;;  %v8432_v19 = vpop.eup %8431 }
 0xd66   :  { %7895 = vmatprep.subr.mxu1 %v8720_v0  ;;  %v2874_v20 = vmul.f32 %v8432_v19, %v9299_v53  ;;  %v8434_v21 = vpop.eup %8433  ;;  %v3438_v19 = vld [vmem:[#allocation13 + $0x10] sm:$0xff] }
 0xd67   :  { %v3040_v25 = vmul.f32 %v8434_v21, %v9302_v55  ;;  %v3439_v21 = vld [vmem:[#allocation13 + $0x18] sm:$0xff] }
 0xd68   :  { %7888 = vmatmul.mubr.msk.f32.vlgmr.msra.gmra.mrb[34].mxu1 %vm265_vm1, %v2874_v20 }
 0xd69   :  { %7896 = vmatpush3.msra.mxu1 %v3042_v23  ;;  %7897 = vmatprep.mubr.msk.f32.mxu1 %vm8721_vm0, %v8720_v0  ;;  %v8436_v26 = vpop.eup %8435  ;;  %v8251_v23 = vpack.c.bf16 %v3439_v21, %v3438_v19 }
 0xd6a   :  { %7905 = vmatprep.subr.mxu1 %v8720_v0  ;;  %v3206_v30 = vmul.f32 %v8436_v26, %v9308_v59  ;;  %v3531_v26 = vld [vmem:[%s9925_s13 + $0x8] sm:$0xff] }
 0xd6c   :  { %7898 = vmatmul.mubr.msk.f32.vlgmr.msra.gmra.mrb[36].mxu1 %vm265_vm1, %v3040_v25  ;;  %v3530_v25 = vld [vmem:[%s9925_s13] sm:$0xff] }
 0xd6d   :  { %7906 = vmatpush3.msra.mxu1 %v3208_v28  ;;  %7907 = vmatprep.mubr.msk.f32.mxu1 %vm8721_vm0, %v8720_v0  ;;  %v3532_v28 = vld [vmem:[%s9925_s13 + $0x10] sm:$0xff] }
 0xd70   :  { %7908 = vmatmul.mubr.msk.f32.vlgmr.msra.gmra.mrb[38].mxu1 %vm265_vm1, %v3206_v30  ;;  %v8255_v30 = vpack.c.bf16 %v3531_v26, %v3530_v25 }
 0xd72   :  { %8256 = vmatprep.subr.bf16.mxu0 %v8255_v30 }
 0xda9   :  { %v2104_v31 = vpop.f32.mrb[24].mxu1 }
 0xdaa   :  { %v7839_v32 = vpop.f32.mrb[25].mxu1 }
 0xdfe   :  { %v2270_v33 = vpop.f32.mrb[26].mxu1 }
 0xdff   :  { %2607 = vrot.lane.b32.xlu0 %v2270_v33, %s9959_s3  ;;  %v7849_v34 = vpop.f32.mrb[27].mxu1  ;;  %v3534_v33 = vld [vmem:[%s9925_s13 + $0x20] sm:$0xff] }
 0xe00   :  { %v3535_v34 = vld [vmem:[%s9925_s13 + $0x28] sm:$0xff] }
 0xe02   :  { %v2436_v29 = vpop.f32.mrb[28].mxu1 }
 0xe03   :  { %2611 = vrot.lane.b32.xlu1 %v2436_v29, %s9980_s23  ;;  %v7859_v35 = vpop.f32.mrb[29].mxu1  ;;  %v8263_v29 = vpack.c.bf16 %v3535_v34, %v3534_v33 }
 0xe06   :  { %v2602_v36 = vpop.f32.mrb[30].mxu1 }
 0xe07   :  { %2615 = vrot.lane.b32.xlu1 %v2602_v36, %s9985_s11  ;;  %v7869_v37 = vpop.f32.mrb[31].mxu1 }
 0xe37   :  { %v2781_v43 = vpop.f32.mrb[32].mxu1 }
 0xe38   :  { %v7879_v44 = vpop.f32.mrb[33].mxu1 }
 0xe3b   :  { %v2947_v45 = vpop.f32.mrb[34].mxu1 }
 0xe3c   :  { %3284 = vrot.lane.b32.xlu0 %v2947_v45, %s9959_s3  ;;  %v7889_v46 = vpop.f32.mrb[35].mxu1  ;;  %s9992_s3 = smov 8  }
 0xe3f   :  { %v3113_v47 = vpop.f32.mrb[36].mxu1 }
 0xe40   :  { %3288 = vrot.lane.b32.xlu0 %v3113_v47, %s9980_s23  ;;  %v7899_v48 = vpop.f32.mrb[37].mxu1 }
 0xe43   :  { %v3279_v49 = vpop.f32.mrb[38].mxu1 }
 0xe44   :  { %3292 = vrot.lane.b32.xlu1 %v3279_v49, %s9985_s11  ;;  %v7909_v50 = vpop.f32.mrb[39].mxu1 }
 0xe45   :  { %v3536_v50 = vld [vmem:[%s9925_s13 + $0x30] sm:$0xff] }
 0xe71   :  { %v2608_v51 = vpop.permute.xlu0 %2607 }
 0xe72   :  { %v2618_v52 = vsel %vm265_vm1, %v2104_v31, %v2608_v51  ;;  %v3533_v31 = vld [vmem:[%s9925_s13 + $0x18] sm:$0xff] }
 0xe73   :  { %v8259_v32 = vpack.c.bf16 %v3533_v31, %v3532_v28  ;;  %v3537_v51 = vld [vmem:[%s9925_s13 + $0x38] sm:$0xff]  ;;  %v7370_v31 = vld [vmem:[%s9931_s19] ss:$0 sm:$0xff] }
 0xe75   :  { %v2612_v11 = vpop.permute.xlu1 %2611 }
 0xe76   :  { %v2619_v53 = vsel %vm939_vm2, %v2618_v52, %v2612_v11  ;;  %v8267_v11 = vpack.c.bf16 %v3537_v51, %v3536_v50  ;;  %v7364_v52 = vld [vmem:[%s9924_s12] ss:$0 sm:$0xff] }
 0xe79   :  { %v2616_v9 = vpop.permute.xlu1 %2615 }
 0xe7a   :  { %v2620_v54 = vsel %vm941_vm3, %v2619_v53, %v2616_v9 }
 0xe7b   :  { %7918 = vmatprep.mubr.msk.f32.mxu0 %vm183_vm4, %v2620_v54 }
 0xeae   :  { %v3285_v55 = vpop.permute.xlu0 %3284 }
 0xeaf   :  { %v3295_v58 = vsel %vm265_vm1, %v2781_v43, %v3285_v55  ;;  %v7363_v43 = vld [vmem:[%s9930_s18] ss:$0 sm:$0xff] }
 0xeb2   :  { %v3289_v57 = vpop.permute.xlu0 %3288 }
 0xeb3   :  { %v3296_v59 = vsel %vm939_vm2, %v3295_v58, %v3289_v57 }
 0xeb6   :  { %v3293_v60 = vpop.permute.xlu1 %3292 }
 0xeb7   :  { %v3297_v61 = vsel %vm941_vm3, %v3296_v59, %v3293_v60  ;;  %v7367_v59 = vld [vmem:[%s9926_s14] ss:$0 sm:$0xff] }
 0xeb8   :  { %7919 = vmatmul.mubr.msk.f32.vlgmr.msra.gmra.mrb[32].mxu0 %vm183_vm4, %v3297_v61 }
 0xeb9   :  { %8258 = vmatpush3.bf16.msra.mxu0 %v8255_v30 }
 0xeba   :  { %8260 = vmatprep.subr.bf16.mxu0 %v8259_v32 }
 0xebd   :  { %8262 = vmatpush3.bf16.msra.mxu0 %v8259_v32 }
 0xebe   :  { %8264 = vmatprep.subr.bf16.mxu0 %v8263_v29 }
 0xec1   :  { %8266 = vmatpush3.bf16.msra.mxu0 %v8263_v29  ;;  %v7371_v29 = vld [vmem:[%s9932_s20] ss:$0 sm:$0xff] }
 0xec2   :  { %8268 = vmatprep.subr.bf16.mxu0 %v8267_v11 }
 0xec5   :  { %8270 = vmatpush3.bf16.msra.mxu0 %v8267_v11 }
 0xec6   :  { %7972 = vmatprep.subr.mxu0 %v8720_v0 }
 0xf8b   :  { %v7920_v63 = vpop.f32.mrb[32].mxu0 }
 0xf8c   :  { %v3387_v1 = vadd.f32 %v7920_v63, %v7359_v62  ;;  %v3381_v2 = vpop.f32.mrb[33].mxu0 }
 0xf8d   :  { %v3382_v3 = vadd.f32 %v7359_v62, %v3381_v2 }
 0xf8e   :  { %v3391_v4 = vadd.f32 %v3387_v1, %v9204_v24 }
 0xf8f   :  { %v3390_v5 = vadd.f32 %v3382_v3, %v9200_v22  ;;  %v3436_v22 = vld [vmem:[#allocation13] sm:$0xff] }
 0xf90   :  { %v3397_v6 = vsel %vm183_vm4, %v3391_v4, 0.0  ;;  %v8247_v20 = vpack.c.bf16 %v3437_v18, %v3436_v22  ;;  %v7375_v18 = vld [vmem:[%s9981_s27 + $0x38] sm:$0xff] }
 0xf91   :  { %3398 = vadd.xlane.f32.xlu1 %v3397_v6  ;;  %v3394_v7 = vsel %vm183_vm4, %v3390_v5, 0.0 }
 0xf92   :  { %3395 = vadd.xlane.f32.xlu0 %v3394_v7  ;;  %8248 = vmatprep.subr.bf16.mxu1 %v8247_v20 }
 0xf93   :  { %8250 = vmatpush3.bf16.msra.mxu1 %v8247_v20 }
 0xf94   :  { %8252 = vmatprep.subr.bf16.mxu1 %v8251_v23 }
 0xf97   :  { %8254 = vmatpush3.bf16.msra.mxu1 %v8251_v23 }
0x101e   :  { %v3399_v27 = vpop.xlane.xlu1 %3398 }
0x101f   :  { %v3401_v8 = vmul.f32 0.03125, %v3399_v27  ;;  %v3396_v10 = vpop.xlane.xlu0 %3395 }
0x1020   :  { %v3400_v12 = vmul.f32 0.03125, %v3396_v10 }
0x1021   :  { %v3403_v13 = vsub.f32 %v3391_v4, %v3401_v8 }
0x1022   :  { %v3402_v14 = vsub.f32 %v3390_v5, %v3400_v12 }
0x1023   :  { %v3405_v17 = vmul.f32 %v3403_v13, %v3403_v13 }
0x1024   :  { %v3404_v15 = vmul.f32 %v3402_v14, %v3402_v14 }
0x1025   :  { %v3409_v24 = vsel %vm183_vm4, %v3405_v17, 0.0  ;;  %v7373_v17 = vld [vmem:[%s9981_s27 + $0x28] sm:$0xff] }
0x1026   :  { %v3406_v16 = vsel %vm183_vm4, %v3404_v15, 0.0 }
0x1027   :  { %3407 = vadd.xlane.f32.xlu0 %v3406_v16  ;;  %v7372_v16 = vld [vmem:[%s9981_s27 + $0x20] sm:$0xff] }
0x1028   :  { %v8271_v22 = vpack.c.bf16 %v7373_v17, %v7372_v16 }
0x102a   :  { %8272 = vmatprep.subr.bf16.mxu1 %v8271_v22 }
0x102b   :  { %3410 = vadd.xlane.f32.xlu0 %v3409_v24  ;;  %v7374_v24 = vld [vmem:[%s9981_s27 + $0x30] sm:$0xff] }
0x102c   :  { %v8275_v19 = vpack.c.bf16 %v7375_v18, %v7374_v24 }
0x10b4   :  { %v3408_v35 = vpop.xlane.xlu0 %3407 }
0x10b5   :  { %v3412_v36 = vmul.f32 0.03125, %v3408_v35 }
0x10b7   :  { %v3414_v37 = vadd.f32 1e-05, %v3412_v36 }
0x10b8   :  { %v3411_v38 = vpop.xlane.xlu0 %3410 }
0x10b9   :  { %8437 = vrsqrt.f32 %v3414_v37  ;;  %v3413_v39 = vmul.f32 0.03125, %v3411_v38 }
0x10bb   :  { %v3415_v40 = vadd.f32 1e-05, %v3413_v39  ;;  %v7377_v39 = vld [vmem:[%s9982_s28 + $0x1] ss:$0 sm:$0xff]  ;;  %s9986_s28 = smov 80  }
0x10bd   :  { %8439 = vrsqrt.f32 %v3415_v40 }
0x10c3   :  { %v8438_v56 = vpop.eup %8437 }
0x10c4   :  { %v3418_v42 = vmul.f32 %v8438_v56, %v3402_v14 }
0x10c6   :  { %v3426_v44 = vmul.f32 %v7362_v41, %v3418_v42 }
0x10c7   :  { %v8440_v45 = vpop.eup %8439 }
0x10c8   :  { %v3419_v46 = vmul.f32 %v8440_v45, %v3403_v13  ;;  %v3434_v47 = vadd.f32 %v7363_v43, %v3426_v44 }
0x10ca   :  { %v3427_v48 = vmul.f32 %v7362_v41, %v3419_v46  ;;  %7929 = vmatprep.mubr.msk.f32.mxu1 %vm183_vm4, %v3434_v47 }
0x10cc   :  { %v3435_v49 = vadd.f32 %v7363_v43, %v3427_v48 }
0x10ce   :  { %7930 = vmatmul.mubr.msk.f32.vlgmr.msra.gmra.mrb[40].mxu1 %vm183_vm4, %v3435_v49 }
0x10cf   :  { %8274 = vmatpush3.bf16.msra.mxu1 %v8271_v22 }
0x10d0   :  { %8276 = vmatprep.subr.bf16.mxu1 %v8275_v19 }
0x10d3   :  { %8278 = vmatpush3.bf16.msra.mxu1 %v8275_v19 }
0x10d4   :  { %7962 = vmatprep.subr.mxu1 %v8720_v0 }
0x11a1   :  { %v7931_v53 = vpop.f32.mrb[40].mxu1 }
0x11a2   :  { %v3525_v9 = vadd.f32 %v7931_v53, %v7364_v52  ;;  %v3519_v54 = vpop.f32.mrb[41].mxu1 }
0x11a3   :  { %v3520_v55 = vadd.f32 %v7364_v52, %v3519_v54 }
0x11a4   :  { %v3529_v58 = vmax.f32 %v3525_v9, 0.0 }
0x11a5   :  { %v3528_v57 = vmax.f32 %v3520_v55, 0.0 }
0x11a7   :  { %7948 = vmatprep.mubr.msk.f32.mxu0 %vm3545_vm5, %v3528_v57 }
0x11a8   :  { %7949 = vmatmul.mubr.msk.f32.vlgmr.msra.gmra.mrb[34].mxu0 %vm3545_vm5, %v3529_v58 }
0x11a9   :  { %7974 = vmatprep.mubr.msk.f32.mxu0 %vm8721_vm0, %v8720_v0 }
0x127b   :  { %v7950_v60 = vpop.f32.mrb[34].mxu0 }
0x127c   :  { %v3624_v61 = vadd.f32 %v7950_v60, %v7367_v59  ;;  %v3618_v62 = vpop.f32.mrb[35].mxu0 }
0x127d   :  { %v3619_v63 = vadd.f32 %v7367_v59, %v3618_v62 }
0x127e   :  { %v3628_v1 = vadd.f32 %v3624_v61, %v3435_v49 }
0x127f   :  { %v3627_v2 = vadd.f32 %v3619_v63, %v3434_v47 }
0x1280   :  { %v3634_v3 = vsel %vm183_vm4, %v3628_v1, 0.0 }
0x1281   :  { %3635 = vadd.xlane.f32.xlu0 %v3634_v3  ;;  %v3631_v4 = vsel %vm183_vm4, %v3627_v2, 0.0 }
0x1282   :  { %3632 = vadd.xlane.f32.xlu1 %v3631_v4 }
0x130e   :  { %v3636_v5 = vpop.xlane.xlu0 %3635 }
0x130f   :  { %v3638_v6 = vmul.f32 0.03125, %v3636_v5  ;;  %v3633_v7 = vpop.xlane.xlu1 %3632 }
0x1310   :  { %v3637_v27 = vmul.f32 0.03125, %v3633_v7 }
0x1311   :  { %v3640_v8 = vsub.f32 %v3628_v1, %v3638_v6 }
0x1312   :  { %v3639_v10 = vsub.f32 %v3627_v2, %v3637_v27 }
0x1313   :  { %v3642_v12 = vmul.f32 %v3640_v8, %v3640_v8 }
0x1314   :  { %v3641_v13 = vmul.f32 %v3639_v10, %v3639_v10 }
0x1315   :  { %v3646_v14 = vsel %vm183_vm4, %v3642_v12, 0.0 }
0x1316   :  { %3647 = vadd.xlane.f32.xlu0 %v3646_v14  ;;  %v3643_v15 = vsel %vm183_vm4, %v3641_v13, 0.0 }
0x1317   :  { %3644 = vadd.xlane.f32.xlu1 %v3643_v15 }
0x13a3   :  { %v3648_v20 = vpop.xlane.xlu0 %3647 }
0x13a4   :  { %v3650_v21 = vmul.f32 0.03125, %v3648_v20  ;;  %v3645_v23 = vpop.xlane.xlu1 %3644 }
0x13a5   :  { %v3649_v25 = vmul.f32 0.03125, %v3645_v23 }
0x13a6   :  { %v3652_v26 = vadd.f32 1e-05, %v3650_v21 }
0x13a7   :  { %v3651_v28 = vadd.f32 1e-05, %v3649_v25 }
0x13a8   :  { %8441 = vrsqrt.f32 %v3652_v26 }
0x13a9   :  { %8443 = vrsqrt.f32 %v3651_v28 }
0x13b2   :  { %v8442_v30 = vpop.eup %8441 }
0x13b3   :  { %v8444_v32 = vpop.eup %8443  ;;  %v3656_v33 = vmul.f32 %v8442_v30, %v3640_v8 }
0x13b4   :  { %v3655_v34 = vmul.f32 %v8444_v32, %v3639_v10 }
0x13b5   :  { %v3664_v35 = vmul.f32 %v7370_v31, %v3656_v33 }
0x13b6   :  { %v3663_v36 = vmul.f32 %v7370_v31, %v3655_v34 }
0x13b7   :  { %v9439_v38 = vadd.f32 %v7371_v29, %v3664_v35 }
0x13b8   :  { %v9437_v37 = vadd.f32 %v7371_v29, %v3663_v36 }
0x13ba   :  { %7959 = vmatprep.mubr.msk.f32.mxu1 %vm183_vm4, %v9437_v37 }
0x13bb   :  { %7960 = vmatmul.mubr.msk.f32.vlgmr.msra.gmra.mrb[42].mxu1 %vm183_vm4, %v9439_v38 }
0x13bc   :  { %7964 = vmatprep.mubr.msk.f32.mxu1 %vm8721_vm0, %v8720_v0 }
0x148e   :  { %v7961_v40 = vpop.f32.mrb[42].mxu1 }
0x148f   :  { %v3758_v56 = vpop.f32.mrb[43].mxu1  ;;  %v9464_v42 = vadd.f32 %v7961_v40, %v7377_v39 }
0x1490   :  { %v9450_v41 = vadd.f32 %v7377_v39, %v3758_v56 }
0x1492   :  { %3934 = vrot.lane.b32.xlu0 %v9450_v41, %s8724_s4  ;;  %3768 = vrot.lane.b32.xlu1 %v9450_v41, %s8723_s22 }
0x1496   :  { %4098 = vrot.lane.b32.xlu0 %v9450_v41, %s8727_s29  ;;  %3932 = vrot.lane.b32.xlu1 %v9450_v41, %s8725_s26 }
0x149a   :  { %4264 = vrot.lane.b32.xlu0 %v9450_v41, %s8728_s1  ;;  %4100 = vrot.lane.b32.xlu1 %v9450_v41, %s9986_s28 }
0x149e   :  { %4612 = vrot.lane.b32.xlu0 %v9464_v42, %s8724_s4  ;;  %4266 = vrot.lane.b32.xlu1 %v9450_v41, %s9987_s21 }
0x14a2   :  { %4778 = vrot.lane.b32.xlu0 %v9464_v42, %s9986_s28  ;;  %4446 = vrot.lane.b32.xlu1 %v9464_v42, %s8723_s22 }
0x14a6   :  { %4944 = vrot.lane.b32.xlu0 %v9464_v42, %s9987_s21  ;;  %4610 = vrot.lane.b32.xlu1 %v9464_v42, %s8725_s26 }
0x14aa   :  { %3856 = vrot.lane.b32.xlu0 %v9450_v41, %s9988_s25  ;;  %4776 = vrot.lane.b32.xlu1 %v9464_v42, %s8727_s29 }
0x14ae   :  { %4942 = vrot.lane.b32.xlu1 %v9464_v42, %s8728_s1 }
0x14b2   :  { %4022 = vrot.lane.b32.xlu1 %v9450_v41, %s9989_s9 }
0x1504   :  { %v3935_v43 = vpop.permute.xlu0 %3934  ;;  %v3769_v44 = vpop.permute.xlu1 %3768 }
0x1505   :  { %7963 = vmatpush3.xpose.msk.msra.mxu1 %vm265_vm1, %v3769_v44  ;;  %7973 = vmatpush3.xpose.msk.msra.mxu0 %vm265_vm1, %v3935_v43 }
0x1506   :  { %7982 = vmatprep.subr.mxu0 %v8720_v0  ;;  %7967 = vmatprep.subr.mxu1 %v8720_v0 }
0x1508   :  { %v4099_v45 = vpop.permute.xlu0 %4098  ;;  %7965 = vmatmul.mubr.msk.f32.vlgmr.msra.gmra.mrb[44].mxu1 %vm265_vm1, %v9450_v41  ;;  %v3933_v46 = vpop.permute.xlu1 %3932 }
0x1509   :  { %7975 = vmatmul.mubr.msk.f32.vlgmr.msra.gmra.mrb[36].mxu0 %vm265_vm1, %v3933_v46  ;;  %7969 = vmatprep.mubr.msk.f32.mxu1 %vm8721_vm0, %v8720_v0 }
0x150a   :  { %7984 = vmatprep.mubr.msk.f32.mxu0 %vm8721_vm0, %v8720_v0 }
0x150c   :  { %v4265_v47 = vpop.permute.xlu0 %4264  ;;  %v4101_v48 = vpop.permute.xlu1 %4100 }
0x150d   :  { %7983 = vmatpush3.xpose.msk.msra.mxu0 %vm265_vm1, %v4101_v48 }
0x150e   :  { %7992 = vmatprep.subr.mxu0 %v8720_v0 }
0x1510   :  { %v4613_v49 = vpop.permute.xlu0 %4612  ;;  %7985 = vmatmul.mubr.msk.f32.vlgmr.msra.gmra.mrb[38].mxu0 %vm265_vm1, %v4099_v45  ;;  %v4267_v50 = vpop.permute.xlu1 %4266 }
0x1511   :  { %7993 = vmatpush3.xpose.msk.msra.mxu0 %vm265_vm1, %v4267_v50  ;;  %7994 = vmatprep.mubr.msk.f32.mxu0 %vm8721_vm0, %v8720_v0 }
0x1512   :  { %8002 = vmatprep.subr.mxu0 %v8720_v0 }
0x1514   :  { %v4779_v51 = vpop.permute.xlu0 %4778  ;;  %7995 = vmatmul.mubr.msk.f32.vlgmr.msra.gmra.mrb[40].mxu0 %vm265_vm1, %v4265_v47  ;;  %v4447_v11 = vpop.permute.xlu1 %4446 }
0x1515   :  { %8003 = vmatpush3.xpose.msk.msra.mxu0 %vm265_vm1, %v4447_v11  ;;  %8004 = vmatprep.mubr.msk.f32.mxu0 %vm8721_vm0, %v8720_v0 }
0x1516   :  { %8012 = vmatprep.subr.mxu0 %v8720_v0 }
0x1518   :  { %v4945_v52 = vpop.permute.xlu0 %4944  ;;  %8005 = vmatmul.mubr.msk.f32.vlgmr.msra.gmra.mrb[42].mxu0 %vm265_vm1, %v9464_v42  ;;  %v4611_v53 = vpop.permute.xlu1 %4610 }
0x1519   :  { %8013 = vmatpush3.xpose.msk.msra.mxu0 %vm265_vm1, %v4613_v49  ;;  %8014 = vmatprep.mubr.msk.f32.mxu0 %vm8721_vm0, %v8720_v0 }
0x151a   :  { %8022 = vmatprep.subr.mxu0 %v8720_v0 }
0x151c   :  { %v3857_v9 = vpop.permute.xlu0 %3856  ;;  %8015 = vmatmul.mubr.msk.f32.vlgmr.msra.gmra.mrb[44].mxu0 %vm265_vm1, %v4611_v53  ;;  %v4777_v54 = vpop.permute.xlu1 %4776 }
0x151d   :  { %7968 = vmatpush3.msra.mxu1 %v3857_v9  ;;  %8023 = vmatpush3.xpose.msk.msra.mxu0 %vm265_vm1, %v4779_v51 }
0x151e   :  { %8024 = vmatprep.mubr.msk.f32.mxu0 %vm8721_vm0, %v8720_v0  ;;  %8032 = vmatprep.subr.mxu0 %v8720_v0 }
0x151f   :  { %7977 = vmatprep.subr.mxu1 %v8720_v0 }
0x1520   :  { %8025 = vmatmul.mubr.msk.f32.vlgmr.msra.gmra.mrb[46].mxu0 %vm265_vm1, %v4777_v54  ;;  %v4943_v55 = vpop.permute.xlu1 %4942 }
0x1521   :  { %8033 = vmatpush3.xpose.msk.msra.mxu0 %vm265_vm1, %v4945_v52  ;;  %8034 = vmatprep.mubr.msk.f32.mxu0 %vm8721_vm0, %v8720_v0 }
0x1524   :  { %8035 = vmatmul.mubr.msk.f32.vlgmr.msra.gmra.mrb[48].mxu0 %vm265_vm1, %v4943_v55  ;;  %v9538_v28 = vpop.permute.xlu1 %4022 }
0x15db   :  { %v3840_v57 = vpop.f32.mrb[44].mxu1 }
0x15dc   :  { %v3844_v58 = vmul.f32 0.35355338, %v3840_v57  ;;  %v7966_v59 = vpop.f32.mrb[45].mxu1  ;;  %v4006_v60 = vpop.f32.mrb[36].mxu0 }
0x15dd   :  { %v4010_v61 = vmul.f32 0.35355338, %v4006_v60  ;;  %v7976_v62 = vpop.f32.mrb[37].mxu0 }
0x15de   :  { %v3845_v63 = vsel %vm265_vm1, %v3844_v58, -inf }
0x15df   :  { %3846 = vmax.xlane.f32.xlu0 %v3845_v63  ;;  %v4011_v1 = vsel %vm265_vm1, %v4010_v61, -inf }
0x15e0   :  { %4012 = vmax.xlane.f32.xlu1 %v4011_v1 }
0x15e3   :  { %v4172_v2 = vpop.f32.mrb[38].mxu0 }
0x15e4   :  { %v4176_v3 = vmul.f32 0.35355338, %v4172_v2  ;;  %v7986_v4 = vpop.f32.mrb[39].mxu0 }
0x15e6   :  { %v4177_v5 = vsel %vm265_vm1, %v4176_v3, -inf }
0x15e7   :  { %4178 = vmax.xlane.f32.xlu0 %v4177_v5  ;;  %v4338_v6 = vpop.f32.mrb[40].mxu0 }
0x15e8   :  { %v4342_v7 = vmul.f32 0.35355338, %v4338_v6  ;;  %v7996_v27 = vpop.f32.mrb[41].mxu0 }
0x15ea   :  { %v4343_v8 = vsel %vm265_vm1, %v4342_v7, -inf }
0x15eb   :  { %4344 = vmax.xlane.f32.xlu0 %v4343_v8  ;;  %v4518_v10 = vpop.f32.mrb[42].mxu0 }
0x15ec   :  { %v4522_v12 = vmul.f32 0.35355338, %v4518_v10  ;;  %v8006_v13 = vpop.f32.mrb[43].mxu0 }
0x15ee   :  { %v4523_v14 = vsel %vm265_vm1, %v4522_v12, -inf }
0x15ef   :  { %4524 = vmax.xlane.f32.xlu1 %v4523_v14  ;;  %v4684_v15 = vpop.f32.mrb[44].mxu0 }
0x15f0   :  { %v4688_v16 = vmul.f32 0.35355338, %v4684_v15  ;;  %v8016_v17 = vpop.f32.mrb[45].mxu0 }
0x15f2   :  { %v4689_v24 = vsel %vm265_vm1, %v4688_v16, -inf }
0x15f3   :  { %4690 = vmax.xlane.f32.xlu0 %v4689_v24  ;;  %v4850_v22 = vpop.f32.mrb[46].mxu0 }
0x15f4   :  { %v4854_v18 = vmul.f32 0.35355338, %v4850_v22  ;;  %v8026_v19 = vpop.f32.mrb[47].mxu0 }
0x15f6   :  { %v4855_v20 = vsel %vm265_vm1, %v4854_v18, -inf }
0x15f7   :  { %4856 = vmax.xlane.f32.xlu1 %v4855_v20  ;;  %v5016_v21 = vpop.f32.mrb[48].mxu0 }
0x15f8   :  { %v5020_v23 = vmul.f32 0.35355338, %v5016_v21  ;;  %v8036_v25 = vpop.f32.mrb[49].mxu0 }
0x15fa   :  { %v5021_v26 = vsel %vm265_vm1, %v5020_v23, -inf }
0x15fb   :  { %5022 = vmax.xlane.f32.xlu0 %v5021_v26 }
0x1608   :  { %4354 = vrot.lane.b32.xlu1 %v9450_v41, %s9990_s24 }
0x1611   :  { %4188 = vrot.lane.b32.xlu0 %v9450_v41, %s9991_s0 }
0x166c   :  { %v3847_v30 = vpop.xlane.xlu0 %3846 }
0x166d   :  { %v3848_v31 = vsub.f32 %v3844_v58, %v3847_v30  ;;  %v4013_v32 = vpop.xlane.xlu1 %4012 }
0x166e   :  { %v4014_v33 = vsub.f32 %v4010_v61, %v4013_v32 }
0x166f   :  { %v3849_v34 = vmul.f32 1.442695, %v3848_v31 }
0x1670   :  { %v4015_v29 = vmul.f32 1.442695, %v4014_v33 }
0x1671   :  { %8445 = vpow2.f32 %v3849_v34 }
0x1672   :  { %8447 = vpow2.f32 %v4015_v29 }
0x1674   :  { %v4179_v35 = vpop.xlane.xlu0 %4178 }
0x1675   :  { %v4180_v36 = vsub.f32 %v4176_v3, %v4179_v35 }
0x1677   :  { %v4181_v39 = vmul.f32 1.442695, %v4180_v36 }
0x1678   :  { %v4345_v40 = vpop.xlane.xlu0 %4344 }
0x1679   :  { %8449 = vpow2.f32 %v4181_v39  ;;  %v4346_v56 = vsub.f32 %v4342_v7, %v4345_v40 }
0x167b   :  { %v8446_v43 = vpop.eup %8445  ;;  %v4347_v44 = vmul.f32 1.442695, %v4346_v56 }
0x167c   :  { %v8448_v45 = vpop.eup %8447  ;;  %v3851_v41 = vsel %vm265_vm1, %v8446_v43, 0.0  ;;  %v4525_v51 = vpop.xlane.xlu1 %4524 }
0x167d   :  { %8451 = vpow2.f32 %v4347_v44  ;;  %3852 = vadd.xlane.f32.xlu1 %v3851_v41  ;;  %v4017_v46 = vsel %vm265_vm1, %v8448_v45, 0.0  ;;  %v4526_v11 = vsub.f32 %v4522_v12, %v4525_v51  ;;  %v7406_v51 = vld [vmem:[%s9983_s7 + $0x30] sm:$0xff] }
0x167e   :  { %4018 = vadd.xlane.f32.xlu0 %v4017_v46 }
0x167f   :  { %v4527_v54 = vmul.f32 1.442695, %v4526_v11  ;;  %v7407_v11 = vld [vmem:[%s9983_s7 + $0x38] sm:$0xff] }
0x1680   :  { %v4691_v52 = vpop.xlane.xlu0 %4690 }
0x1681   :  { %v4692_v9 = vsub.f32 %v4688_v16, %v4691_v52  ;;  %8453 = vpow2.f32 %v4527_v54  ;;  %v8283_v52 = vpack.c.bf16 %v7407_v11, %v7406_v51  ;;  %v7413_v51 = vld [vmem:[%s9927_s15 + $0x1] ss:$0 sm:$0xff] }
0x1683   :  { %v8450_v47 = vpop.eup %8449  ;;  %v4693_v58 = vmul.f32 1.442695, %v4692_v9 }
0x1684   :  { %v4183_v48 = vsel %vm265_vm1, %v8450_v47, 0.0  ;;  %v4857_v53 = vpop.xlane.xlu1 %4856 }
0x1685   :  { %4184 = vadd.xlane.f32.xlu1 %v4183_v48  ;;  %v4858_v55 = vsub.f32 %v4854_v18, %v4857_v53  ;;  %8455 = vpow2.f32 %v4693_v58  ;;  %v7404_v48 = vld [vmem:[%s9983_s7 + $0x20] sm:$0xff] }
0x1687   :  { %v9543_v49 = vpop.eup %8451  ;;  %v4859_v59 = vmul.f32 1.442695, %v4858_v55 }
0x1688   :  { %v4349_v50 = vsel %vm265_vm1, %v9543_v49, 0.0  ;;  %v5023_v57 = vpop.xlane.xlu0 %5022  ;;  %v4355_v7 = vpop.permute.xlu1 %4354 }
0x1689   :  { %4350 = vadd.xlane.f32.xlu0 %v4349_v50  ;;  %v5024_v60 = vsub.f32 %v5020_v23, %v5023_v57  ;;  %8457 = vpow2.f32 %v4859_v59 }
0x168b   :  { %v5025_v61 = vmul.f32 1.442695, %v5024_v60  ;;  %v8454_v62 = vpop.eup %8453 }
0x168c   :  { %v4529_v1 = vsel %vm265_vm1, %v8454_v62, 0.0  ;;  %v4189_v27 = vpop.permute.xlu0 %4188 }
0x168d   :  { %8459 = vpow2.f32 %v5025_v61 }
0x168f   :  { %v9551_v63 = vpop.eup %8455 }
0x1690   :  { %v4695_v3 = vsel %vm265_vm1, %v9551_v63, 0.0 }
0x1693   :  { %v9554_v2 = vpop.eup %8457 }
0x1694   :  { %v4861_v4 = vsel %vm265_vm1, %v9554_v2, 0.0 }
0x1696   :  { %4700 = vrot.lane.b32.xlu1 %v9464_v42, %s9989_s9 }
0x1697   :  { %v9560_v5 = vpop.eup %8459 }
0x1698   :  { %v5027_v6 = vsel %vm265_vm1, %v9560_v5, 0.0 }
0x169f   :  { %4534 = vrot.lane.b32.xlu0 %v9464_v42, %s9988_s25 }
0x16ba   :  { %4530 = vadd.xlane.f32.xlu1 %v4529_v1 }
0x16be   :  { %4696 = vadd.xlane.f32.xlu0 %v4695_v3  ;;  %4862 = vadd.xlane.f32.xlu1 %v4861_v4 }
0x16c2   :  { %5028 = vadd.xlane.f32.xlu1 %v5027_v6 }
0x16d3   :  { %5032 = vrot.lane.b32.xlu1 %v9464_v42, %s9990_s24 }
0x16d4   :  { %4866 = vrot.lane.b32.xlu0 %v9464_v42, %s9991_s0 }
0x170a   :  { %v3853_v8 = vpop.xlane.xlu1 %3852 }
0x170b   :  { %8461 = vrcp.f32 %v3853_v8  ;;  %v4019_v10 = vpop.xlane.xlu0 %4018 }
0x170c   :  { %8463 = vrcp.f32 %v4019_v10  ;;  %v8521_v10 = vld [vmem:[#allocation2] sm:$0xff] }
0x1712   :  { %v4185_v12 = vpop.xlane.xlu1 %4184 }
0x1713   :  { %8465 = vrcp.f32 %v4185_v12  ;;  %v7408_v12 = vld [vmem:[#allocation5 + $0x1] ss:$0 sm:$0xff] }
0x1715   :  { %v8462_v13 = vpop.eup %8461 }
0x1716   :  { %v3855_v14 = vmul.f32 %v8462_v13, %v8446_v43  ;;  %v4351_v15 = vpop.xlane.xlu0 %4350  ;;  %v8464_v16 = vpop.eup %8463 }
0x1717   :  { %8467 = vrcp.f32 %v4351_v15  ;;  %v4021_v42 = vmul.f32 %v8464_v16, %v8448_v45  ;;  %v4701_v20 = vpop.permute.xlu1 %4700 }
0x1718   :  { %7970 = vmatmul.mubr.msk.f32.vlgmr.msra.gmra.mrb[46].mxu1 %vm265_vm1, %v3855_v14 }
0x1719   :  { %7978 = vmatpush3.msra.mxu1 %v9538_v28  ;;  %7979 = vmatprep.mubr.msk.f32.mxu1 %vm8721_vm0, %v8720_v0 }
0x171a   :  { %7987 = vmatprep.subr.mxu1 %v8720_v0  ;;  %v4535_v19 = vpop.permute.xlu0 %4534 }
0x171c   :  { %7980 = vmatmul.mubr.msk.f32.vlgmr.msra.gmra.mrb[48].mxu1 %vm265_vm1, %v4021_v42 }
0x171d   :  { %v8466_v17 = vpop.eup %8465  ;;  %7988 = vmatpush3.msra.mxu1 %v4189_v27  ;;  %7989 = vmatprep.mubr.msk.f32.mxu1 %vm8721_vm0, %v8720_v0 }
0x171e   :  { %v4187_v24 = vmul.f32 %v8466_v17, %v8450_v47  ;;  %7997 = vmatprep.subr.mxu1 %v8720_v0 }
0x1720   :  { %7990 = vmatmul.mubr.msk.f32.vlgmr.msra.gmra.mrb[50].mxu1 %vm265_vm1, %v4187_v24 }
0x1721   :  { %v8468_v22 = vpop.eup %8467  ;;  %7998 = vmatpush3.msra.mxu1 %v4355_v7  ;;  %7999 = vmatprep.mubr.msk.f32.mxu1 %vm8721_vm0, %v8720_v0 }
0x1722   :  { %v4353_v18 = vmul.f32 %v8468_v22, %v9543_v49  ;;  %8007 = vmatprep.subr.mxu1 %v8720_v0  ;;  %v7405_v49 = vld [vmem:[%s9983_s7 + $0x28] sm:$0xff] }
0x1723   :  { %v8279_v50 = vpack.c.bf16 %v7405_v49, %v7404_v48 }
0x1724   :  { %8000 = vmatmul.mubr.msk.f32.vlgmr.msra.gmra.mrb[52].mxu1 %vm265_vm1, %v4353_v18 }
0x1725   :  { %8008 = vmatpush3.msra.mxu1 %v4535_v19  ;;  %8009 = vmatprep.mubr.msk.f32.mxu1 %vm8721_vm0, %v8720_v0 }
0x1726   :  { %8017 = vmatprep.subr.mxu1 %v8720_v0  ;;  %8280 = vmatprep.subr.bf16.mxu0 %v8279_v50 }
0x1727   :  { %8282 = vmatpush3.bf16.msra.mxu0 %v8279_v50 }
0x1728   :  { %8284 = vmatprep.subr.bf16.mxu0 %v8283_v52 }
0x172b   :  { %8286 = vmatpush3.bf16.msra.mxu0 %v8283_v52  ;;  %v7414_v52 = vld [vmem:[%s9928_s16 + $0x1] ss:$0 sm:$0xff] }
0x1747   :  { %v4531_v21 = vpop.xlane.xlu1 %4530 }
0x1748   :  { %8469 = vrcp.f32 %v4531_v21 }
0x174b   :  { %v4697_v23 = vpop.xlane.xlu0 %4696  ;;  %v4863_v25 = vpop.xlane.xlu1 %4862 }
0x174c   :  { %8471 = vrcp.f32 %v4697_v23 }
0x174d   :  { %8473 = vrcp.f32 %v4863_v25 }
0x174f   :  { %v5029_v26 = vpop.xlane.xlu1 %5028  ;;  %v4867_v34 = vpop.permute.xlu0 %4866 }
0x1750   :  { %8475 = vrcp.f32 %v5029_v26 }
0x1752   :  { %v8470_v28 = vpop.eup %8469 }
0x1753   :  { %v4533_v30 = vmul.f32 %v8470_v28, %v8454_v62  ;;  %v5033_v36 = vpop.permute.xlu1 %5032 }
0x1755   :  { %8010 = vmatmul.mubr.msk.f32.vlgmr.msra.gmra.mrb[54].mxu1 %vm265_vm1, %v4533_v30 }
0x1756   :  { %v8472_v31 = vpop.eup %8471  ;;  %8018 = vmatpush3.msra.mxu1 %v4701_v20  ;;  %8019 = vmatprep.mubr.msk.f32.mxu1 %vm8721_vm0, %v8720_v0 }
0x1757   :  { %v4699_v32 = vmul.f32 %v8472_v31, %v9551_v63  ;;  %8027 = vmatprep.subr.mxu1 %v8720_v0  ;;  %v8474_v33 = vpop.eup %8473  ;;  %v5361_v31 = vld [vmem:[#allocation8 + $0x28] sm:$0xff] }
0x1758   :  { %v4865_v29 = vmul.f32 %v8474_v33, %v9554_v2  ;;  %v5362_v33 = vld [vmem:[#allocation8 + $0x30] sm:$0xff] }
0x1759   :  { %8020 = vmatmul.mubr.msk.f32.vlgmr.msra.gmra.mrb[56].mxu1 %vm265_vm1, %v4699_v32 }
0x175a   :  { %8028 = vmatpush3.msra.mxu1 %v4867_v34  ;;  %8029 = vmatprep.mubr.msk.f32.mxu1 %vm8721_vm0, %v8720_v0  ;;  %v8476_v35 = vpop.eup %8475  ;;  %v5363_v34 = vld [vmem:[#allocation8 + $0x38] sm:$0xff] }
0x175b   :  { %8037 = vmatprep.subr.mxu1 %v8720_v0  ;;  %v5031_v39 = vmul.f32 %v8476_v35, %v9560_v5  ;;  %v7415_v35 = vld [vmem:[%s9984_s30 + $0x20] sm:$0xff] }
0x175d   :  { %8030 = vmatmul.mubr.msk.f32.vlgmr.msra.gmra.mrb[58].mxu1 %vm265_vm1, %v4865_v29  ;;  %v8299_v29 = vpack.c.bf16 %v5363_v34, %v5362_v33 }
0x175e   :  { %8038 = vmatpush3.msra.mxu1 %v5033_v36  ;;  %8039 = vmatprep.mubr.msk.f32.mxu1 %vm8721_vm0, %v8720_v0  ;;  %v7416_v36 = vld [vmem:[%s9984_s30 + $0x28] sm:$0xff] }
0x1761   :  { %8040 = vmatmul.mubr.msk.f32.vlgmr.msra.gmra.mrb[60].mxu1 %vm265_vm1, %v5031_v39  ;;  %v8287_v39 = vpack.c.bf16 %v7416_v36, %v7415_v35 }
0x1763   :  { %8288 = vmatprep.subr.bf16.mxu1 %v8287_v39 }
0x1764   :  { %8290 = vmatpush3.bf16.msra.mxu1 %v8287_v39 }
0x17eb   :  { %v3928_v40 = vpop.f32.mrb[46].mxu1 }
0x17ec   :  { %v7971_v56 = vpop.f32.mrb[47].mxu1 }
0x17ed   :  { %v7417_v56 = vld [vmem:[%s9984_s30 + $0x30] sm:$0xff] }
0x17ef   :  { %v4094_v43 = vpop.f32.mrb[48].mxu1 }
0x17f0   :  { %4431 = vrot.lane.b32.xlu0 %v4094_v43, %s9992_s3  ;;  %v7981_v44 = vpop.f32.mrb[49].mxu1  ;;  %v7418_v43 = vld [vmem:[%s9984_s30 + $0x38] sm:$0xff] }
0x17f1   :  { %v8291_v44 = vpack.c.bf16 %v7418_v43, %v7417_v56 }
0x17f3   :  { %v4260_v45 = vpop.f32.mrb[50].mxu1  ;;  %8292 = vmatprep.subr.bf16.mxu1 %v8291_v44 }
0x17f4   :  { %4435 = vrot.lane.b32.xlu1 %v4260_v45, %s9980_s23  ;;  %v7991_v41 = vpop.f32.mrb[51].mxu1  ;;  %8294 = vmatpush3.bf16.msra.mxu1 %v8291_v44 }
0x17f5   :  { %8075 = vmatprep.subr.mxu1 %v8720_v0 }
0x17f7   :  { %v4426_v46 = vpop.f32.mrb[52].mxu1 }
0x17f8   :  { %4439 = vrot.lane.b32.xlu1 %v4426_v46, %s9985_s11  ;;  %v8001_v47 = vpop.f32.mrb[53].mxu1 }
0x1828   :  { %v4606_v53 = vpop.f32.mrb[54].mxu1 }
0x1829   :  { %v8011_v9 = vpop.f32.mrb[55].mxu1 }
0x182c   :  { %v4772_v54 = vpop.f32.mrb[56].mxu1 }
0x182d   :  { %5109 = vrot.lane.b32.xlu0 %v4772_v54, %s9992_s3  ;;  %v8021_v55 = vpop.f32.mrb[57].mxu1 }
0x1830   :  { %v4938_v57 = vpop.f32.mrb[58].mxu1 }
0x1831   :  { %5113 = vrot.lane.b32.xlu0 %v4938_v57, %s9980_s23  ;;  %v8031_v58 = vpop.f32.mrb[59].mxu1 }
0x1834   :  { %v5104_v59 = vpop.f32.mrb[60].mxu1 }
0x1835   :  { %5117 = vrot.lane.b32.xlu1 %v5104_v59, %s9985_s11  ;;  %v8041_v60 = vpop.f32.mrb[61].mxu1  ;;  %v7422_v59 = vld [vmem:[#allocation10 + $0x1] ss:$0 sm:$0xff] }
0x1862   :  { %v4432_v61 = vpop.permute.xlu0 %4431 }
0x1863   :  { %v4442_v63 = vsel %vm265_vm1, %v3928_v40, %v4432_v61  ;;  %v8522_v40 = vld [vmem:[#allocation2 + $0x8] sm:$0xff] }
0x1866   :  { %v4436_v62 = vpop.permute.xlu1 %4435 }
0x1867   :  { %v4443_v1 = vsel %vm939_vm2, %v4442_v63, %v4436_v62 }
0x186a   :  { %v4440_v2 = vpop.permute.xlu1 %4439 }
0x186b   :  { %v4444_v3 = vsel %vm941_vm3, %v4443_v1, %v4440_v2  ;;  %v7419_v2 = vld [vmem:[#allocation7 + $0x1] ss:$0 sm:$0xff] }
0x186c   :  { %8050 = vmatprep.mubr.msk.f32.mxu0 %vm183_vm4, %v4444_v3 }
0x189f   :  { %v5110_v4 = vpop.permute.xlu0 %5109 }
0x18a0   :  { %v5120_v6 = vsel %vm265_vm1, %v4606_v53, %v5110_v4 }
0x18a3   :  { %v5114_v5 = vpop.permute.xlu0 %5113 }
0x18a4   :  { %v5121_v7 = vsel %vm939_vm2, %v5120_v6, %v5114_v5 }
0x18a7   :  { %v5118_v27 = vpop.permute.xlu1 %5117 }
0x18a8   :  { %v5122_v8 = vsel %vm941_vm3, %v5121_v7, %v5118_v27 }
0x18a9   :  { %8051 = vmatmul.mubr.msk.f32.vlgmr.msra.gmra.mrb[50].mxu0 %vm183_vm4, %v5122_v8 }
0x18aa   :  { %8072 = vmatprep.mubr.msk.f32.mxu0 %vm183_vm4, %v8521_v10 }
0x197c   :  { %v8052_v13 = vpop.f32.mrb[50].mxu0 }
0x197d   :  { %v5214_v14 = vadd.f32 %v8052_v13, %v7408_v12  ;;  %v5208_v15 = vpop.f32.mrb[51].mxu0 }
0x197e   :  { %v5209_v16 = vadd.f32 %v7408_v12, %v5208_v15 }
0x197f   :  { %v5218_v42 = vadd.f32 %v5214_v14, %v9439_v38 }
0x1980   :  { %v5217_v17 = vadd.f32 %v5209_v16, %v9437_v37  ;;  %v5360_v37 = vld [vmem:[#allocation8 + $0x20] sm:$0xff] }
0x1981   :  { %v5226_v24 = vsel %vm183_vm4, %v5218_v42, 0.0  ;;  %v8295_v32 = vpack.c.bf16 %v5361_v31, %v5360_v37 }
0x1982   :  { %5227 = vadd.xlane.f32.xlu1 %v5226_v24  ;;  %v5223_v22 = vsel %vm183_vm4, %v5217_v17, 0.0 }
0x1983   :  { %5224 = vadd.xlane.f32.xlu0 %v5223_v22  ;;  %8296 = vmatprep.subr.bf16.mxu0 %v8295_v32 }
0x1984   :  { %8298 = vmatpush3.bf16.msra.mxu0 %v8295_v32 }
0x1985   :  { %8300 = vmatprep.subr.bf16.mxu0 %v8299_v29 }
0x1988   :  { %8302 = vmatpush3.bf16.msra.mxu0 %v8299_v29 }
0x1989   :  { %8085 = vmatprep.subr.mxu0 %v8720_v0 }
0x198b   :  { %8073 = vmatmul.mubr.msk.f32.vlgmr.msra.gmra.mrb[52].mxu0 %vm183_vm4, %v8522_v40 }
0x198c   :  { %8087 = vmatprep.mubr.msk.f32.mxu0 %vm8721_vm0, %v8720_v0 }
0x1a0f   :  { %v5228_v18 = vpop.xlane.xlu1 %5227 }
0x1a10   :  { %v5230_v19 = vmul.f32 0.03125, %v5228_v18  ;;  %v5225_v20 = vpop.xlane.xlu0 %5224 }
0x1a11   :  { %v5229_v21 = vmul.f32 0.03125, %v5225_v20 }
0x1a12   :  { %v5232_v23 = vsub.f32 %v5218_v42, %v5230_v19 }
0x1a13   :  { %v5231_v25 = vsub.f32 %v5217_v17, %v5229_v21 }
0x1a14   :  { %v5234_v30 = vmul.f32 %v5232_v23, %v5232_v23 }
0x1a15   :  { %v5233_v26 = vmul.f32 %v5231_v25, %v5231_v25 }
0x1a16   :  { %v5238_v38 = vsel %vm183_vm4, %v5234_v30, 0.0 }
0x1a17   :  { %v5235_v28 = vsel %vm183_vm4, %v5233_v26, 0.0 }
0x1a18   :  { %5236 = vadd.xlane.f32.xlu0 %v5235_v28 }
0x1a1c   :  { %5239 = vadd.xlane.f32.xlu0 %v5238_v38 }
0x1a5e   :  { %v8074_v60 = vpop.f32.mrb[52].mxu0 }
0x1a5f   :  { %v9667_v61 = vadd.f32 %v8074_v60, %v7422_v59  ;;  %v5438_v62 = vpop.f32.mrb[53].mxu0 }
0x1a60   :  { %v9669_v63 = vadd.f32 %v7422_v59, %v5438_v62 }
0x1a62   :  { %5613 = vrot.lane.b32.xlu1 %v9669_v63, %s8725_s26 }
0x1a66   :  { %5779 = vrot.lane.b32.xlu1 %v9669_v63, %s8727_s29 }
0x1aa5   :  { %v5237_v45 = vpop.xlane.xlu0 %5236 }
0x1aa6   :  { %v5241_v41 = vmul.f32 0.03125, %v5237_v45 }
0x1aa8   :  { %v5243_v46 = vadd.f32 1e-05, %v5241_v41 }
0x1aa9   :  { %v5240_v47 = vpop.xlane.xlu0 %5239 }
0x1aaa   :  { %8477 = vrsqrt.f32 %v5243_v46  ;;  %v5242_v48 = vmul.f32 0.03125, %v5240_v47 }
0x1aac   :  { %v5244_v49 = vadd.f32 1e-05, %v5242_v48 }
0x1aae   :  { %8479 = vrsqrt.f32 %v5244_v49 }
0x1ab4   :  { %v8478_v50 = vpop.eup %8477 }
0x1ab5   :  { %v5247_v11 = vmul.f32 %v8478_v50, %v5231_v25 }
0x1ab7   :  { %v5255_v53 = vmul.f32 %v7413_v51, %v5247_v11 }
0x1ab8   :  { %v8480_v9 = vpop.eup %8479 }
0x1ab9   :  { %v5248_v54 = vmul.f32 %v8480_v9, %v5232_v23  ;;  %v9657_v55 = vadd.f32 %v7414_v52, %v5255_v53 }
0x1abb   :  { %v5256_v57 = vmul.f32 %v7413_v51, %v5248_v54  ;;  %8061 = vmatprep.mubr.msk.f32.mxu1 %vm183_vm4, %v9657_v55 }
0x1abd   :  { %v9661_v58 = vadd.f32 %v7414_v52, %v5256_v57 }
0x1abf   :  { %8062 = vmatmul.mubr.msk.f32.vlgmr.msra.gmra.mrb[62].mxu1 %vm183_vm4, %v9661_v58 }
0x1ac0   :  { %8077 = vmatprep.mubr.msk.f32.mxu1 %vm8721_vm0, %v8720_v0  ;;  %8076 = vmatpush3.xpose.msk.msra.mxu1 %vm265_vm1, %v9669_v63 }
0x1ac1   :  { %8080 = vmatprep.subr.mxu1 %v8720_v0 }
0x1ad4   :  { %v5614_v1 = vpop.permute.xlu1 %5613 }
0x1ad5   :  { %8086 = vmatpush3.xpose.msk.msra.mxu0 %vm265_vm1, %v5614_v1 }
0x1ad6   :  { %8095 = vmatprep.subr.mxu0 %v8720_v0 }
0x1ad8   :  { %v5780_v7 = vpop.permute.xlu1 %5779 }
0x1b92   :  { %v8063_v3 = vpop.f32.mrb[62].mxu1 }
0x1b93   :  { %v5350_v4 = vpop.f32.mrb[63].mxu1  ;;  %v5356_v6 = vadd.f32 %v8063_v3, %v7419_v2 }
0x1b94   :  { %v5351_v5 = vadd.f32 %v7419_v2, %v5350_v4 }
0x1b96   :  { %5777 = vrot.lane.b32.xlu1 %v5351_v5, %s8727_s29  ;;  %5611 = vrot.lane.b32.xlu0 %v5351_v5, %s8725_s26 }
0x1b97   :  { %8078 = vmatmul.mubr.msk.f32.vlgmr.msra.gmra.mrb[64].mxu1 %vm265_vm1, %v5351_v5 }
0x1b98   :  { %8082 = vmatprep.mubr.msk.f32.mxu1 %vm8721_vm0, %v8720_v0 }
0x1b9a   :  { %5943 = vrot.lane.b32.xlu1 %v5351_v5, %s8728_s1  ;;  %5945 = vrot.lane.b32.xlu0 %v9669_v63, %s8728_s1 }
0x1b9e   :  { %6288 = vrot.lane.b32.xlu1 %v5356_v6, %s8725_s26  ;;  %6290 = vrot.lane.b32.xlu0 %v9667_v61, %s8725_s26 }
0x1ba2   :  { %6454 = vrot.lane.b32.xlu1 %v5356_v6, %s8727_s29  ;;  %6456 = vrot.lane.b32.xlu0 %v9667_v61, %s8727_s29 }
0x1ba6   :  { %6620 = vrot.lane.b32.xlu1 %v5356_v6, %s8728_s1  ;;  %6622 = vrot.lane.b32.xlu0 %v9667_v61, %s8728_s1 }
0x1baa   :  { %5701 = vrot.lane.b32.xlu1 %v9669_v63, %s8724_s4  ;;  %5535 = vrot.lane.b32.xlu0 %v9669_v63, %s8723_s22 }
0x1c08   :  { %v5778_v27 = vpop.permute.xlu1 %5777  ;;  %v5612_v8 = vpop.permute.xlu0 %5611 }
0x1c09   :  { %8088 = vmatmul.mubr.msk.f32.vlgmr.msra.gmra.mrb[54].mxu0 %vm265_vm1, %v5612_v8 }
0x1c0a   :  { %8096 = vmatpush3.xpose.msk.msra.mxu0 %vm265_vm1, %v5780_v7  ;;  %8097 = vmatprep.mubr.msk.f32.mxu0 %vm8721_vm0, %v8720_v0 }
0x1c0b   :  { %8105 = vmatprep.subr.mxu0 %v8720_v0 }
0x1c0c   :  { %v5946_v10 = vpop.permute.xlu0 %5945  ;;  %v5944_v12 = vpop.permute.xlu1 %5943 }
0x1c0d   :  { %8098 = vmatmul.mubr.msk.f32.vlgmr.msra.gmra.mrb[56].mxu0 %vm265_vm1, %v5778_v27 }
0x1c0e   :  { %8106 = vmatpush3.xpose.msk.msra.mxu0 %vm265_vm1, %v5946_v10  ;;  %8107 = vmatprep.mubr.msk.f32.mxu0 %vm8721_vm0, %v8720_v0 }
0x1c0f   :  { %8115 = vmatprep.subr.mxu0 %v8720_v0 }
0x1c10   :  { %v6291_v13 = vpop.permute.xlu0 %6290  ;;  %v6289_v14 = vpop.permute.xlu1 %6288 }
0x1c11   :  { %8108 = vmatmul.mubr.msk.f32.vlgmr.msra.gmra.mrb[58].mxu0 %vm265_vm1, %v5944_v12 }
0x1c12   :  { %8116 = vmatpush3.xpose.msk.msra.mxu0 %vm265_vm1, %v9667_v61  ;;  %8117 = vmatprep.mubr.msk.f32.mxu0 %vm8721_vm0, %v8720_v0 }
0x1c13   :  { %8125 = vmatprep.subr.mxu0 %v8720_v0 }
0x1c14   :  { %v6457_v15 = vpop.permute.xlu0 %6456  ;;  %v6455_v42 = vpop.permute.xlu1 %6454 }
0x1c15   :  { %8118 = vmatmul.mubr.msk.f32.vlgmr.msra.gmra.mrb[60].mxu0 %vm265_vm1, %v5356_v6 }
0x1c16   :  { %8126 = vmatpush3.xpose.msk.msra.mxu0 %vm265_vm1, %v6291_v13  ;;  %8127 = vmatprep.mubr.msk.f32.mxu0 %vm8721_vm0, %v8720_v0 }
0x1c17   :  { %8135 = vmatprep.subr.mxu0 %v8720_v0 }
0x1c18   :  { %v6623_v16 = vpop.permute.xlu0 %6622  ;;  %v6621_v24 = vpop.permute.xlu1 %6620 }
0x1c19   :  { %8128 = vmatmul.mubr.msk.f32.vlgmr.msra.gmra.mrb[62].mxu0 %vm265_vm1, %v6289_v14 }
0x1c1a   :  { %8136 = vmatpush3.xpose.msk.msra.mxu0 %vm265_vm1, %v6457_v15  ;;  %8137 = vmatprep.mubr.msk.f32.mxu0 %vm8721_vm0, %v8720_v0 }
0x1c1b   :  { %8145 = vmatprep.subr.mxu0 %v8720_v0 }
0x1c1c   :  { %v5536_v17 = vpop.permute.xlu0 %5535  ;;  %v5702_v57 = vpop.permute.xlu1 %5701 }
0x1c1d   :  { %8081 = vmatpush3.msra.mxu1 %v5536_v17  ;;  %8138 = vmatmul.mubr.msk.f32.vlgmr.msra.gmra.mrb[64].mxu0 %vm265_vm1, %v6455_v42 }
0x1c1e   :  { %8146 = vmatpush3.xpose.msk.msra.mxu0 %vm265_vm1, %v6623_v16  ;;  %8147 = vmatprep.mubr.msk.f32.mxu0 %vm8721_vm0, %v8720_v0 }
0x1c1f   :  { %8090 = vmatprep.subr.mxu1 %v8720_v0 }
0x1c21   :  { %8148 = vmatmul.mubr.msk.f32.vlgmr.msra.gmra.mrb[66].mxu0 %vm265_vm1, %v6621_v24 }
0x1c6a   :  { %v5519_v22 = vpop.f32.mrb[64].mxu1 }
0x1c6b   :  { %v5523_v18 = vmul.f32 0.35355338, %v5519_v22  ;;  %v8079_v19 = vpop.f32.mrb[65].mxu1 }
0x1c6d   :  { %v5524_v20 = vsel %vm265_vm1, %v5523_v18, -inf }
0x1c6e   :  { %5525 = vmax.xlane.f32.xlu0 %v5524_v20 }
0x1cdc   :  { %v5685_v21 = vpop.f32.mrb[54].mxu0 }
0x1cdd   :  { %v5689_v23 = vmul.f32 0.35355338, %v5685_v21  ;;  %v8089_v25 = vpop.f32.mrb[55].mxu0 }
0x1cdf   :  { %v5690_v26 = vsel %vm265_vm1, %v5689_v23, -inf }
0x1ce0   :  { %5691 = vmax.xlane.f32.xlu1 %v5690_v26  ;;  %v5851_v28 = vpop.f32.mrb[56].mxu0 }
0x1ce1   :  { %v5855_v30 = vmul.f32 0.35355338, %v5851_v28  ;;  %v8099_v38 = vpop.f32.mrb[57].mxu0 }
0x1ce3   :  { %v5856_v37 = vsel %vm265_vm1, %v5855_v30, -inf }
0x1ce4   :  { %v6017_v31 = vpop.f32.mrb[58].mxu0  ;;  %5857 = vmax.xlane.f32.xlu0 %v5856_v37 }
0x1ce5   :  { %v6021_v32 = vmul.f32 0.35355338, %v6017_v31  ;;  %v8109_v33 = vpop.f32.mrb[59].mxu0 }
0x1ce7   :  { %v6022_v34 = vsel %vm265_vm1, %v6021_v32, -inf }
0x1ce8   :  { %v6196_v29 = vpop.f32.mrb[60].mxu0  ;;  %6023 = vmax.xlane.f32.xlu0 %v6022_v34 }
0x1ce9   :  { %v6200_v35 = vmul.f32 0.35355338, %v6196_v29  ;;  %v8119_v36 = vpop.f32.mrb[61].mxu0 }
0x1ceb   :  { %v6201_v39 = vsel %vm265_vm1, %v6200_v35, -inf }
0x1cec   :  { %6202 = vmax.xlane.f32.xlu1 %v6201_v39  ;;  %v6362_v40 = vpop.f32.mrb[62].mxu0 }
0x1ced   :  { %v6366_v56 = vmul.f32 0.35355338, %v6362_v40  ;;  %v8129_v43 = vpop.f32.mrb[63].mxu0 }
0x1cef   :  { %v6367_v44 = vsel %vm265_vm1, %v6366_v56, -inf }
0x1cf0   :  { %v6528_v45 = vpop.f32.mrb[64].mxu0  ;;  %6368 = vmax.xlane.f32.xlu0 %v6367_v44 }
0x1cf1   :  { %v6532_v41 = vmul.f32 0.35355338, %v6528_v45  ;;  %v8139_v46 = vpop.f32.mrb[65].mxu0 }
0x1cf3   :  { %v6533_v47 = vsel %vm265_vm1, %v6532_v41, -inf }
0x1cf4   :  { %6534 = vmax.xlane.f32.xlu1 %v6533_v47  ;;  %v6694_v48 = vpop.f32.mrb[66].mxu0 }
0x1cf5   :  { %v6698_v49 = vmul.f32 0.35355338, %v6694_v48  ;;  %v8149_v50 = vpop.f32.mrb[67].mxu0 }
0x1cf7   :  { %v6699_v51 = vsel %vm265_vm1, %v6698_v49, -inf }
0x1cf8   :  { %6700 = vmax.xlane.f32.xlu0 %v6699_v51 }
0x1cfb   :  { %v5526_v11 = vpop.xlane.xlu0 %5525 }
0x1cfc   :  { %v5527_v52 = vsub.f32 %v5523_v18, %v5526_v11 }
0x1cfe   :  { %v5528_v53 = vmul.f32 1.442695, %v5527_v52 }
0x1d00   :  { %8481 = vpow2.f32 %v5528_v53 }
0x1d05   :  { %6033 = vrot.lane.b32.xlu1 %v9669_v63, %s9987_s21 }
0x1d0a   :  { %v8482_v9 = vpop.eup %8481 }
0x1d0b   :  { %v5530_v54 = vsel %vm265_vm1, %v8482_v9, 0.0 }
0x1d0e   :  { %5867 = vrot.lane.b32.xlu0 %v9669_v63, %s9986_s28 }
0x1d29   :  { %5531 = vadd.xlane.f32.xlu1 %v5530_v54 }
0x1d6d   :  { %v5692_v59 = vpop.xlane.xlu1 %5691 }
0x1d6e   :  { %v5693_v60 = vsub.f32 %v5689_v23, %v5692_v59 }
0x1d70   :  { %v5694_v62 = vmul.f32 1.442695, %v5693_v60 }
0x1d71   :  { %v5858_v1 = vpop.xlane.xlu0 %5857 }
0x1d72   :  { %8483 = vpow2.f32 %v5694_v62  ;;  %v5859_v2 = vsub.f32 %v5855_v30, %v5858_v1 }
0x1d74   :  { %v5860_v3 = vmul.f32 1.442695, %v5859_v2 }
0x1d75   :  { %v6024_v4 = vpop.xlane.xlu0 %6023 }
0x1d76   :  { %8485 = vpow2.f32 %v5860_v3  ;;  %v6025_v5 = vsub.f32 %v6021_v32, %v6024_v4 }
0x1d78   :  { %v6026_v63 = vmul.f32 1.442695, %v6025_v5 }
0x1d79   :  { %v6203_v13 = vpop.xlane.xlu1 %6202 }
0x1d7a   :  { %8487 = vpow2.f32 %v6026_v63  ;;  %v6204_v14 = vsub.f32 %v6200_v35, %v6203_v13  ;;  %v6805_v13 = vld [vmem:[#allocation11 + $0x38] sm:$0xff] }
0x1d7c   :  { %v8484_v6 = vpop.eup %8483  ;;  %v6205_v17 = vmul.f32 1.442695, %v6204_v14 }
0x1d7d   :  { %v5696_v7 = vsel %vm265_vm1, %v8484_v6, 0.0  ;;  %v6369_v15 = vpop.xlane.xlu0 %6368 }
0x1d7e   :  { %5697 = vadd.xlane.f32.xlu0 %v5696_v7  ;;  %v6370_v42 = vsub.f32 %v6366_v56, %v6369_v15  ;;  %8489 = vpow2.f32 %v6205_v17 }
0x1d80   :  { %v8486_v27 = vpop.eup %8485  ;;  %v6371_v18 = vmul.f32 1.442695, %v6370_v42 }
0x1d81   :  { %v5862_v8 = vsel %vm265_vm1, %v8486_v27, 0.0  ;;  %v6535_v16 = vpop.xlane.xlu1 %6534 }
0x1d82   :  { %5863 = vadd.xlane.f32.xlu1 %v5862_v8  ;;  %v6536_v24 = vsub.f32 %v6532_v41, %v6535_v16  ;;  %8491 = vpow2.f32 %v6371_v18  ;;  %v6802_v8 = vld [vmem:[#allocation11 + $0x20] sm:$0xff] }
0x1d84   :  { %v9748_v10 = vpop.eup %8487  ;;  %v6537_v19 = vmul.f32 1.442695, %v6536_v24 }
0x1d85   :  { %v6028_v12 = vsel %vm265_vm1, %v9748_v10, 0.0  ;;  %v6701_v22 = vpop.xlane.xlu0 %6700  ;;  %v6034_v23 = vpop.permute.xlu1 %6033 }
0x1d86   :  { %6029 = vadd.xlane.f32.xlu0 %v6028_v12  ;;  %v6702_v20 = vsub.f32 %v6698_v49, %v6701_v22  ;;  %8493 = vpow2.f32 %v6537_v19  ;;  %v6804_v12 = vld [vmem:[#allocation11 + $0x30] sm:$0xff] }
0x1d87   :  { %v8307_v14 = vpack.c.bf16 %v6805_v13, %v6804_v12  ;;  %v7455_v12 = vld [vmem:[%s9929_s17 + $0x1] ss:$0 sm:$0xff] }
0x1d88   :  { %v6703_v21 = vmul.f32 1.442695, %v6702_v20  ;;  %v8490_v25 = vpop.eup %8489 }
0x1d89   :  { %v6207_v30 = vsel %vm265_vm1, %v8490_v25, 0.0  ;;  %v5868_v35 = vpop.permute.xlu0 %5867 }
0x1d8a   :  { %8495 = vpow2.f32 %v6703_v21 }
0x1d8c   :  { %v9756_v26 = vpop.eup %8491 }
0x1d8d   :  { %v6373_v31 = vsel %vm265_vm1, %v9756_v26, 0.0 }
0x1d90   :  { %v9759_v38 = vpop.eup %8493 }
0x1d91   :  { %v6539_v37 = vsel %vm265_vm1, %v9759_v38, 0.0 }
0x1d93   :  { %6378 = vrot.lane.b32.xlu1 %v9667_v61, %s8724_s4 }
0x1d94   :  { %v9765_v32 = vpop.eup %8495 }
0x1d95   :  { %v6705_v33 = vsel %vm265_vm1, %v9765_v32, 0.0 }
0x1d9c   :  { %6212 = vrot.lane.b32.xlu0 %v9667_v61, %s8723_s22 }
0x1db6   :  { %v5532_v28 = vpop.xlane.xlu1 %5531 }
0x1db7   :  { %8497 = vrcp.f32 %v5532_v28  ;;  %6208 = vadd.xlane.f32.xlu1 %v6207_v30 }
0x1dbb   :  { %6540 = vadd.xlane.f32.xlu1 %v6539_v37  ;;  %6374 = vadd.xlane.f32.xlu0 %v6373_v31 }
0x1dbf   :  { %6706 = vadd.xlane.f32.xlu1 %v6705_v33 }
0x1dc1   :  { %v8498_v34 = vpop.eup %8497 }
0x1dc2   :  { %v5534_v29 = vmul.f32 %v8498_v34, %v8482_v9  ;;  %v7450_v34 = vld [vmem:[%s9922_s10 + $0x1] ss:$0 sm:$0xff] }
0x1dc4   :  { %8083 = vmatmul.mubr.msk.f32.vlgmr.msra.gmra.mrb[66].mxu1 %vm265_vm1, %v5534_v29 }
0x1dc5   :  { %8091 = vmatpush3.msra.mxu1 %v5702_v57  ;;  %8092 = vmatprep.mubr.msk.f32.mxu1 %vm8721_vm0, %v8720_v0 }
0x1dc6   :  { %8100 = vmatprep.subr.mxu1 %v8720_v0 }
0x1dd0   :  { %6710 = vrot.lane.b32.xlu1 %v9667_v61, %s9987_s21 }
0x1dd1   :  { %6544 = vrot.lane.b32.xlu0 %v9667_v61, %s9986_s28 }
0x1e0b   :  { %v5698_v36 = vpop.xlane.xlu0 %5697 }
0x1e0c   :  { %8499 = vrcp.f32 %v5698_v36 }
0x1e0f   :  { %v5864_v39 = vpop.xlane.xlu1 %5863 }
0x1e10   :  { %8501 = vrcp.f32 %v5864_v39 }
0x1e13   :  { %v6030_v40 = vpop.xlane.xlu0 %6029  ;;  %v6379_v47 = vpop.permute.xlu1 %6378 }
0x1e14   :  { %8503 = vrcp.f32 %v6030_v40 }
0x1e16   :  { %v8500_v56 = vpop.eup %8499 }
0x1e17   :  { %v5700_v43 = vmul.f32 %v8500_v56, %v8484_v6  ;;  %v6213_v46 = vpop.permute.xlu0 %6212 }
0x1e19   :  { %8093 = vmatmul.mubr.msk.f32.vlgmr.msra.gmra.mrb[68].mxu1 %vm265_vm1, %v5700_v43 }
0x1e1a   :  { %v8502_v44 = vpop.eup %8501  ;;  %8101 = vmatpush3.msra.mxu1 %v5868_v35  ;;  %8102 = vmatprep.mubr.msk.f32.mxu1 %vm8721_vm0, %v8720_v0 }
0x1e1b   :  { %v5866_v45 = vmul.f32 %v8502_v44, %v8486_v27  ;;  %8110 = vmatprep.subr.mxu1 %v8720_v0 }
0x1e1d   :  { %8103 = vmatmul.mubr.msk.f32.vlgmr.msra.gmra.mrb[70].mxu1 %vm265_vm1, %v5866_v45 }
0x1e1e   :  { %v8504_v61 = vpop.eup %8503  ;;  %8111 = vmatpush3.msra.mxu1 %v6034_v23  ;;  %8112 = vmatprep.mubr.msk.f32.mxu1 %vm8721_vm0, %v8720_v0 }
0x1e1f   :  { %v6032_v41 = vmul.f32 %v8504_v61, %v9748_v10  ;;  %8120 = vmatprep.subr.mxu1 %v8720_v0 }
0x1e21   :  { %8113 = vmatmul.mubr.msk.f32.vlgmr.msra.gmra.mrb[72].mxu1 %vm265_vm1, %v6032_v41 }
0x1e22   :  { %8121 = vmatpush3.msra.mxu1 %v6213_v46  ;;  %8122 = vmatprep.mubr.msk.f32.mxu1 %vm8721_vm0, %v8720_v0 }
0x1e23   :  { %8130 = vmatprep.subr.mxu1 %v8720_v0 }
0x1e44   :  { %v6209_v48 = vpop.xlane.xlu1 %6208 }
0x1e45   :  { %8505 = vrcp.f32 %v6209_v48 }
0x1e48   :  { %v6541_v49 = vpop.xlane.xlu1 %6540  ;;  %v6375_v50 = vpop.xlane.xlu0 %6374 }
0x1e49   :  { %8507 = vrcp.f32 %v6375_v50 }
0x1e4a   :  { %8509 = vrcp.f32 %v6541_v49 }
0x1e4c   :  { %v6707_v51 = vpop.xlane.xlu1 %6706  ;;  %v6545_v57 = vpop.permute.xlu0 %6544 }
0x1e4d   :  { %8511 = vrcp.f32 %v6707_v51 }
0x1e4f   :  { %v8506_v11 = vpop.eup %8505 }
0x1e50   :  { %v6211_v52 = vmul.f32 %v8506_v11, %v8490_v25  ;;  %v6711_v62 = vpop.permute.xlu1 %6710  ;;  %v6945_v11 = vld [vmem:[#allocation13 + $0x28] sm:$0xff] }
0x1e52   :  { %8123 = vmatmul.mubr.msk.f32.vlgmr.msra.gmra.mrb[74].mxu1 %vm265_vm1, %v6211_v52 }
0x1e53   :  { %8131 = vmatpush3.msra.mxu1 %v6379_v47  ;;  %8132 = vmatprep.mubr.msk.f32.mxu1 %vm8721_vm0, %v8720_v0  ;;  %v8508_v53 = vpop.eup %8507 }
0x1e54   :  { %8140 = vmatprep.subr.mxu1 %v8720_v0  ;;  %v6377_v9 = vmul.f32 %v8508_v53, %v9756_v26  ;;  %v8510_v54 = vpop.eup %8509  ;;  %v6946_v53 = vld [vmem:[#allocation13 + $0x30] sm:$0xff] }
0x1e55   :  { %v6543_v59 = vmul.f32 %v8510_v54, %v9759_v38 }
0x1e56   :  { %8133 = vmatmul.mubr.msk.f32.vlgmr.msra.gmra.mrb[76].mxu1 %vm265_vm1, %v6377_v9  ;;  %v6947_v9 = vld [vmem:[#allocation13 + $0x38] sm:$0xff] }
0x1e57   :  { %8141 = vmatpush3.msra.mxu1 %v6545_v57  ;;  %8142 = vmatprep.mubr.msk.f32.mxu1 %vm8721_vm0, %v8720_v0  ;;  %v8512_v60 = vpop.eup %8511  ;;  %v8315_v54 = vpack.c.bf16 %v6947_v9, %v6946_v53  ;;  %v7461_v57 = vld [vmem:[%s9925_s13 + $0x40] sm:$0xff] }
0x1e58   :  { %8150 = vmatprep.subr.mxu1 %v8720_v0  ;;  %v6709_v1 = vmul.f32 %v8512_v60, %v9765_v32  ;;  %v7463_v60 = vld [vmem:[%s9925_s13 + $0x50] sm:$0xff] }
0x1e5a   :  { %8143 = vmatmul.mubr.msk.f32.vlgmr.msra.gmra.mrb[78].mxu1 %vm265_vm1, %v6543_v59  ;;  %v7462_v59 = vld [vmem:[%s9925_s13 + $0x48] sm:$0xff] }
0x1e5b   :  { %8151 = vmatpush3.msra.mxu1 %v6711_v62  ;;  %8152 = vmatprep.mubr.msk.f32.mxu1 %vm8721_vm0, %v8720_v0  ;;  %v6803_v0 = vld [vmem:[#allocation11 + $0x28] sm:$0xff]  ;;  %v8319_v62 = vpack.c.bf16 %v7462_v59, %v7461_v57 }
0x1e5c   :  { %v8303_v10 = vpack.c.bf16 %v6803_v0, %v6802_v8 }
0x1e5e   :  { %8153 = vmatmul.mubr.msk.f32.vlgmr.msra.gmra.mrb[80].mxu1 %vm265_vm1, %v6709_v1  ;;  %8304 = vmatprep.subr.bf16.mxu0 %v8303_v10  ;;  %v7464_v1 = vld [vmem:[%s9925_s13 + $0x58] sm:$0xff] }
0x1e5f   :  { %8306 = vmatpush3.bf16.msra.mxu0 %v8303_v10 }
0x1e60   :  { %8308 = vmatprep.subr.bf16.mxu0 %v8307_v14 }
0x1e63   :  { %8310 = vmatpush3.bf16.msra.mxu0 %v8307_v14  ;;  %v7456_v14 = vld [vmem:[%s9930_s18 + $0x1] ss:$0 sm:$0xff] }
0x1e64   :  { %8320 = vmatprep.subr.bf16.mxu0 %v8319_v62 }
0x1e97   :  { %v5607_v2 = vpop.f32.mrb[66].mxu1 }
0x1e98   :  { %v8084_v3 = vpop.f32.mrb[67].mxu1 }
0x1e99   :  { %v7465_v3 = vld [vmem:[%s9925_s13 + $0x60] sm:$0xff] }
0x1eec   :  { %v5773_v4 = vpop.f32.mrb[68].mxu1 }
0x1eed   :  { %6110 = vrot.lane.b32.xlu0 %v5773_v4, %s9992_s3  ;;  %v8094_v5 = vpop.f32.mrb[69].mxu1  ;;  %v7466_v4 = vld [vmem:[%s9925_s13 + $0x68] sm:$0xff] }
0x1eee   :  { %v8327_v5 = vpack.c.bf16 %v7466_v4, %v7465_v3  ;;  %v7476_v4 = vld [vmem:[%s9932_s20 + $0x1] ss:$0 sm:$0xff] }
0x1ef0   :  { %v5939_v63 = vpop.f32.mrb[70].mxu1 }
0x1ef1   :  { %6114 = vrot.lane.b32.xlu1 %v5939_v63, %s9980_s23  ;;  %v8104_v6 = vpop.f32.mrb[71].mxu1 }
0x1ef4   :  { %v6105_v7 = vpop.f32.mrb[72].mxu1 }
0x1ef5   :  { %6118 = vrot.lane.b32.xlu1 %v6105_v7, %s9985_s11  ;;  %v8114_v27 = vpop.f32.mrb[73].mxu1 }
0x1f25   :  { %v6284_v15 = vpop.f32.mrb[74].mxu1 }
0x1f26   :  { %v8124_v16 = vpop.f32.mrb[75].mxu1 }
0x1f29   :  { %v6450_v42 = vpop.f32.mrb[76].mxu1 }
0x1f2a   :  { %6787 = vrot.lane.b32.xlu0 %v6450_v42, %s9992_s3  ;;  %v8134_v17 = vpop.f32.mrb[77].mxu1 }
0x1f2d   :  { %v6616_v24 = vpop.f32.mrb[78].mxu1 }
0x1f2e   :  { %6791 = vrot.lane.b32.xlu0 %v6616_v24, %s9980_s23  ;;  %v8144_v22 = vpop.f32.mrb[79].mxu1 }
0x1f31   :  { %v6782_v18 = vpop.f32.mrb[80].mxu1 }
0x1f32   :  { %6795 = vrot.lane.b32.xlu1 %v6782_v18, %s9985_s11  ;;  %v8154_v19 = vpop.f32.mrb[81].mxu1  ;;  %v7467_v18 = vld [vmem:[%s9925_s13 + $0x70] sm:$0xff] }
0x1f33   :  { %v7468_v19 = vld [vmem:[%s9925_s13 + $0x78] sm:$0xff] }
0x1f5f   :  { %v6111_v20 = vpop.permute.xlu0 %6110 }
0x1f60   :  { %v6121_v23 = vsel %vm265_vm1, %v5607_v2, %v6111_v20  ;;  %v8323_v2 = vpack.c.bf16 %v7464_v1, %v7463_v60  ;;  %v8331_v20 = vpack.c.bf16 %v7468_v19, %v7467_v18 }
0x1f63   :  { %v6115_v21 = vpop.permute.xlu1 %6114 }
0x1f64   :  { %v6122_v25 = vsel %vm939_vm2, %v6121_v23, %v6115_v21  ;;  %v7458_v21 = vld [vmem:[%s9924_s12 + $0x1] ss:$0 sm:$0xff] }
0x1f67   :  { %v6119_v26 = vpop.permute.xlu1 %6118 }
0x1f68   :  { %v6123_v28 = vsel %vm941_vm3, %v6122_v25, %v6119_v26 }
0x1f69   :  { %8163 = vmatprep.mubr.msk.f32.mxu0 %vm183_vm4, %v6123_v28 }
0x1f9c   :  { %v6788_v30 = vpop.permute.xlu0 %6787 }
0x1f9d   :  { %v6798_v37 = vsel %vm265_vm1, %v6284_v15, %v6788_v30 }
0x1fa0   :  { %v6792_v38 = vpop.permute.xlu0 %6791 }
0x1fa1   :  { %v6799_v31 = vsel %vm939_vm2, %v6798_v37, %v6792_v38  ;;  %v7470_v37 = vld [vmem:[%s9926_s14 + $0x1] ss:$0 sm:$0xff]  ;;  %s9993_s14 = sld [smem:[#allocation28_spill]] }
0x1fa4   :  { %v6796_v32 = vpop.permute.xlu1 %6795 }
0x1fa5   :  { %v6800_v33 = vsel %vm941_vm3, %v6799_v31, %v6796_v32 }
0x1fa6   :  { %8164 = vmatmul.mubr.msk.f32.vlgmr.msra.gmra.mrb[68].mxu0 %vm183_vm4, %v6800_v33 }
0x1fa7   :  { %8322 = vmatpush3.bf16.msra.mxu0 %v8319_v62  ;;  %v7475_v62 = vld [vmem:[%s9931_s19 + $0x1] ss:$0 sm:$0xff]  ;;  %s8734_s19 = smov [#allocation14]  }
0x1fa8   :  { %8324 = vmatprep.subr.bf16.mxu0 %v8323_v2  ;;  %s7284_s27 = sshll.u32 %s8734_s19, 4  ;;  %s7285_s27 = int_to_ptr.vmem [resolvable:$true] %s7284_s27 }
0x1fa9   :  { %s8677_s20 = scalar_lea.vmem %s7285_s27, 256  ;;  %p8682_p1 = scmp.lt.s32.totalorder %s7285_s27, %s7285_s27 }
0x1faa   :  { %p8678_p0 = scmp.ne.s32.totalorder %s7285_s27, %s8677_s20  ;;  %p8683_p2 = scmp.lt.s32.totalorder %s8677_s20, %s8677_s20 }
0x1fab   :  { %8326 = vmatpush3.bf16.msra.mxu0 %v8323_v2 }
0x1fac   :  { %8328 = vmatprep.subr.bf16.mxu0 %v8327_v5  ;;  %p8684_p3 = por %p8683_p2, %p8682_p1 }
0x1fae   :  { %p8685_p4 = pnand %p8684_p3, %p8678_p0 }
0x1faf   :  { %8330 = vmatpush3.bf16.msra.mxu0 %v8327_v5 }
0x1fb0   :  { %8332 = vmatprep.subr.bf16.mxu0 %v8331_v20 }
0x1fb3   :  { %8334 = vmatpush3.bf16.msra.mxu0 %v8331_v20 }
0x2079   :  { %v8165_v29 = vpop.f32.mrb[68].mxu0 }
0x207a   :  { %v6892_v35 = vadd.f32 %v8165_v29, %v7450_v34  ;;  %v6886_v36 = vpop.f32.mrb[69].mxu0 }
0x207b   :  { %v6887_v39 = vadd.f32 %v7450_v34, %v6886_v36 }
0x207c   :  { %v6896_v40 = vadd.f32 %v6892_v35, %v9661_v58 }
0x207d   :  { %v6895_v56 = vadd.f32 %v6887_v39, %v9657_v55  ;;  %v6944_v55 = vld [vmem:[#allocation13 + $0x20] sm:$0xff] }
0x207e   :  { %v6904_v43 = vsel %vm183_vm4, %v6896_v40, 0.0  ;;  %v8311_v52 = vpack.c.bf16 %v6945_v11, %v6944_v55  ;;  %v7188_v55 = vld [vmem:[%s9993_s14 + $0x18] sm:$0xff] }
0x207f   :  { %6905 = vadd.xlane.f32.xlu1 %v6904_v43  ;;  %v6901_v44 = vsel %vm183_vm4, %v6895_v56, 0.0 }
0x2080   :  { %6902 = vadd.xlane.f32.xlu0 %v6901_v44  ;;  %8312 = vmatprep.subr.bf16.mxu1 %v8311_v52 }
0x2081   :  { %8314 = vmatpush3.bf16.msra.mxu1 %v8311_v52 }
0x2082   :  { %8316 = vmatprep.subr.bf16.mxu1 %v8315_v54 }
0x2085   :  { %8318 = vmatpush3.bf16.msra.mxu1 %v8315_v54 }
0x210c   :  { %v6906_v45 = vpop.xlane.xlu1 %6905 }
0x210d   :  { %v6908_v61 = vmul.f32 0.03125, %v6906_v45  ;;  %v6903_v41 = vpop.xlane.xlu0 %6902 }
0x210e   :  { %v6907_v46 = vmul.f32 0.03125, %v6903_v41 }
0x210f   :  { %v6910_v47 = vsub.f32 %v6896_v40, %v6908_v61 }
0x2110   :  { %v6909_v48 = vsub.f32 %v6895_v56, %v6907_v46 }
0x2111   :  { %v6912_v51 = vmul.f32 %v6910_v47, %v6910_v47 }
0x2112   :  { %v6911_v49 = vmul.f32 %v6909_v48, %v6909_v48 }
0x2113   :  { %v6916_v58 = vsel %vm183_vm4, %v6912_v51, 0.0 }
0x2114   :  { %v6913_v50 = vsel %vm183_vm4, %v6911_v49, 0.0  ;;  %v7185_v49 = vld [vmem:[%s9993_s14] sm:$0xff] }
0x2115   :  { %6914 = vadd.xlane.f32.xlu0 %v6913_v50  ;;  %v7186_v50 = vld [vmem:[%s9993_s14 + $0x8] sm:$0xff] }
0x2116   :  { %v8335_v51 = vpack.c.bf16 %v7186_v50, %v7185_v49 }
0x2118   :  { %8336 = vmatprep.subr.bf16.mxu1 %v8335_v51 }
0x2119   :  { %6917 = vadd.xlane.f32.xlu0 %v6916_v58  ;;  %v7187_v58 = vld [vmem:[%s9993_s14 + $0x10] sm:$0xff] }
0x211a   :  { %v8339_v11 = vpack.c.bf16 %v7188_v55, %v7187_v58 }
0x21a2   :  { %v6915_v63 = vpop.xlane.xlu0 %6914 }
0x21a3   :  { %v6919_v6 = vmul.f32 0.03125, %v6915_v63 }
0x21a5   :  { %v6921_v7 = vadd.f32 1e-05, %v6919_v6 }
0x21a6   :  { %v6918_v27 = vpop.xlane.xlu0 %6917 }
0x21a7   :  { %8513 = vrsqrt.f32 %v6921_v7  ;;  %v6920_v8 = vmul.f32 0.03125, %v6918_v27  ;;  %v7477_v27 = vld [vmem:[%s9994_s8] ss:$0 sm:$0xff] }
0x21a9   :  { %v6922_v0 = vadd.f32 1e-05, %v6920_v8 }
0x21ab   :  { %8515 = vrsqrt.f32 %v6922_v0 }
0x21b1   :  { %v8514_v10 = vpop.eup %8513 }
0x21b2   :  { %v6925_v13 = vmul.f32 %v8514_v10, %v6909_v48 }
0x21b4   :  { %v6933_v15 = vmul.f32 %v7455_v12, %v6925_v13 }
0x21b5   :  { %v8516_v16 = vpop.eup %8515 }
0x21b6   :  { %v6926_v42 = vmul.f32 %v8516_v16, %v6910_v47  ;;  %v6941_v17 = vadd.f32 %v7456_v14, %v6933_v15 }
0x21b8   :  { %v6934_v24 = vmul.f32 %v7455_v12, %v6926_v42  ;;  %8174 = vmatprep.mubr.msk.f32.mxu1 %vm183_vm4, %v6941_v17 }
0x21ba   :  { %v6942_v22 = vadd.f32 %v7456_v14, %v6934_v24 }
0x21bc   :  { %8175 = vmatmul.mubr.msk.f32.vlgmr.msra.gmra.mrb[82].mxu1 %vm183_vm4, %v6942_v22 }
0x21bd   :  { %8338 = vmatpush3.bf16.msra.mxu1 %v8335_v51 }
0x21be   :  { %8340 = vmatprep.subr.bf16.mxu1 %v8339_v11 }
0x21c1   :  { %8342 = vmatpush3.bf16.msra.mxu1 %v8339_v11 }
0x228f   :  { %v8176_v23 = vpop.f32.mrb[82].mxu1 }
0x2290   :  { %v7034_v25 = vadd.f32 %v8176_v23, %v7458_v21  ;;  %v7028_v26 = vpop.f32.mrb[83].mxu1 }
0x2291   :  { %v7029_v28 = vadd.f32 %v7458_v21, %v7028_v26 }
0x2292   :  { %v7038_v38 = vmax.f32 %v7034_v25, 0.0 }
0x2293   :  { %v7037_v30 = vmax.f32 %v7029_v28, 0.0 }
0x2295   :  { %8193 = vmatprep.mubr.msk.f32.mxu0 %vm3545_vm5, %v7037_v30 }
0x2296   :  { %8194 = vmatmul.mubr.msk.f32.vlgmr.msra.gmra.mrb[70].mxu0 %vm3545_vm5, %v7038_v38 }
0x2369   :  { %v8195_v31 = vpop.f32.mrb[70].mxu0 }
0x236a   :  { %v7134_v32 = vadd.f32 %v8195_v31, %v7470_v37  ;;  %v7128_v33 = vpop.f32.mrb[71].mxu0 }
0x236b   :  { %v7129_v34 = vadd.f32 %v7470_v37, %v7128_v33 }
0x236c   :  { %v7138_v29 = vadd.f32 %v7134_v32, %v6942_v22 }
0x236d   :  { %v7137_v35 = vadd.f32 %v7129_v34, %v6941_v17 }
0x236e   :  { %v7146_v36 = vsel %vm183_vm4, %v7138_v29, 0.0 }
0x236f   :  { %7147 = vadd.xlane.f32.xlu0 %v7146_v36  ;;  %v7143_v39 = vsel %vm183_vm4, %v7137_v35, 0.0 }
0x2370   :  { %7144 = vadd.xlane.f32.xlu1 %v7143_v39 }
0x23fc   :  { %v7148_v40 = vpop.xlane.xlu0 %7147 }
0x23fd   :  { %v7150_v56 = vmul.f32 0.03125, %v7148_v40  ;;  %v7145_v43 = vpop.xlane.xlu1 %7144 }
0x23fe   :  { %v7149_v44 = vmul.f32 0.03125, %v7145_v43 }
0x23ff   :  { %v7152_v45 = vsub.f32 %v7138_v29, %v7150_v56 }
0x2400   :  { %v7151_v61 = vsub.f32 %v7137_v35, %v7149_v44 }
0x2401   :  { %v7154_v41 = vmul.f32 %v7152_v45, %v7152_v45 }
0x2402   :  { %v7153_v46 = vmul.f32 %v7151_v61, %v7151_v61 }
0x2403   :  { %v7158_v47 = vsel %vm183_vm4, %v7154_v41, 0.0 }
0x2404   :  { %7159 = vadd.xlane.f32.xlu0 %v7158_v47  ;;  %v7155_v48 = vsel %vm183_vm4, %v7153_v46, 0.0 }
0x2405   :  { %7156 = vadd.xlane.f32.xlu1 %v7155_v48 }
0x2491   :  { %v7160_v52 = vpop.xlane.xlu0 %7159 }
0x2492   :  { %v7162_v53 = vmul.f32 0.03125, %v7160_v52  ;;  %v7157_v9 = vpop.xlane.xlu1 %7156 }
0x2493   :  { %v7161_v54 = vmul.f32 0.03125, %v7157_v9 }
0x2494   :  { %v7164_v57 = vadd.f32 1e-05, %v7162_v53 }
0x2495   :  { %v7163_v59 = vadd.f32 1e-05, %v7161_v54 }
0x2496   :  { %8517 = vrsqrt.f32 %v7164_v57 }
0x2497   :  { %8519 = vrsqrt.f32 %v7163_v59 }
0x24a0   :  { %v8518_v60 = vpop.eup %8517 }
0x24a1   :  { %v8520_v1 = vpop.eup %8519  ;;  %v7168_v2 = vmul.f32 %v8518_v60, %v7152_v45 }
0x24a2   :  { %v7167_v3 = vmul.f32 %v8520_v1, %v7151_v61 }
0x24a3   :  { %v7176_v5 = vmul.f32 %v7475_v62, %v7168_v2 }
0x24a4   :  { %v7175_v63 = vmul.f32 %v7475_v62, %v7167_v3 }
0x24a5   :  { %v7184_v7 = vadd.f32 %v7476_v4, %v7176_v5 }
0x24a6   :  { %v7183_v6 = vadd.f32 %v7476_v4, %v7175_v63 }
0x24a8   :  { %8204 = vmatprep.mubr.msk.f32.mxu1 %vm183_vm4, %v7183_v6 }
0x24a9   :  { %8205 = vmatmul.mubr.msk.f32.vlgmr.msra.gmra.mrb[84].mxu1 %vm183_vm4, %v7184_v7 }
0x257c   :  { %v8206_v8 = vpop.f32.mrb[84].mxu1 }
0x257d   :  { %v7274_v0 = vadd.f32 %v8206_v8, %v7477_v27  ;;  %v7268_v10 = vpop.f32.mrb[85].mxu1 }
0x257e   :  { %v7269_v12 = vadd.f32 %v7477_v27, %v7268_v10 }
0x257f   :  { %7278 = vst.msk [vmem:[#allocation14 + $0x8] sm:$0xff] %vm183_vm4, %v7274_v0 }
0x2580   :  { %7277 = vst.msk [vmem:[#allocation14] sm:$0xff] %vm183_vm4, %v7269_v12 }
0x2581   :  { %8688 = shalt.err (!%p8685_p4)
}
0x2582   :  { %s9995_s5 = sld [smem:[#allocation30_spill]] }
0x2588   :  { %s8689_s25 = scalar_lea.hbm %s9995_s5, 256 }
0x2589   :  { %p8690_p5 = scmp.ne.s32.totalorder %s9995_s5, %s8689_s25  ;;  %p8693_p6 = scmp.lt.u32.totalorder %s8689_s25, %s9995_s5 }
0x258b   :  { %p8695_p7 = pnand %p8693_p6, %p8690_p5 }
0x258d   :  { %8698 = shalt.err (!%p8695_p7)
}
0x258e   :  { %s9996_s30 = smov 128  }
0x258f   :  { %7290 = dma.vmem_to_hbm [thread:$0]  %s7285_s27, 256, %s9995_s5, [#allocation4], %s9996_s30, %s9996_s30, %s9992_s3  }
0x2590   :  { %8707 = dma.done.wait [#allocation4], 256  }
0x2591   :  { %8708 = vsyncadd [#allocation4], 4294967040 }
0x2592   :  { %7294 = vsyncpa [#allocation3], 1 }
0x2593   :  { %7295 = vsyncpa [#allocation6], 1 }
0x2594   :  { %7296 = vsyncpa [#allocation9], 1 }
0x2595   :  { %7297 = vsyncpa [#allocation12], 1 }
0x2596   :  { %7298 = vsyncpa [#allocation4], 1 }

</bundles_post_ra>
